<compile_context>
chip_gen: v5e
topology: v5e:2x2
jax: 0.10.0
libtpu: 0.0.40
codegen_flags: <defaults>
</compile_context>

<pallas_src>
import functools

import jax
import jax.numpy as jnp
from jax.experimental import pallas as pl
from jax.experimental.pallas import tpu as pltpu

KH, STRIDE, PAD = 6, 3, 1
BN_EPS = 1e-5
LANE = 128
ROW_ALIGN = 16  # bf16 sublane packing (also satisfies the f32 8-row rule)


def _round_up(x, m):
    return (x + m - 1) // m * m


# ----------------------------- Pallas kernel --------------------------------
def _fused_matmul_kernel(x_ref, w_ref, b_ref, o_ref, *, apply_relu):
    # x: (tm, K) bf16, w: (K, Co) bf16, b: (1, Co) f32 -> o: (tm, Co) f32.
    acc = jnp.dot(x_ref[...], w_ref[...], preferred_element_type=jnp.float32)
    y = acc + b_ref[...]
    if apply_relu:
        y = jnp.maximum(y, 0.0)
    o_ref[...] = y


def fused_matmul(x, w, bias, *, apply_relu, tm=256):
    """ReLU?( x @ w + bias ), M tiled over a parallel grid axis.

    x/w are cast to bf16 for the MXU; accumulate + epilogue are f32.
    Weight/bias blocks are VMEM-resident across all M tiles.
    """
    M, K = x.shape
    K2, Co = w.shape
    assert K == K2
    # Row tile: multiple of 16 (bf16 sublane); pad M so every tile is full.
    tm = min(tm, _round_up(M, ROW_ALIGN))
    Mp = _round_up(M, tm)
    if Mp != M:
        x = jnp.pad(x, ((0, Mp - M), (0, 0)))
    xb = x.astype(jnp.bfloat16)
    wb = w.astype(jnp.bfloat16)
    b2 = bias.reshape(1, Co).astype(jnp.float32)

    kern = functools.partial(_fused_matmul_kernel, apply_relu=apply_relu)
    out = pl.pallas_call(
        kern,
        out_shape=jax.ShapeDtypeStruct((Mp, Co), jnp.float32),
        grid=(Mp // tm,),
        in_specs=[
            pl.BlockSpec((tm, K), lambda i: (i, 0)),   # activation tile (pipelined)
            pl.BlockSpec((K, Co), lambda i: (0, 0)),   # weights: VMEM-resident
            pl.BlockSpec((1, Co), lambda i: (0, 0)),   # bias: VMEM-resident
        ],
        out_specs=pl.BlockSpec((tm, Co), lambda i: (i, 0)),
        compiler_params=pltpu.CompilerParams(
            dimension_semantics=("parallel",)),
    )(xb, wb, b2)
    return out[:M]


# ------------------------------- JAX glue ------------------------------------
def _im2col_h(x_nhwc):
    """im2col only along H (kernel (6,1), stride (3,1), pad (1,0)).

    Built from KH static strided slices (cheap XLA slices, no gather)."""
    N, H, W, C = x_nhwc.shape
    xp = jnp.pad(x_nhwc, ((0, 0), (PAD, PAD), (0, 0), (0, 0)))
    Hp = H + 2 * PAD
    Ho = (Hp - KH) // STRIDE + 1
    taps = [
        xp[:, kh: kh + (Ho - 1) * STRIDE + 1: STRIDE, :, :]  # (N, Ho, W, C)
        for kh in range(KH)
    ]
    patches = jnp.stack(taps, axis=-1)                 # (N, Ho, W, C, KH)
    return patches.reshape(N * Ho * W, C * KH), Ho


def conv_bn_relu(x_nhwc, layer_params):
    w, b, gamma, beta, mean, var = layer_params        # w: (Co, Ci, 6, 1)
    Co, Ci = w.shape[0], w.shape[1]
    N, H, W, _ = x_nhwc.shape
    patches, Ho = _im2col_h(x_nhwc)                    # (N*Ho*W, Ci*KH)
    wmat = jnp.transpose(w[:, :, :, 0].reshape(Co, Ci * KH))  # (Ci*KH, Co)
    # fold conv bias + eval-mode BatchNorm: scale goes into the weights,
    # shift becomes the kernel bias.
    s = gamma / jnp.sqrt(var + BN_EPS)                 # (Co,)
    wmat = wmat * s[None, :]                           # weight-sized prescale
    t = beta + (b - mean) * s
    out = fused_matmul(patches, wmat, t, apply_relu=True)  # (N*Ho*W, Co) f32
    return out.reshape(N, Ho, W, Co)


def cnn_forward(x_nchw, params):
    x = jnp.transpose(x_nchw, (0, 2, 3, 1))            # NCHW -> NHWC
    x = conv_bn_relu(x, params["layer1"])
    x = conv_bn_relu(x, params["layer2"])
    x = conv_bn_relu(x, params["layer3"])
    # flatten in PyTorch NCHW view order: feature index = c*H*W + h*W + w
    x_nchw_out = jnp.transpose(x, (0, 3, 1, 2))
    N = x_nchw_out.shape[0]
    feat = x_nchw_out.reshape(N, -1)
    wfc, bfc = params["fc"]                            # (classes, D), (classes,)
    num_classes, D = wfc.shape
    # Lane-dense FC: pad class dim to a multiple of 128, slice back after.
    Cp = _round_up(num_classes, LANE)
    wpad = jnp.zeros((D, Cp), jnp.float32).at[:, :num_classes].set(
        jnp.transpose(wfc))
    bpad = jnp.zeros((Cp,), jnp.float32).at[:num_classes].set(bfc)
    out = fused_matmul(feat, wpad, bpad, apply_relu=False)[:, :num_classes]
    return feat, out                                   # matches torch: (x, out)


# ---------------------------- parameter init ---------------------------------
def init_params(key, input_channel, num_classes, fc_in):
    def conv_bn(k, ci, co):
        k1, k2, k3, k4, k5, k6 = jax.random.split(k, 6)
        w = jax.random.normal(k1, (co, ci, KH, 1), jnp.float32) * 0.05
        b = jax.random.normal(k2, (co,), jnp.float32) * 0.01
        gamma = 1.0 + 0.1 * jax.random.normal(k3, (co,), jnp.float32)
        beta = 0.1 * jax.random.normal(k4, (co,), jnp.float32)
        mean = 0.1 * jax.random.normal(k5, (co,), jnp.float32)
        var = 0.9 + 0.1 * jnp.abs(jax.random.normal(k6, (co,), jnp.float32))
        return (w, b, gamma, beta, mean, var)

    k1, k2, k3, k4, k5 = jax.random.split(key, 5)
    return {
        "layer1": conv_bn(k1, input_channel, 64),
        "layer2": conv_bn(k2, 64, 128),
        "layer3": conv_bn(k3, 128, 256),
        "fc": (
            jax.random.normal(k4, (num_classes, fc_in), jnp.float32) * 0.01,
            jax.random.normal(k5, (num_classes,), jnp.float32) * 0.01,
        ),
    }


# --------------------------------- main ---------------------------------------
if __name__ == "__main__":
    key = jax.random.PRNGKey(0)
    kx, kp = jax.random.split(key)

    # Small PAMAP2-like input: N=2, C_in=4, H(time)=40, W(sensor)=9.
    N, Cin, H, W = 2, 4, 40, 9
    num_classes = 12
    x = jax.random.normal(kx, (N, Cin, H, W), jnp.float32)

    def out_h(h):
        return (h + 2 * PAD - KH) // STRIDE + 1

    H3 = out_h(out_h(out_h(H)))
    # Original module hardcodes 36864 (= 256 * H3 * W for the real dataset size);
    # here the fc in_features is derived from the small demo shape.
    fc_in = 256 * H3 * W

    params = init_params(kp, Cin, num_classes, fc_in)

    feat, logits = jax.jit(cnn_forward)(x, params)
    jax.block_until_ready((feat, logits))

    assert feat.shape == (N, fc_in)
    assert logits.shape == (N, num_classes)
    print("KERNEL_OK")
</pallas_src>

<mosaic_0001>
module attributes {stable_mosaic.version = 11 : i64} {
  func.func @_fused_matmul_kernel(%arg0: i32, %arg1: memref<240x24xbf16, #tpu.memory_space<vmem>>, %arg2: memref<24x64xbf16, #tpu.memory_space<vmem>>, %arg3: memref<1x64xf32, #tpu.memory_space<vmem>>, %arg4: memref<240x64xf32, #tpu.memory_space<vmem>>) attributes {dimension_semantics = [#tpu.dimension_semantics<parallel>], iteration_bounds = array<i64: 1>, scalar_prefetch = 0 : i64, scratch_operands = 0 : i64, tpu.core_type = #tpu.core_type<tc>, window_params = [{transform_indices = @transform_0, window_bounds = array<i64: 240, 24>}, {pipeline_mode = #tpu.pipeline_mode<synchronous>, transform_indices = @transform_1, window_bounds = array<i64: 24, 64>}, {pipeline_mode = #tpu.pipeline_mode<synchronous>, transform_indices = @transform_2, window_bounds = array<i64: 1, 64>}, {transform_indices = @transform_3, window_bounds = array<i64: 240, 64>}]} {
    %c0 = arith.constant 0 : index
    %c0_0 = arith.constant 0 : index
    %0 = vector.load %arg1[%c0, %c0_0] : memref<240x24xbf16, #tpu.memory_space<vmem>>, vector<240x24xbf16>
    %c0_1 = arith.constant 0 : index
    %c0_2 = arith.constant 0 : index
    %1 = vector.load %arg2[%c0_1, %c0_2] : memref<24x64xbf16, #tpu.memory_space<vmem>>, vector<24x64xbf16>
    %cst = arith.constant dense<0.000000e+00> : vector<240x64xf32>
    %2 = tpu.matmul %0, %1, %cst {dimension_numbers = #tpu.dot_dimension_numbers<[1], [0], [0], [1], [0, 0, 1, 1], [], []>} : vector<240x24xbf16>, vector<24x64xbf16>, vector<240x64xf32> -> vector<240x64xf32>
    %c0_3 = arith.constant 0 : index
    %c0_4 = arith.constant 0 : index
    %3 = vector.load %arg3[%c0_3, %c0_4] : memref<1x64xf32, #tpu.memory_space<vmem>>, vector<1x64xf32>
    %4 = vector.broadcast %3 : vector<1x64xf32> to vector<240x64xf32>
    %5 = arith.addf %2, %4 : vector<240x64xf32>
    %cst_5 = arith.constant 0.000000e+00 : f32
    %6 = vector.broadcast %cst_5 : f32 to vector<240x64xf32>
    %7 = arith.maximumf %5, %6 : vector<240x64xf32>
    %c0_6 = arith.constant 0 : index
    %c0_7 = arith.constant 0 : index
    %8 = vector.load %arg4[%c0_6, %c0_7] : memref<240x64xf32, #tpu.memory_space<vmem>>, vector<240x64xf32>
    tpu.vector_store %arg4[%c0_6, %c0_7], %7 {strides = array<i32>} : memref<240x64xf32, #tpu.memory_space<vmem>>, vector<240x64xf32>,
    return
  }
  func.func @transform_0(%arg0: i32) -> (i32, i32) {
    %c0_i32 = arith.constant 0 : i32
    %c0_i32_0 = arith.constant 0 : i32
    return %arg0, %c0_i32 : i32, i32
  }
  func.func @transform_1(%arg0: i32) -> (i32, i32) {
    %c0_i32 = arith.constant 0 : i32
    %c0_i32_0 = arith.constant 0 : i32
    %c0_i32_1 = arith.constant 0 : i32
    return %c0_i32, %c0_i32_0 : i32, i32
  }
  func.func @transform_2(%arg0: i32) -> (i32, i32) {
    %c0_i32 = arith.constant 0 : i32
    %c0_i32_0 = arith.constant 0 : i32
    %c0_i32_1 = arith.constant 0 : i32
    return %c0_i32, %c0_i32_0 : i32, i32
  }
  func.func @transform_3(%arg0: i32) -> (i32, i32) {
    %c0_i32 = arith.constant 0 : i32
    %c0_i32_0 = arith.constant 0 : i32
    return %arg0, %c0_i32 : i32, i32
  }
}

module attributes {stable_mosaic.version = 11 : i64} {
  func.func @_fused_matmul_kernel(%arg0: i32, %arg1: memref<80x384xbf16, #tpu.memory_space<vmem>>, %arg2: memref<384x128xbf16, #tpu.memory_space<vmem>>, %arg3: memref<1x128xf32, #tpu.memory_space<vmem>>, %arg4: memref<80x128xf32, #tpu.memory_space<vmem>>) attributes {dimension_semantics = [#tpu.dimension_semantics<parallel>], iteration_bounds = array<i64: 1>, scalar_prefetch = 0 : i64, scratch_operands = 0 : i64, tpu.core_type = #tpu.core_type<tc>, window_params = [{transform_indices = @transform_0, window_bounds = array<i64: 80, 384>}, {pipeline_mode = #tpu.pipeline_mode<synchronous>, transform_indices = @transform_1, window_bounds = array<i64: 384, 128>}, {pipeline_mode = #tpu.pipeline_mode<synchronous>, transform_indices = @transform_2, window_bounds = array<i64: 1, 128>}, {transform_indices = @transform_3, window_bounds = array<i64: 80, 128>}]} {
    %c0 = arith.constant 0 : index
    %c0_0 = arith.constant 0 : index
    %0 = vector.load %arg1[%c0, %c0_0] : memref<80x384xbf16, #tpu.memory_space<vmem>>, vector<80x384xbf16>
    %c0_1 = arith.constant 0 : index
    %c0_2 = arith.constant 0 : index
    %1 = vector.load %arg2[%c0_1, %c0_2] : memref<384x128xbf16, #tpu.memory_space<vmem>>, vector<384x128xbf16>
    %cst = arith.constant dense<0.000000e+00> : vector<80x128xf32>
    %2 = tpu.matmul %0, %1, %cst {dimension_numbers = #tpu.dot_dimension_numbers<[1], [0], [0], [1], [0, 0, 1, 1], [], []>} : vector<80x384xbf16>, vector<384x128xbf16>, vector<80x128xf32> -> vector<80x128xf32>
    %c0_3 = arith.constant 0 : index
    %c0_4 = arith.constant 0 : index
    %3 = vector.load %arg3[%c0_3, %c0_4] : memref<1x128xf32, #tpu.memory_space<vmem>>, vector<1x128xf32>
    %4 = vector.broadcast %3 : vector<1x128xf32> to vector<80x128xf32>
    %5 = arith.addf %2, %4 : vector<80x128xf32>
    %cst_5 = arith.constant 0.000000e+00 : f32
    %6 = vector.broadcast %cst_5 : f32 to vector<80x128xf32>
    %7 = arith.maximumf %5, %6 : vector<80x128xf32>
    %c0_6 = arith.constant 0 : index
    %c0_7 = arith.constant 0 : index
    %8 = vector.load %arg4[%c0_6, %c0_7] : memref<80x128xf32, #tpu.memory_space<vmem>>, vector<80x128xf32>
    tpu.vector_store %arg4[%c0_6, %c0_7], %7 {strides = array<i32>} : memref<80x128xf32, #tpu.memory_space<vmem>>, vector<80x128xf32>,
    return
  }
  func.func @transform_0(%arg0: i32) -> (i32, i32) {
    %c0_i32 = arith.constant 0 : i32
    %c0_i32_0 = arith.constant 0 : i32
    return %arg0, %c0_i32 : i32, i32
  }
  func.func @transform_1(%arg0: i32) -> (i32, i32) {
    %c0_i32 = arith.constant 0 : i32
    %c0_i32_0 = arith.constant 0 : i32
    %c0_i32_1 = arith.constant 0 : i32
    return %c0_i32, %c0_i32_0 : i32, i32
  }
  func.func @transform_2(%arg0: i32) -> (i32, i32) {
    %c0_i32 = arith.constant 0 : i32
    %c0_i32_0 = arith.constant 0 : i32
    %c0_i32_1 = arith.constant 0 : i32
    return %c0_i32, %c0_i32_0 : i32, i32
  }
  func.func @transform_3(%arg0: i32) -> (i32, i32) {
    %c0_i32 = arith.constant 0 : i32
    %c0_i32_0 = arith.constant 0 : i32
    return %arg0, %c0_i32 : i32, i32
  }
}

module attributes {stable_mosaic.version = 11 : i64} {
  func.func @_fused_matmul_kernel(%arg0: i32, %arg1: memref<32x768xbf16, #tpu.memory_space<vmem>>, %arg2: memref<768x256xbf16, #tpu.memory_space<vmem>>, %arg3: memref<1x256xf32, #tpu.memory_space<vmem>>, %arg4: memref<32x256xf32, #tpu.memory_space<vmem>>) attributes {dimension_semantics = [#tpu.dimension_semantics<parallel>], iteration_bounds = array<i64: 1>, scalar_prefetch = 0 : i64, scratch_operands = 0 : i64, tpu.core_type = #tpu.core_type<tc>, window_params = [{transform_indices = @transform_0, window_bounds = array<i64: 32, 768>}, {pipeline_mode = #tpu.pipeline_mode<synchronous>, transform_indices = @transform_1, window_bounds = array<i64: 768, 256>}, {pipeline_mode = #tpu.pipeline_mode<synchronous>, transform_indices = @transform_2, window_bounds = array<i64: 1, 256>}, {transform_indices = @transform_3, window_bounds = array<i64: 32, 256>}]} {
    %c0 = arith.constant 0 : index
    %c0_0 = arith.constant 0 : index
    %0 = vector.load %arg1[%c0, %c0_0] : memref<32x768xbf16, #tpu.memory_space<vmem>>, vector<32x768xbf16>
    %c0_1 = arith.constant 0 : index
    %c0_2 = arith.constant 0 : index
    %1 = vector.load %arg2[%c0_1, %c0_2] : memref<768x256xbf16, #tpu.memory_space<vmem>>, vector<768x256xbf16>
    %cst = arith.constant dense<0.000000e+00> : vector<32x256xf32>
    %2 = tpu.matmul %0, %1, %cst {dimension_numbers = #tpu.dot_dimension_numbers<[1], [0], [0], [1], [0, 0, 1, 1], [], []>} : vector<32x768xbf16>, vector<768x256xbf16>, vector<32x256xf32> -> vector<32x256xf32>
    %c0_3 = arith.constant 0 : index
    %c0_4 = arith.constant 0 : index
    %3 = vector.load %arg3[%c0_3, %c0_4] : memref<1x256xf32, #tpu.memory_space<vmem>>, vector<1x256xf32>
    %4 = vector.broadcast %3 : vector<1x256xf32> to vector<32x256xf32>
    %5 = arith.addf %2, %4 : vector<32x256xf32>
    %cst_5 = arith.constant 0.000000e+00 : f32
    %6 = vector.broadcast %cst_5 : f32 to vector<32x256xf32>
    %7 = arith.maximumf %5, %6 : vector<32x256xf32>
    %c0_6 = arith.constant 0 : index
    %c0_7 = arith.constant 0 : index
    %8 = vector.load %arg4[%c0_6, %c0_7] : memref<32x256xf32, #tpu.memory_space<vmem>>, vector<32x256xf32>
    tpu.vector_store %arg4[%c0_6, %c0_7], %7 {strides = array<i32>} : memref<32x256xf32, #tpu.memory_space<vmem>>, vector<32x256xf32>,
    return
  }
  func.func @transform_0(%arg0: i32) -> (i32, i32) {
    %c0_i32 = arith.constant 0 : i32
    %c0_i32_0 = arith.constant 0 : i32
    return %arg0, %c0_i32 : i32, i32
  }
  func.func @transform_1(%arg0: i32) -> (i32, i32) {
    %c0_i32 = arith.constant 0 : i32
    %c0_i32_0 = arith.constant 0 : i32
    %c0_i32_1 = arith.constant 0 : i32
    return %c0_i32, %c0_i32_0 : i32, i32
  }
  func.func @transform_2(%arg0: i32) -> (i32, i32) {
    %c0_i32 = arith.constant 0 : i32
    %c0_i32_0 = arith.constant 0 : i32
    %c0_i32_1 = arith.constant 0 : i32
    return %c0_i32, %c0_i32_0 : i32, i32
  }
  func.func @transform_3(%arg0: i32) -> (i32, i32) {
    %c0_i32 = arith.constant 0 : i32
    %c0_i32_0 = arith.constant 0 : i32
    return %arg0, %c0_i32 : i32, i32
  }
}

module attributes {stable_mosaic.version = 11 : i64} {
  func.func @_fused_matmul_kernel(%arg0: i32, %arg1: memref<16x2304xbf16, #tpu.memory_space<vmem>>, %arg2: memref<2304x128xbf16, #tpu.memory_space<vmem>>, %arg3: memref<1x128xf32, #tpu.memory_space<vmem>>, %arg4: memref<16x128xf32, #tpu.memory_space<vmem>>) attributes {dimension_semantics = [#tpu.dimension_semantics<parallel>], iteration_bounds = array<i64: 1>, scalar_prefetch = 0 : i64, scratch_operands = 0 : i64, tpu.core_type = #tpu.core_type<tc>, window_params = [{transform_indices = @transform_0, window_bounds = array<i64: 16, 2304>}, {pipeline_mode = #tpu.pipeline_mode<synchronous>, transform_indices = @transform_1, window_bounds = array<i64: 2304, 128>}, {pipeline_mode = #tpu.pipeline_mode<synchronous>, transform_indices = @transform_2, window_bounds = array<i64: 1, 128>}, {transform_indices = @transform_3, window_bounds = array<i64: 16, 128>}]} {
    %c0 = arith.constant 0 : index
    %c0_0 = arith.constant 0 : index
    %0 = vector.load %arg1[%c0, %c0_0] : memref<16x2304xbf16, #tpu.memory_space<vmem>>, vector<16x2304xbf16>
    %c0_1 = arith.constant 0 : index
    %c0_2 = arith.constant 0 : index
    %1 = vector.load %arg2[%c0_1, %c0_2] : memref<2304x128xbf16, #tpu.memory_space<vmem>>, vector<2304x128xbf16>
    %cst = arith.constant dense<0.000000e+00> : vector<16x128xf32>
    %2 = tpu.matmul %0, %1, %cst {dimension_numbers = #tpu.dot_dimension_numbers<[1], [0], [0], [1], [0, 0, 1, 1], [], []>} : vector<16x2304xbf16>, vector<2304x128xbf16>, vector<16x128xf32> -> vector<16x128xf32>
    %c0_3 = arith.constant 0 : index
    %c0_4 = arith.constant 0 : index
    %3 = vector.load %arg3[%c0_3, %c0_4] : memref<1x128xf32, #tpu.memory_space<vmem>>, vector<1x128xf32>
    %4 = vector.broadcast %3 : vector<1x128xf32> to vector<16x128xf32>
    %5 = arith.addf %2, %4 : vector<16x128xf32>
    %c0_5 = arith.constant 0 : index
    %c0_6 = arith.constant 0 : index
    %6 = vector.load %arg4[%c0_5, %c0_6] : memref<16x128xf32, #tpu.memory_space<vmem>>, vector<16x128xf32>
    tpu.vector_store %arg4[%c0_5, %c0_6], %5 {strides = array<i32>} : memref<16x128xf32, #tpu.memory_space<vmem>>, vector<16x128xf32>,
    return
  }
  func.func @transform_0(%arg0: i32) -> (i32, i32) {
    %c0_i32 = arith.constant 0 : i32
    %c0_i32_0 = arith.constant 0 : i32
    return %arg0, %c0_i32 : i32, i32
  }
  func.func @transform_1(%arg0: i32) -> (i32, i32) {
    %c0_i32 = arith.constant 0 : i32
    %c0_i32_0 = arith.constant 0 : i32
    %c0_i32_1 = arith.constant 0 : i32
    return %c0_i32, %c0_i32_0 : i32, i32
  }
  func.func @transform_2(%arg0: i32) -> (i32, i32) {
    %c0_i32 = arith.constant 0 : i32
    %c0_i32_0 = arith.constant 0 : i32
    %c0_i32_1 = arith.constant 0 : i32
    return %c0_i32, %c0_i32_0 : i32, i32
  }
  func.func @transform_3(%arg0: i32) -> (i32, i32) {
    %c0_i32 = arith.constant 0 : i32
    %c0_i32_0 = arith.constant 0 : i32
    return %arg0, %c0_i32 : i32, i32
  }
}

</mosaic_0001>

<bundles_post_ra>
// kernel: cnn_forward.4
= control target key start
LH: loop header
LB: loop body
LE: loop exit
PB: predicated region body
PF: predicated region fallthrough
CT: control target
= control target key end

     0   :  { %vm182_vm0 = vcmask 1043456   ;;  %vm136_vm1 = vcmask 195584   ;;  %vm300_vm2 = vcmask 523264   ;;  %s678_s1 = inlined_call_operand.vmem [shape: bf16[24,64], index: 1, kind: input, shape index: {}]   ;;  %s679_s2 = inlined_call_operand.vmem [shape: f32[1,64], index: 2, kind: input, shape index: {}]   ;;  %s680_s0 = inlined_call_operand.vmem [shape: bf16[240,24], index: 0, kind: input, shape index: {}]   ;;  %s681_s3 = inlined_call_operand.vmem [shape: f32[240,64], index: 3, kind: output, shape index: {}]  }
   0x1   :  { %v47_v0 = vld [vmem:[%s678_s1 + $0x8] sm:$0xf]  ;;  %v429_v4 = vld [vmem:[%s678_s1] sm:$0xff]  ;;  %v416_v13 = vld [vmem:[%s680_s0 + $0x10] sm:$0xff] }
   0x2   :  { %v132_v1 = vunpack.c.l.b16 %v47_v0  ;;  %v414_v5 = vld [vmem:[%s680_s0] sm:$0xff]  ;;  %v415_v9 = vld [vmem:[%s680_s0 + $0x8] sm:$0xff]  ;;  %v420_v14 = vld [vmem:[%s680_s0 + $0x30] sm:$0xff] }
   0x3   :  { %v418_v6 = vld [vmem:[%s680_s0 + $0x20] sm:$0xff]  ;;  %v419_v10 = vld [vmem:[%s680_s0 + $0x28] sm:$0xff]  ;;  %v424_v15 = vld [vmem:[%s680_s0 + $0x50] sm:$0xff] }
   0x4   :  { %v134_v2 = vpack.c.b16 %v132_v1, %v132_v1  ;;  %v422_v7 = vld [vmem:[%s680_s0 + $0x40] sm:$0xff]  ;;  %v423_v11 = vld [vmem:[%s680_s0 + $0x48] sm:$0xff]  ;;  %v428_v16 = vld [vmem:[%s680_s0 + $0x70] sm:$0xff] }
   0x5   :  { %v426_v8 = vld [vmem:[%s680_s0 + $0x60] sm:$0xff]  ;;  %v427_v12 = vld [vmem:[%s680_s0 + $0x68] sm:$0xff]  ;;  %v417_v17 = vld [vmem:[%s680_s0 + $0x18] sm:$0xff] }
   0x6   :  { %v184_v3 = vsel %vm182_vm0, %v134_v2, 0  ;;  %v421_v18 = vld [vmem:[%s680_s0 + $0x38] sm:$0xff]  ;;  %v526_v20 = vld [vmem:[%s679_s2] ss:$0 sm:$0xff] }
   0x7   :  { %192 = vmatpush.bf16.msra.mxu0 %v184_v3  ;;  %430 = vmatpush.bf16.msra.mxu1 %v184_v3  ;;  %v425_v19 = vld [vmem:[%s680_s0 + $0x58] sm:$0xff] }
   0x8   :  { %431 = vmatpush.bf16.msra.mxu2 %v184_v3  ;;  %432 = vmatpush.bf16.msra.mxu3 %v184_v3 }
   0xb   :  { %193 = vmatpush.bf16.msra.mxu0 %v429_v4  ;;  %433 = vmatpush.bf16.msra.mxu1 %v429_v4 }
   0xc   :  { %434 = vmatpush.bf16.msra.mxu2 %v429_v4  ;;  %435 = vmatpush.bf16.msra.mxu3 %v429_v4 }
   0xe   :  { %399 = vmatmul.msk.bf16.vlgmr.msra.gmra.mxu0 %vm136_vm1, %v414_v5  ;;  %403 = vmatmul.msk.bf16.vlgmr.msra.gmra.mxu1 %vm136_vm1, %v418_v6 }
   0xf   :  { %407 = vmatmul.msk.bf16.vlgmr.msra.gmra.mxu2 %vm136_vm1, %v422_v7  ;;  %411 = vmatmul.msk.bf16.vlgmr.msra.gmra.mxu3 %vm136_vm1, %v426_v8 }
  0x1e   :  { %400 = vmatmul.msk.bf16.gmra.mxu0 %vm136_vm1, %v415_v9  ;;  %404 = vmatmul.msk.bf16.gmra.mxu1 %vm136_vm1, %v419_v10 }
  0x1f   :  { %408 = vmatmul.msk.bf16.gmra.mxu2 %vm136_vm1, %v423_v11  ;;  %412 = vmatmul.msk.bf16.gmra.mxu3 %vm136_vm1, %v427_v12 }
  0x2e   :  { %401 = vmatmul.msk.bf16.gmra.mxu0 %vm136_vm1, %v416_v13  ;;  %405 = vmatmul.msk.bf16.gmra.mxu1 %vm136_vm1, %v420_v14 }
  0x2f   :  { %409 = vmatmul.msk.bf16.gmra.mxu2 %vm136_vm1, %v424_v15  ;;  %413 = vmatmul.msk.bf16.gmra.mxu3 %vm136_vm1, %v428_v16 }
  0x3e   :  { %402 = vmatmul.msk.bf16.gmra.mxu0 %vm136_vm1, %v417_v17  ;;  %406 = vmatmul.msk.bf16.gmra.mxu1 %vm136_vm1, %v421_v18 }
  0x3f   :  { %410 = vmatmul.msk.bf16.gmra.mxu2 %vm136_vm1, %v425_v19 }
  0x8b   :  { %v195_v21 = vpop.f32.mrf.mxu0  ;;  %v215_v22 = vpop.f32.mrf.mxu1 }
  0x8c   :  { %v196_v23 = vadd.f32 %v526_v20, %v195_v21  ;;  %v216_v24 = vadd.f32 %v526_v20, %v215_v22 }
  0x8e   :  { %v270_v25 = vmax.f32 %v196_v23, 0.0  ;;  %v278_v26 = vmax.f32 %v216_v24, 0.0 }
  0x90   :  { %301 = vst.msk [vmem:[%s681_s3] sm:$0xff] %vm300_vm2, %v270_v25 }
  0x91   :  { %309 = vst.msk [vmem:[%s681_s3 + $0x40] sm:$0xff] %vm300_vm2, %v278_v26 }
  0x92   :  { %v235_v27 = vpop.f32.mrf.mxu2  ;;  %v255_v28 = vpop.f32.mrf.mxu3 }
  0x93   :  { %v236_v29 = vadd.f32 %v526_v20, %v235_v27  ;;  %v197_v30 = vpop.f32.mrf.mxu0  ;;  %v217_v31 = vpop.f32.mrf.mxu1  ;;  %v256_v32 = vadd.f32 %v526_v20, %v255_v28 }
  0x94   :  { %v198_v33 = vadd.f32 %v526_v20, %v197_v30  ;;  %v218_v34 = vadd.f32 %v526_v20, %v217_v31 }
  0x95   :  { %v286_v35 = vmax.f32 %v236_v29, 0.0  ;;  %v294_v38 = vmax.f32 %v256_v32, 0.0 }
  0x96   :  { %v271_v36 = vmax.f32 %v198_v33, 0.0  ;;  %v279_v37 = vmax.f32 %v218_v34, 0.0 }
  0x97   :  { %317 = vst.msk [vmem:[%s681_s3 + $0x80] sm:$0xff] %vm300_vm2, %v286_v35 }
  0x98   :  { %302 = vst.msk [vmem:[%s681_s3 + $0x8] sm:$0xff] %vm300_vm2, %v271_v36 }
  0x99   :  { %310 = vst.msk [vmem:[%s681_s3 + $0x48] sm:$0xff] %vm300_vm2, %v279_v37 }
  0x9a   :  { %v237_v39 = vpop.f32.mrf.mxu2  ;;  %325 = vst.msk [vmem:[%s681_s3 + $0xc0] sm:$0xff] %vm300_vm2, %v294_v38  ;;  %v257_v40 = vpop.f32.mrf.mxu3 }
  0x9b   :  { %v238_v41 = vadd.f32 %v526_v20, %v237_v39  ;;  %v200_v42 = vpop.f32.mrf.mxu0  ;;  %v220_v43 = vpop.f32.mrf.mxu1  ;;  %v258_v44 = vadd.f32 %v526_v20, %v257_v40 }
  0x9c   :  { %v201_v45 = vadd.f32 %v526_v20, %v200_v42  ;;  %v221_v46 = vadd.f32 %v526_v20, %v220_v43 }
  0x9d   :  { %v287_v47 = vmax.f32 %v238_v41, 0.0  ;;  %v295_v50 = vmax.f32 %v258_v44, 0.0 }
  0x9e   :  { %v272_v48 = vmax.f32 %v201_v45, 0.0  ;;  %v280_v49 = vmax.f32 %v221_v46, 0.0 }
  0x9f   :  { %318 = vst.msk [vmem:[%s681_s3 + $0x88] sm:$0xff] %vm300_vm2, %v287_v47 }
  0xa0   :  { %303 = vst.msk [vmem:[%s681_s3 + $0x10] sm:$0xff] %vm300_vm2, %v272_v48 }
  0xa1   :  { %311 = vst.msk [vmem:[%s681_s3 + $0x50] sm:$0xff] %vm300_vm2, %v280_v49 }
  0xa2   :  { %v240_v51 = vpop.f32.mrf.mxu2  ;;  %326 = vst.msk [vmem:[%s681_s3 + $0xc8] sm:$0xff] %vm300_vm2, %v295_v50  ;;  %v260_v52 = vpop.f32.mrf.mxu3 }
  0xa3   :  { %v241_v53 = vadd.f32 %v526_v20, %v240_v51  ;;  %v202_v54 = vpop.f32.mrf.mxu0  ;;  %v222_v55 = vpop.f32.mrf.mxu1  ;;  %v261_v56 = vadd.f32 %v526_v20, %v260_v52 }
  0xa4   :  { %v203_v57 = vadd.f32 %v526_v20, %v202_v54  ;;  %v223_v58 = vadd.f32 %v526_v20, %v222_v55 }
  0xa5   :  { %v288_v59 = vmax.f32 %v241_v53, 0.0  ;;  %v296_v62 = vmax.f32 %v261_v56, 0.0 }
  0xa6   :  { %v273_v60 = vmax.f32 %v203_v57, 0.0  ;;  %v281_v61 = vmax.f32 %v223_v58, 0.0 }
  0xa7   :  { %319 = vst.msk [vmem:[%s681_s3 + $0x90] sm:$0xff] %vm300_vm2, %v288_v59 }
  0xa8   :  { %304 = vst.msk [vmem:[%s681_s3 + $0x18] sm:$0xff] %vm300_vm2, %v273_v60 }
  0xa9   :  { %312 = vst.msk [vmem:[%s681_s3 + $0x58] sm:$0xff] %vm300_vm2, %v281_v61 }
  0xaa   :  { %v242_v63 = vpop.f32.mrf.mxu2  ;;  %327 = vst.msk [vmem:[%s681_s3 + $0xd0] sm:$0xff] %vm300_vm2, %v296_v62  ;;  %v262_v0 = vpop.f32.mrf.mxu3 }
  0xab   :  { %v243_v1 = vadd.f32 %v526_v20, %v242_v63  ;;  %v205_v2 = vpop.f32.mrf.mxu0  ;;  %v225_v3 = vpop.f32.mrf.mxu1  ;;  %v263_v4 = vadd.f32 %v526_v20, %v262_v0 }
  0xac   :  { %v206_v5 = vadd.f32 %v526_v20, %v205_v2  ;;  %v226_v6 = vadd.f32 %v526_v20, %v225_v3 }
  0xad   :  { %v289_v7 = vmax.f32 %v243_v1, 0.0  ;;  %v297_v10 = vmax.f32 %v263_v4, 0.0 }
  0xae   :  { %v274_v8 = vmax.f32 %v206_v5, 0.0  ;;  %v282_v9 = vmax.f32 %v226_v6, 0.0 }
  0xaf   :  { %320 = vst.msk [vmem:[%s681_s3 + $0x98] sm:$0xff] %vm300_vm2, %v289_v7 }
  0xb0   :  { %305 = vst.msk [vmem:[%s681_s3 + $0x20] sm:$0xff] %vm300_vm2, %v274_v8 }
  0xb1   :  { %313 = vst.msk [vmem:[%s681_s3 + $0x60] sm:$0xff] %vm300_vm2, %v282_v9 }
  0xb2   :  { %v245_v11 = vpop.f32.mrf.mxu2  ;;  %328 = vst.msk [vmem:[%s681_s3 + $0xd8] sm:$0xff] %vm300_vm2, %v297_v10  ;;  %v265_v12 = vpop.f32.mrf.mxu3 }
  0xb3   :  { %v246_v13 = vadd.f32 %v526_v20, %v245_v11  ;;  %v207_v14 = vpop.f32.mrf.mxu0  ;;  %v227_v15 = vpop.f32.mrf.mxu1  ;;  %v266_v16 = vadd.f32 %v526_v20, %v265_v12 }
  0xb4   :  { %v208_v17 = vadd.f32 %v526_v20, %v207_v14  ;;  %v228_v18 = vadd.f32 %v526_v20, %v227_v15 }
  0xb5   :  { %v290_v19 = vmax.f32 %v246_v13, 0.0  ;;  %v298_v23 = vmax.f32 %v266_v16, 0.0 }
  0xb6   :  { %v275_v21 = vmax.f32 %v208_v17, 0.0  ;;  %v283_v22 = vmax.f32 %v228_v18, 0.0 }
  0xb7   :  { %321 = vst.msk [vmem:[%s681_s3 + $0xa0] sm:$0xff] %vm300_vm2, %v290_v19 }
  0xb8   :  { %306 = vst.msk [vmem:[%s681_s3 + $0x28] sm:$0xff] %vm300_vm2, %v275_v21 }
  0xb9   :  { %314 = vst.msk [vmem:[%s681_s3 + $0x68] sm:$0xff] %vm300_vm2, %v283_v22 }
  0xba   :  { %v247_v24 = vpop.f32.mrf.mxu2  ;;  %329 = vst.msk [vmem:[%s681_s3 + $0xe0] sm:$0xff] %vm300_vm2, %v298_v23  ;;  %v267_v25 = vpop.f32.mrf.mxu3 }
  0xbb   :  { %v248_v26 = vadd.f32 %v526_v20, %v247_v24  ;;  %v210_v27 = vpop.f32.mrf.mxu0  ;;  %v230_v28 = vpop.f32.mrf.mxu1  ;;  %v268_v29 = vadd.f32 %v526_v20, %v267_v25 }
  0xbc   :  { %v211_v30 = vadd.f32 %v526_v20, %v210_v27  ;;  %v231_v31 = vadd.f32 %v526_v20, %v230_v28 }
  0xbd   :  { %v291_v32 = vmax.f32 %v248_v26, 0.0  ;;  %v299_v35 = vmax.f32 %v268_v29, 0.0 }
  0xbe   :  { %v276_v33 = vmax.f32 %v211_v30, 0.0  ;;  %v284_v34 = vmax.f32 %v231_v31, 0.0 }
  0xbf   :  { %322 = vst.msk [vmem:[%s681_s3 + $0xa8] sm:$0xff] %vm300_vm2, %v291_v32 }
  0xc0   :  { %307 = vst.msk [vmem:[%s681_s3 + $0x30] sm:$0xff] %vm300_vm2, %v276_v33 }
  0xc1   :  { %315 = vst.msk [vmem:[%s681_s3 + $0x70] sm:$0xff] %vm300_vm2, %v284_v34 }
  0xc2   :  { %v250_v36 = vpop.f32.mrf.mxu2  ;;  %330 = vst.msk [vmem:[%s681_s3 + $0xe8] sm:$0xff] %vm300_vm2, %v299_v35 }
  0xc3   :  { %v251_v37 = vadd.f32 %v526_v20, %v250_v36  ;;  %v212_v38 = vpop.f32.mrf.mxu0  ;;  %v232_v39 = vpop.f32.mrf.mxu1 }
  0xc4   :  { %v213_v40 = vadd.f32 %v526_v20, %v212_v38  ;;  %v233_v41 = vadd.f32 %v526_v20, %v232_v39 }
  0xc5   :  { %v292_v42 = vmax.f32 %v251_v37, 0.0 }
  0xc6   :  { %v277_v43 = vmax.f32 %v213_v40, 0.0  ;;  %v285_v44 = vmax.f32 %v233_v41, 0.0 }
  0xc7   :  { %323 = vst.msk [vmem:[%s681_s3 + $0xb0] sm:$0xff] %vm300_vm2, %v292_v42 }
  0xc8   :  { %308 = vst.msk [vmem:[%s681_s3 + $0x38] sm:$0xff] %vm300_vm2, %v277_v43 }
  0xc9   :  { %316 = vst.msk [vmem:[%s681_s3 + $0x78] sm:$0xff] %vm300_vm2, %v285_v44 }
  0xca   :  { %v252_v45 = vpop.f32.mrf.mxu2 }
  0xcb   :  { %v253_v46 = vadd.f32 %v526_v20, %v252_v45 }
  0xcd   :  { %v293_v47 = vmax.f32 %v253_v46, 0.0 }
  0xcf   :  { %324 = vst.msk [vmem:[%s681_s3 + $0xb8] sm:$0xff] %vm300_vm2, %v293_v47 }

// kernel: cnn_forward.5
= control target key start
LH: loop header
LB: loop body
LE: loop exit
PB: predicated region body
PF: predicated region fallthrough
CT: control target
= control target key end

     0   :  { %s879_s1 = inlined_call_operand.vmem [shape: bf16[384,128], index: 1, kind: input, shape index: {}]   ;;  %s880_s0 = inlined_call_operand.vmem [shape: bf16[80,384], index: 0, kind: input, shape index: {}]   ;;  %s881_s2 = inlined_call_operand.vmem [shape: f32[1,128], index: 2, kind: input, shape index: {}]   ;;  %s882_s3 = inlined_call_operand.vmem [shape: f32[80,128], index: 3, kind: output, shape index: {}]  }
   0x1   :  { %v614_v0 = vld [vmem:[%s879_s1 + $0x38] sm:$0xff]  ;;  %v613_v2 = vld [vmem:[%s879_s1 + $0x30] sm:$0xff]  ;;  %v612_v6 = vld [vmem:[%s879_s1 + $0x28] sm:$0xff] }
   0x2   :  { %v630_v1 = vld [vmem:[%s879_s1 + $0xb8] sm:$0xff]  ;;  %310 = vmatpush.bf16.msra.mxu0 %v614_v0  ;;  %v629_v3 = vld [vmem:[%s879_s1 + $0xb0] sm:$0xff]  ;;  %631 = vmatpush.bf16.msra.mxu3 %v614_v0  ;;  %v628_v7 = vld [vmem:[%s879_s1 + $0xa8] sm:$0xff] }
   0x3   :  { %378 = vmatpush.bf16.msra.mxu2 %v630_v1  ;;  %v622_v4 = vld [vmem:[%s879_s1 + $0x78] sm:$0xff]  ;;  %v686_v5 = vld [vmem:[%s879_s1 + $0x70] sm:$0xff]  ;;  %v620_v8 = vld [vmem:[%s879_s1 + $0x68] sm:$0xff] }
   0x4   :  { %639 = vmatpush.bf16.msra.mxu1 %v622_v4  ;;  %v611_v9 = vld [vmem:[%s879_s1 + $0x20] sm:$0xff]  ;;  %v610_v12 = vld [vmem:[%s879_s1 + $0x18] sm:$0xff]  ;;  %v609_v15 = vld [vmem:[%s879_s1 + $0x10] sm:$0xff] }
   0x5   :  { %v627_v10 = vld [vmem:[%s879_s1 + $0xa0] sm:$0xff]  ;;  %v626_v13 = vld [vmem:[%s879_s1 + $0x98] sm:$0xff]  ;;  %v625_v16 = vld [vmem:[%s879_s1 + $0x90] sm:$0xff] }
   0x6   :  { %311 = vmatpush.bf16.msra.mxu0 %v613_v2  ;;  %632 = vmatpush.bf16.msra.mxu3 %v613_v2  ;;  %v619_v11 = vld [vmem:[%s879_s1 + $0x60] sm:$0xff]  ;;  %v618_v14 = vld [vmem:[%s879_s1 + $0x58] sm:$0xff]  ;;  %v617_v17 = vld [vmem:[%s879_s1 + $0x50] sm:$0xff] }
   0x7   :  { %379 = vmatpush.bf16.msra.mxu2 %v629_v3  ;;  %v608_v18 = vld [vmem:[%s879_s1 + $0x8] sm:$0xff]  ;;  %v607_v21 = vld [vmem:[%s879_s1] sm:$0xff]  ;;  %v594_v24 = vld [vmem:[%s880_s0 + $0x10] sm:$0xf0] }
   0x8   :  { %640 = vmatpush.bf16.msra.mxu1 %v686_v5  ;;  %v624_v19 = vld [vmem:[%s879_s1 + $0x88] sm:$0xff]  ;;  %v623_v22 = vld [vmem:[%s879_s1 + $0x80] sm:$0xff]  ;;  %v450_v27 = vld [vmem:[%s880_s0 + $0x18] sm:$0xf] }
   0x9   :  { %v616_v20 = vld [vmem:[%s879_s1 + $0x48] sm:$0xff]  ;;  %v438_v25 = vld [vmem:[%s880_s0] sm:$0xf]  ;;  %v596_v28 = vld [vmem:[%s880_s0 + $0x20] sm:$0xf0] }
   0xa   :  { %312 = vmatpush.bf16.msra.mxu0 %v612_v6  ;;  %633 = vmatpush.bf16.msra.mxu3 %v612_v6  ;;  %v446_v23 = vld [vmem:[%s880_s0 + $0x8] sm:$0xf]  ;;  %v593_v26 = vld [vmem:[%s880_s0 + $0x8] sm:$0xf0]  ;;  %v615_v29 = vld [vmem:[%s879_s1 + $0x40] sm:$0xff]  ;;  %v451_v34 = vor.u32 %v596_v28, %v450_v27 }
   0xb   :  { %380 = vmatpush.bf16.msra.mxu2 %v628_v7  ;;  %v595_v30 = vld [vmem:[%s880_s0 + $0x1c] sm:$0xf]  ;;  %v452_v31 = vld [vmem:[%s880_s0 + $0x24] sm:$0xf0]  ;;  %v447_v32 = vor.u32 %v594_v24, %v446_v23  ;;  %v439_v33 = vor.u32 %v593_v26, %v438_v25  ;;  %v458_v36 = vld [vmem:[%s880_s0 + $0x20] sm:$0xf] }
   0xc   :  { %641 = vmatpush.bf16.msra.mxu1 %v620_v8  ;;  %v455_v35 = vor.u32 %v595_v30, %v452_v31  ;;  %v597_v37 = vld [vmem:[%s880_s0 + $0x28] sm:$0xf0]  ;;  %v462_v38 = vld [vmem:[%s880_s0 + $0x30] sm:$0xf]  ;;  %v599_v39 = vld [vmem:[%s880_s0 + $0x38] sm:$0xf0] }
   0xd   :  { %v598_v40 = vld [vmem:[%s880_s0 + $0x34] sm:$0xf]  ;;  %v464_v41 = vld [vmem:[%s880_s0 + $0x3c] sm:$0xf0]  ;;  %v459_v42 = vor.u32 %v597_v37, %v458_v36  ;;  %v463_v43 = vor.u32 %v599_v39, %v462_v38  ;;  %v592_v45 = vld [vmem:[%s880_s0 + $0x4] sm:$0xf] }
   0xe   :  { %313 = vmatpush.bf16.msra.mxu0 %v611_v9  ;;  %634 = vmatpush.bf16.msra.mxu3 %v611_v9  ;;  %v467_v44 = vor.u32 %v598_v40, %v464_v41  ;;  %v440_v46 = vld [vmem:[%s880_s0 + $0xc] sm:$0xf0]  ;;  %v470_v48 = vld [vmem:[%s880_s0 + $0x38] sm:$0xf]  ;;  %v600_v49 = vld [vmem:[%s880_s0 + $0x40] sm:$0xf0] }
   0xf   :  { %381 = vmatpush.bf16.msra.mxu2 %v627_v10  ;;  %v443_v47 = vor.u32 %v592_v45, %v440_v46  ;;  %v474_v50 = vld [vmem:[%s880_s0 + $0x48] sm:$0xf]  ;;  %v602_v51 = vld [vmem:[%s880_s0 + $0x50] sm:$0xf0]  ;;  %v601_v52 = vld [vmem:[%s880_s0 + $0x4c] sm:$0xf]  ;;  %v471_v54 = vor.u32 %v600_v49, %v470_v48 }
  0x10   :  { %642 = vmatpush.bf16.msra.mxu1 %v619_v11  ;;  %v476_v53 = vld [vmem:[%s880_s0 + $0x54] sm:$0xf0]  ;;  %v475_v55 = vor.u32 %v602_v51, %v474_v50  ;;  %v482_v57 = vld [vmem:[%s880_s0 + $0x50] sm:$0xf]  ;;  %v603_v58 = vld [vmem:[%s880_s0 + $0x58] sm:$0xf0] }
  0x11   :  { %v479_v56 = vor.u32 %v601_v52, %v476_v53  ;;  %v486_v59 = vld [vmem:[%s880_s0 + $0x60] sm:$0xf]  ;;  %v605_v60 = vld [vmem:[%s880_s0 + $0x68] sm:$0xf0]  ;;  %v604_v61 = vld [vmem:[%s880_s0 + $0x64] sm:$0xf]  ;;  %v483_v63 = vor.u32 %v603_v58, %v482_v57 }
  0x12   :  { %314 = vmatpush.bf16.msra.mxu0 %v610_v12  ;;  %635 = vmatpush.bf16.msra.mxu3 %v610_v12  ;;  %v488_v62 = vld [vmem:[%s880_s0 + $0x6c] sm:$0xf0]  ;;  %v487_v0 = vor.u32 %v605_v60, %v486_v59  ;;  %v494_v2 = vld [vmem:[%s880_s0 + $0x68] sm:$0xf]  ;;  %v606_v3 = vld [vmem:[%s880_s0 + $0x70] sm:$0xf0] }
  0x13   :  { %382 = vmatpush.bf16.msra.mxu2 %v626_v13  ;;  %v491_v1 = vor.u32 %v604_v61, %v488_v62  ;;  %v837_v9 = vld [vmem:[%s881_s2] ss:$0 sm:$0xff] }
  0x14   :  { %643 = vmatpush.bf16.msra.mxu1 %v618_v14 }
  0x16   :  { %315 = vmatpush.bf16.msra.mxu0 %v609_v15  ;;  %636 = vmatpush.bf16.msra.mxu3 %v609_v15 }
  0x17   :  { %383 = vmatpush.bf16.msra.mxu2 %v625_v16 }
  0x18   :  { %644 = vmatpush.bf16.msra.mxu1 %v617_v17 }
  0x1a   :  { %316 = vmatpush.bf16.msra.mxu0 %v608_v18  ;;  %637 = vmatpush.bf16.msra.mxu3 %v608_v18 }
  0x1b   :  { %384 = vmatpush.bf16.msra.mxu2 %v624_v19 }
  0x1c   :  { %645 = vmatpush.bf16.msra.mxu1 %v616_v20 }
  0x1e   :  { %317 = vmatpush.bf16.msra.mxu0 %v607_v21  ;;  %638 = vmatpush.bf16.msra.mxu3 %v607_v21 }
  0x1f   :  { %385 = vmatpush.bf16.msra.mxu2 %v623_v22 }
  0x20   :  { %646 = vmatpush.bf16.msra.mxu1 %v615_v29 }
  0x21   :  { %318 = vmatmul.bf16.vlgmr.msra.gmra.mxu0 %v439_v33  ;;  %323 = vmatmul.bf16.vlgmr.msra.gmra.mxu3 %v451_v34 }
  0x22   :  { %344 = vmatpush.bf16.msrb.mxu0 %v622_v4  ;;  %386 = vmatmul.bf16.vlgmr.msra.gmra.mxu2 %v447_v32  ;;  %v495_v4 = vor.u32 %v606_v3, %v494_v2 }
  0x23   :  { %357 = vmatmul.bf16.vlgmr.msra.gmra.mxu1 %v455_v35 }
  0x26   :  { %345 = vmatpush.bf16.msrb.mxu0 %v686_v5 }
  0x2a   :  { %346 = vmatpush.bf16.msrb.mxu0 %v620_v8 }
  0x2e   :  { %347 = vmatpush.bf16.msrb.mxu0 %v619_v11 }
  0x31   :  { %328 = vmatmul.bf16.gmra.mxu3 %v463_v43 }
  0x32   :  { %348 = vmatpush.bf16.msrb.mxu0 %v618_v14  ;;  %391 = vmatmul.bf16.gmra.mxu2 %v459_v42 }
  0x33   :  { %362 = vmatmul.bf16.gmra.mxu1 %v467_v44 }
  0x36   :  { %349 = vmatpush.bf16.msrb.mxu0 %v617_v17 }
  0x3a   :  { %350 = vmatpush.bf16.msrb.mxu0 %v616_v20 }
  0x3e   :  { %351 = vmatpush.bf16.msrb.mxu0 %v615_v29 }
  0x41   :  { %352 = vmatmul.bf16.vlgmr.msrb.gmra.mxu0 %v443_v47  ;;  %333 = vmatmul.bf16.gmra.mxu3 %v475_v55 }
  0x42   :  { %396 = vmatmul.bf16.gmra.mxu2 %v471_v54 }
  0x43   :  { %367 = vmatmul.bf16.gmra.mxu1 %v479_v56 }
  0x51   :  { %338 = vmatmul.bf16.gmra.mxu3 %v487_v0 }
  0x52   :  { %401 = vmatmul.bf16.gmra.mxu2 %v483_v63 }
  0x53   :  { %372 = vmatmul.bf16.gmra.mxu1 %v491_v1 }
  0x62   :  { %406 = vmatmul.bf16.gmra.mxu2 %v495_v4 }
  0x9e   :  { %v319_v8 = vpop.f32.mrf.mxu0 }
  0x9f   :  { %v320_v22 = vadd.f32 %v837_v9, %v319_v8 }
  0xa0   :  { %v358_v5 = vpop.f32.mrf.mxu1 }
  0xa4   :  { %v324_v7 = vpop.f32.mrf.mxu3 }
  0xa5   :  { %v387_v6 = vpop.f32.mrf.mxu2  ;;  %v325_v12 = vadd.f32 %v837_v9, %v324_v7 }
  0xa6   :  { %v321_v15 = vpop.f32.mrf.mxu0 }
  0xa7   :  { %v359_v14 = vadd.f32 %v358_v5, %v325_v12  ;;  %v322_v32 = vadd.f32 %v837_v9, %v321_v15 }
  0xa8   :  { %v360_v11 = vpop.f32.mrf.mxu1 }
  0xac   :  { %v326_v13 = vpop.f32.mrf.mxu3 }
  0xad   :  { %v389_v10 = vpop.f32.mrf.mxu2  ;;  %v327_v20 = vadd.f32 %v837_v9, %v326_v13 }
  0xaf   :  { %v361_v23 = vadd.f32 %v360_v11, %v327_v20 }
  0xb0   :  { %v363_v19 = vpop.f32.mrf.mxu1 }
  0xb4   :  { %v329_v18 = vpop.f32.mrf.mxu3 }
  0xb5   :  { %v392_v16 = vpop.f32.mrf.mxu2  ;;  %v330_v27 = vadd.f32 %v837_v9, %v329_v18 }
  0xb6   :  { %v393_v17 = vadd.f32 %v392_v16, %v359_v14 }
  0xb7   :  { %v364_v35 = vadd.f32 %v363_v19, %v330_v27 }
  0xb8   :  { %v414_v21 = vmax.f32 %v393_v17, 0.0  ;;  %v365_v34 = vpop.f32.mrf.mxu1 }
  0xba   :  { %424 = vst [vmem:[%s882_s3 + $0x10] sm:$0xff] %v414_v21 }
  0xbc   :  { %v331_v29 = vpop.f32.mrf.mxu3 }
  0xbd   :  { %v394_v26 = vpop.f32.mrf.mxu2  ;;  %v332_v42 = vadd.f32 %v837_v9, %v331_v29 }
  0xbe   :  { %v353_v24 = vpop.f32.mrf.mxu0  ;;  %v395_v28 = vadd.f32 %v394_v26, %v361_v23 }
  0xbf   :  { %v354_v25 = vadd.f32 %v353_v24, %v320_v22  ;;  %v366_v46 = vadd.f32 %v365_v34, %v332_v42 }
  0xc0   :  { %v415_v31 = vmax.f32 %v395_v28, 0.0  ;;  %v368_v45 = vpop.f32.mrf.mxu1 }
  0xc1   :  { %v388_v30 = vadd.f32 %v387_v6, %v354_v25 }
  0xc2   :  { %425 = vst [vmem:[%s882_s3 + $0x18] sm:$0xff] %v415_v31 }
  0xc3   :  { %v412_v33 = vmax.f32 %v388_v30, 0.0 }
  0xc4   :  { %v334_v41 = vpop.f32.mrf.mxu3 }
  0xc5   :  { %422 = vst [vmem:[%s882_s3] sm:$0xff] %v412_v33  ;;  %v397_v38 = vpop.f32.mrf.mxu2  ;;  %v335_v48 = vadd.f32 %v837_v9, %v334_v41 }
  0xc6   :  { %v355_v36 = vpop.f32.mrf.mxu0  ;;  %v398_v39 = vadd.f32 %v397_v38, %v364_v35 }
  0xc7   :  { %v356_v37 = vadd.f32 %v355_v36, %v322_v32  ;;  %v369_v52 = vadd.f32 %v368_v45, %v335_v48 }
  0xc8   :  { %v416_v43 = vmax.f32 %v398_v39, 0.0  ;;  %v370_v53 = vpop.f32.mrf.mxu1 }
  0xc9   :  { %v390_v40 = vadd.f32 %v389_v10, %v356_v37 }
  0xca   :  { %426 = vst [vmem:[%s882_s3 + $0x20] sm:$0xff] %v416_v43 }
  0xcb   :  { %v413_v44 = vmax.f32 %v390_v40, 0.0 }
  0xcc   :  { %v336_v51 = vpop.f32.mrf.mxu3 }
  0xcd   :  { %423 = vst [vmem:[%s882_s3 + $0x8] sm:$0xff] %v413_v44  ;;  %v399_v47 = vpop.f32.mrf.mxu2  ;;  %v337_v56 = vadd.f32 %v837_v9, %v336_v51 }
  0xce   :  { %v400_v49 = vadd.f32 %v399_v47, %v366_v46 }
  0xcf   :  { %v371_v59 = vadd.f32 %v370_v53, %v337_v56 }
  0xd0   :  { %v417_v50 = vmax.f32 %v400_v49, 0.0  ;;  %v373_v63 = vpop.f32.mrf.mxu1 }
  0xd2   :  { %427 = vst [vmem:[%s882_s3 + $0x28] sm:$0xff] %v417_v50 }
  0xd4   :  { %v339_v58 = vpop.f32.mrf.mxu3 }
  0xd5   :  { %v402_v54 = vpop.f32.mrf.mxu2  ;;  %v340_v61 = vadd.f32 %v837_v9, %v339_v58 }
  0xd6   :  { %v403_v55 = vadd.f32 %v402_v54, %v369_v52 }
  0xd7   :  { %v374_v1 = vadd.f32 %v373_v63, %v340_v61 }
  0xd8   :  { %v418_v57 = vmax.f32 %v403_v55, 0.0  ;;  %v375_v7 = vpop.f32.mrf.mxu1 }
  0xda   :  { %428 = vst [vmem:[%s882_s3 + $0x30] sm:$0xff] %v418_v57 }
  0xdc   :  { %v341_v2 = vpop.f32.mrf.mxu3 }
  0xdd   :  { %v404_v60 = vpop.f32.mrf.mxu2  ;;  %v342_v5 = vadd.f32 %v837_v9, %v341_v2 }
  0xde   :  { %v405_v62 = vadd.f32 %v404_v60, %v371_v59 }
  0xdf   :  { %v376_v8 = vadd.f32 %v375_v7, %v342_v5 }
  0xe0   :  { %v419_v0 = vmax.f32 %v405_v62, 0.0 }
  0xe2   :  { %429 = vst [vmem:[%s882_s3 + $0x38] sm:$0xff] %v419_v0 }
  0xe5   :  { %v407_v3 = vpop.f32.mrf.mxu2 }
  0xe6   :  { %v408_v4 = vadd.f32 %v407_v3, %v374_v1 }
  0xe8   :  { %v420_v6 = vmax.f32 %v408_v4, 0.0 }
  0xea   :  { %430 = vst [vmem:[%s882_s3 + $0x40] sm:$0xff] %v420_v6 }
  0xed   :  { %v409_v10 = vpop.f32.mrf.mxu2 }
  0xee   :  { %v410_v11 = vadd.f32 %v409_v10, %v376_v8 }
  0xf0   :  { %v421_v12 = vmax.f32 %v410_v11, 0.0 }
  0xf2   :  { %431 = vst [vmem:[%s882_s3 + $0x48] sm:$0xff] %v421_v12 }

// kernel: squeeze.5
= control target key start
LH: loop header
LB: loop body
LE: loop exit
PB: predicated region body
PF: predicated region fallthrough
CT: control target
= control target key end

     0   :  { %s3848_s0 = inlined_call_operand.vmem [shape: f32[256,128,6,1], index: 0, kind: input, shape index: {}]   ;;  %s3849_s1 = inlined_call_operand.vmem [shape: f32[256,768], index: 1, kind: output, shape index: {}]  }
   0x1   :  { %v2_v0 = vld [vmem:[%s3848_s0] sm:$0x3f]   ;;  %v1280_v1 = vld [vmem:[%s3848_s0 + $0x8] sm:$0x3f]   ;;  %v1282_v2 = vld [vmem:[%s3848_s0 + $0x10] sm:$0x3f]  }
   0x2   :  { %3 = vst [vmem:[%s3849_s1] sm:$0x3f] %v2_v0   ;;  %v1285_v3 = vld [vmem:[%s3848_s0 + $0x18] sm:$0x3f]   ;;  %v1288_v4 = vld [vmem:[%s3848_s0 + $0x20] sm:$0x3f]  }
   0x3   :  { %1281 = vst [vmem:[%s3849_s1 + $0x8] sm:$0x3f] %v1280_v1   ;;  %v1291_v5 = vld [vmem:[%s3848_s0 + $0x28] sm:$0x3f]   ;;  %v1294_v6 = vld [vmem:[%s3848_s0 + $0x30] sm:$0x3f]  }
   0x4   :  { %1283 = vst [vmem:[%s3849_s1 + $0x6] sm:$0x3] %v1282_v2   ;;  %v1296_v7 = vld [vmem:[%s3848_s0 + $0x38] sm:$0x3f]   ;;  %v1298_v8 = vld [vmem:[%s3848_s0 + $0x40] sm:$0x3f]  }
   0x5   :  { %1284 = vst [vmem:[%s3849_s1 + $0xe] sm:$0x3c] %v1282_v2   ;;  %v1300_v9 = vld [vmem:[%s3848_s0 + $0x48] sm:$0x3f]   ;;  %v1302_v10 = vld [vmem:[%s3848_s0 + $0x50] sm:$0x3f]  }
   0x6   :  { %1286 = vst [vmem:[%s3849_s1 + $0xe] sm:$0x3] %v1285_v3   ;;  %v1305_v11 = vld [vmem:[%s3848_s0 + $0x58] sm:$0x3f]   ;;  %v1308_v12 = vld [vmem:[%s3848_s0 + $0x60] sm:$0x3f]  }
   0x7   :  { %1287 = vst [vmem:[%s3849_s1 + $0x16] sm:$0x3c] %v1285_v3   ;;  %v1311_v13 = vld [vmem:[%s3848_s0 + $0x68] sm:$0x3f]   ;;  %v1314_v14 = vld [vmem:[%s3848_s0 + $0x70] sm:$0x3f]  }
   0x8   :  { %1289 = vst [vmem:[%s3849_s1 + $0x14] sm:$0xf] %v1288_v4   ;;  %v1316_v15 = vld [vmem:[%s3848_s0 + $0x78] sm:$0x3f]   ;;  %v1318_v16 = vld [vmem:[%s3848_s0 + $0x80] sm:$0x3f]  }
   0x9   :  { %1290 = vst [vmem:[%s3849_s1 + $0x1c] sm:$0x30] %v1288_v4   ;;  %v1320_v17 = vld [vmem:[%s3848_s0 + $0x88] sm:$0x3f]   ;;  %v1322_v18 = vld [vmem:[%s3848_s0 + $0x90] sm:$0x3f]  }
   0xa   :  { %1292 = vst [vmem:[%s3849_s1 + $0x1c] sm:$0xf] %v1291_v5   ;;  %v1325_v19 = vld [vmem:[%s3848_s0 + $0x98] sm:$0x3f]   ;;  %v1328_v20 = vld [vmem:[%s3848_s0 + $0xa0] sm:$0x3f]  }
   0xb   :  { %1293 = vst [vmem:[%s3849_s1 + $0x24] sm:$0x30] %v1291_v5   ;;  %v1331_v21 = vld [vmem:[%s3848_s0 + $0xa8] sm:$0x3f]   ;;  %v1334_v22 = vld [vmem:[%s3848_s0 + $0xb0] sm:$0x3f]  }
   0xc   :  { %1295 = vst [vmem:[%s3849_s1 + $0x22] sm:$0x3f] %v1294_v6   ;;  %v1336_v23 = vld [vmem:[%s3848_s0 + $0xb8] sm:$0x3f]   ;;  %v1338_v24 = vld [vmem:[%s3848_s0 + $0xc0] sm:$0x3f]  }
   0xd   :  { %1297 = vst [vmem:[%s3849_s1 + $0x2a] sm:$0x3f] %v1296_v7   ;;  %v1340_v25 = vld [vmem:[%s3848_s0 + $0xc8] sm:$0x3f]   ;;  %v1342_v26 = vld [vmem:[%s3848_s0 + $0xd0] sm:$0x3f]  }
   0xe   :  { %1299 = vst [vmem:[%s3849_s1 + $0x30] sm:$0x3f] %v1298_v8   ;;  %v1345_v27 = vld [vmem:[%s3848_s0 + $0xd8] sm:$0x3f]   ;;  %v1348_v28 = vld [vmem:[%s3848_s0 + $0xe0] sm:$0x3f]  }
   0xf   :  { %1301 = vst [vmem:[%s3849_s1 + $0x38] sm:$0x3f] %v1300_v9   ;;  %v1351_v29 = vld [vmem:[%s3848_s0 + $0xe8] sm:$0x3f]   ;;  %v1354_v30 = vld [vmem:[%s3848_s0 + $0xf0] sm:$0x3f]  }
  0x10   :  { %1303 = vst [vmem:[%s3849_s1 + $0x36] sm:$0x3] %v1302_v10   ;;  %v1356_v31 = vld [vmem:[%s3848_s0 + $0xf8] sm:$0x3f]   ;;  %v1358_v32 = vld [vmem:[%s3848_s0 + $0x100] sm:$0x3f]  }
  0x11   :  { %1304 = vst [vmem:[%s3849_s1 + $0x3e] sm:$0x3c] %v1302_v10   ;;  %v1360_v33 = vld [vmem:[%s3848_s0 + $0x108] sm:$0x3f]   ;;  %v1362_v34 = vld [vmem:[%s3848_s0 + $0x110] sm:$0x3f]  }
  0x12   :  { %1306 = vst [vmem:[%s3849_s1 + $0x3e] sm:$0x3] %v1305_v11   ;;  %v1365_v35 = vld [vmem:[%s3848_s0 + $0x118] sm:$0x3f]   ;;  %v1368_v36 = vld [vmem:[%s3848_s0 + $0x120] sm:$0x3f]  }
  0x13   :  { %1307 = vst [vmem:[%s3849_s1 + $0x46] sm:$0x3c] %v1305_v11   ;;  %v1371_v37 = vld [vmem:[%s3848_s0 + $0x128] sm:$0x3f]   ;;  %v1374_v38 = vld [vmem:[%s3848_s0 + $0x130] sm:$0x3f]  }
  0x14   :  { %1309 = vst [vmem:[%s3849_s1 + $0x44] sm:$0xf] %v1308_v12   ;;  %v1376_v39 = vld [vmem:[%s3848_s0 + $0x138] sm:$0x3f]   ;;  %v1378_v40 = vld [vmem:[%s3848_s0 + $0x140] sm:$0x3f]  }
  0x15   :  { %1310 = vst [vmem:[%s3849_s1 + $0x4c] sm:$0x30] %v1308_v12   ;;  %v1380_v41 = vld [vmem:[%s3848_s0 + $0x148] sm:$0x3f]   ;;  %v1382_v42 = vld [vmem:[%s3848_s0 + $0x150] sm:$0x3f]  }
  0x16   :  { %1312 = vst [vmem:[%s3849_s1 + $0x4c] sm:$0xf] %v1311_v13   ;;  %v1385_v43 = vld [vmem:[%s3848_s0 + $0x158] sm:$0x3f]   ;;  %v1388_v44 = vld [vmem:[%s3848_s0 + $0x160] sm:$0x3f]  }
  0x17   :  { %1313 = vst [vmem:[%s3849_s1 + $0x54] sm:$0x30] %v1311_v13   ;;  %v1391_v45 = vld [vmem:[%s3848_s0 + $0x168] sm:$0x3f]   ;;  %v1394_v46 = vld [vmem:[%s3848_s0 + $0x170] sm:$0x3f]  }
  0x18   :  { %1315 = vst [vmem:[%s3849_s1 + $0x52] sm:$0x3f] %v1314_v14   ;;  %v1396_v47 = vld [vmem:[%s3848_s0 + $0x178] sm:$0x3f]   ;;  %v1398_v48 = vld [vmem:[%s3848_s0 + $0x180] sm:$0x3f]  }
  0x19   :  { %1317 = vst [vmem:[%s3849_s1 + $0x5a] sm:$0x3f] %v1316_v15   ;;  %v1400_v49 = vld [vmem:[%s3848_s0 + $0x188] sm:$0x3f]   ;;  %v1402_v50 = vld [vmem:[%s3848_s0 + $0x190] sm:$0x3f]  }
  0x1a   :  { %1319 = vst [vmem:[%s3849_s1 + $0x60] sm:$0x3f] %v1318_v16   ;;  %v1405_v51 = vld [vmem:[%s3848_s0 + $0x198] sm:$0x3f]   ;;  %v1408_v52 = vld [vmem:[%s3848_s0 + $0x1a0] sm:$0x3f]  }
  0x1b   :  { %1321 = vst [vmem:[%s3849_s1 + $0x68] sm:$0x3f] %v1320_v17   ;;  %v1411_v53 = vld [vmem:[%s3848_s0 + $0x1a8] sm:$0x3f]   ;;  %v1414_v54 = vld [vmem:[%s3848_s0 + $0x1b0] sm:$0x3f]  }
  0x1c   :  { %1323 = vst [vmem:[%s3849_s1 + $0x66] sm:$0x3] %v1322_v18   ;;  %v1416_v55 = vld [vmem:[%s3848_s0 + $0x1b8] sm:$0x3f]   ;;  %v1418_v56 = vld [vmem:[%s3848_s0 + $0x1c0] sm:$0x3f]  }
  0x1d   :  { %1324 = vst [vmem:[%s3849_s1 + $0x6e] sm:$0x3c] %v1322_v18   ;;  %v1420_v57 = vld [vmem:[%s3848_s0 + $0x1c8] sm:$0x3f]   ;;  %v1422_v58 = vld [vmem:[%s3848_s0 + $0x1d0] sm:$0x3f]  }
  0x1e   :  { %1326 = vst [vmem:[%s3849_s1 + $0x6e] sm:$0x3] %v1325_v19   ;;  %v1425_v59 = vld [vmem:[%s3848_s0 + $0x1d8] sm:$0x3f]   ;;  %v1428_v60 = vld [vmem:[%s3848_s0 + $0x1e0] sm:$0x3f]  }
  0x1f   :  { %1327 = vst [vmem:[%s3849_s1 + $0x76] sm:$0x3c] %v1325_v19   ;;  %v1431_v61 = vld [vmem:[%s3848_s0 + $0x1e8] sm:$0x3f]   ;;  %v1434_v62 = vld [vmem:[%s3848_s0 + $0x1f0] sm:$0x3f]  }
  0x20   :  { %1329 = vst [vmem:[%s3849_s1 + $0x74] sm:$0xf] %v1328_v20   ;;  %v1436_v63 = vld [vmem:[%s3848_s0 + $0x1f8] sm:$0x3f]   ;;  %v1438_v0 = vld [vmem:[%s3848_s0 + $0x200] sm:$0x3f]  }
  0x21   :  { %1330 = vst [vmem:[%s3849_s1 + $0x7c] sm:$0x30] %v1328_v20   ;;  %v1440_v1 = vld [vmem:[%s3848_s0 + $0x208] sm:$0x3f]   ;;  %v1442_v2 = vld [vmem:[%s3848_s0 + $0x210] sm:$0x3f]  }
  0x22   :  { %1332 = vst [vmem:[%s3849_s1 + $0x7c] sm:$0xf] %v1331_v21   ;;  %v1445_v3 = vld [vmem:[%s3848_s0 + $0x218] sm:$0x3f]   ;;  %v1448_v4 = vld [vmem:[%s3848_s0 + $0x220] sm:$0x3f]  }
  0x23   :  { %1333 = vst [vmem:[%s3849_s1 + $0x84] sm:$0x30] %v1331_v21   ;;  %v1451_v5 = vld [vmem:[%s3848_s0 + $0x228] sm:$0x3f]   ;;  %v1454_v6 = vld [vmem:[%s3848_s0 + $0x230] sm:$0x3f]  }
  0x24   :  { %1335 = vst [vmem:[%s3849_s1 + $0x82] sm:$0x3f] %v1334_v22   ;;  %v1456_v7 = vld [vmem:[%s3848_s0 + $0x238] sm:$0x3f]   ;;  %v1458_v8 = vld [vmem:[%s3848_s0 + $0x240] sm:$0x3f]  }
  0x25   :  { %1337 = vst [vmem:[%s3849_s1 + $0x8a] sm:$0x3f] %v1336_v23   ;;  %v1460_v9 = vld [vmem:[%s3848_s0 + $0x248] sm:$0x3f]   ;;  %v1462_v10 = vld [vmem:[%s3848_s0 + $0x250] sm:$0x3f]  }
  0x26   :  { %1339 = vst [vmem:[%s3849_s1 + $0x90] sm:$0x3f] %v1338_v24   ;;  %v1465_v11 = vld [vmem:[%s3848_s0 + $0x258] sm:$0x3f]   ;;  %v1468_v12 = vld [vmem:[%s3848_s0 + $0x260] sm:$0x3f]  }
  0x27   :  { %1341 = vst [vmem:[%s3849_s1 + $0x98] sm:$0x3f] %v1340_v25   ;;  %v1471_v13 = vld [vmem:[%s3848_s0 + $0x268] sm:$0x3f]   ;;  %v1474_v14 = vld [vmem:[%s3848_s0 + $0x270] sm:$0x3f]  }
  0x28   :  { %1343 = vst [vmem:[%s3849_s1 + $0x96] sm:$0x3] %v1342_v26   ;;  %v1476_v15 = vld [vmem:[%s3848_s0 + $0x278] sm:$0x3f]   ;;  %v1478_v16 = vld [vmem:[%s3848_s0 + $0x280] sm:$0x3f]  }
  0x29   :  { %1344 = vst [vmem:[%s3849_s1 + $0x9e] sm:$0x3c] %v1342_v26   ;;  %v1480_v17 = vld [vmem:[%s3848_s0 + $0x288] sm:$0x3f]   ;;  %v1482_v18 = vld [vmem:[%s3848_s0 + $0x290] sm:$0x3f]  }
  0x2a   :  { %1346 = vst [vmem:[%s3849_s1 + $0x9e] sm:$0x3] %v1345_v27   ;;  %v1485_v19 = vld [vmem:[%s3848_s0 + $0x298] sm:$0x3f]   ;;  %v1488_v20 = vld [vmem:[%s3848_s0 + $0x2a0] sm:$0x3f]  }
  0x2b   :  { %1347 = vst [vmem:[%s3849_s1 + $0xa6] sm:$0x3c] %v1345_v27   ;;  %v1491_v21 = vld [vmem:[%s3848_s0 + $0x2a8] sm:$0x3f]   ;;  %v1494_v22 = vld [vmem:[%s3848_s0 + $0x2b0] sm:$0x3f]  }
  0x2c   :  { %1349 = vst [vmem:[%s3849_s1 + $0xa4] sm:$0xf] %v1348_v28   ;;  %v1496_v23 = vld [vmem:[%s3848_s0 + $0x2b8] sm:$0x3f]   ;;  %v1498_v24 = vld [vmem:[%s3848_s0 + $0x2c0] sm:$0x3f]  }
  0x2d   :  { %1350 = vst [vmem:[%s3849_s1 + $0xac] sm:$0x30] %v1348_v28   ;;  %v1500_v25 = vld [vmem:[%s3848_s0 + $0x2c8] sm:$0x3f]   ;;  %v1502_v26 = vld [vmem:[%s3848_s0 + $0x2d0] sm:$0x3f]  }
  0x2e   :  { %1352 = vst [vmem:[%s3849_s1 + $0xac] sm:$0xf] %v1351_v29   ;;  %v1505_v27 = vld [vmem:[%s3848_s0 + $0x2d8] sm:$0x3f]   ;;  %v1508_v28 = vld [vmem:[%s3848_s0 + $0x2e0] sm:$0x3f]  }
  0x2f   :  { %1353 = vst [vmem:[%s3849_s1 + $0xb4] sm:$0x30] %v1351_v29   ;;  %v1511_v29 = vld [vmem:[%s3848_s0 + $0x2e8] sm:$0x3f]  }
  0x30   :  { %1355 = vst [vmem:[%s3849_s1 + $0xb2] sm:$0x3f] %v1354_v30   ;;  %v1514_v30 = vld [vmem:[%s3848_s0 + $0x2f0] sm:$0x3f]  }
  0x31   :  { %1357 = vst [vmem:[%s3849_s1 + $0xba] sm:$0x3f] %v1356_v31   ;;  %v1516_v31 = vld [vmem:[%s3848_s0 + $0x2f8] sm:$0x3f]  }
  0x32   :  { %1359 = vst [vmem:[%s3849_s1 + $0xc0] sm:$0x3f] %v1358_v32   ;;  %v1518_v32 = vld [vmem:[%s3848_s0 + $0x300] sm:$0x3f]  }
  0x33   :  { %1361 = vst [vmem:[%s3849_s1 + $0xc8] sm:$0x3f] %v1360_v33   ;;  %v1520_v33 = vld [vmem:[%s3848_s0 + $0x308] sm:$0x3f]  }
  0x34   :  { %1363 = vst [vmem:[%s3849_s1 + $0xc6] sm:$0x3] %v1362_v34  }
  0x35   :  { %1364 = vst [vmem:[%s3849_s1 + $0xce] sm:$0x3c] %v1362_v34   ;;  %v1522_v34 = vld [vmem:[%s3848_s0 + $0x310] sm:$0x3f]  }
  0x36   :  { %1366 = vst [vmem:[%s3849_s1 + $0xce] sm:$0x3] %v1365_v35  }
  0x37   :  { %1367 = vst [vmem:[%s3849_s1 + $0xd6] sm:$0x3c] %v1365_v35   ;;  %v1525_v35 = vld [vmem:[%s3848_s0 + $0x318] sm:$0x3f]  }
  0x38   :  { %1369 = vst [vmem:[%s3849_s1 + $0xd4] sm:$0xf] %v1368_v36  }
  0x39   :  { %1370 = vst [vmem:[%s3849_s1 + $0xdc] sm:$0x30] %v1368_v36   ;;  %v1528_v36 = vld [vmem:[%s3848_s0 + $0x320] sm:$0x3f]  }
  0x3a   :  { %1372 = vst [vmem:[%s3849_s1 + $0xdc] sm:$0xf] %v1371_v37  }
  0x3b   :  { %1373 = vst [vmem:[%s3849_s1 + $0xe4] sm:$0x30] %v1371_v37   ;;  %v1531_v37 = vld [vmem:[%s3848_s0 + $0x328] sm:$0x3f]  }
  0x3c   :  { %1375 = vst [vmem:[%s3849_s1 + $0xe2] sm:$0x3f] %v1374_v38   ;;  %v1534_v38 = vld [vmem:[%s3848_s0 + $0x330] sm:$0x3f]  }
  0x3d   :  { %1377 = vst [vmem:[%s3849_s1 + $0xea] sm:$0x3f] %v1376_v39   ;;  %v1536_v39 = vld [vmem:[%s3848_s0 + $0x338] sm:$0x3f]  }
  0x3e   :  { %1379 = vst [vmem:[%s3849_s1 + $0xf0] sm:$0x3f] %v1378_v40   ;;  %v1538_v40 = vld [vmem:[%s3848_s0 + $0x340] sm:$0x3f]  }
  0x3f   :  { %1381 = vst [vmem:[%s3849_s1 + $0xf8] sm:$0x3f] %v1380_v41   ;;  %v1540_v41 = vld [vmem:[%s3848_s0 + $0x348] sm:$0x3f]  }
  0x40   :  { %1383 = vst [vmem:[%s3849_s1 + $0xf6] sm:$0x3] %v1382_v42  }
  0x41   :  { %1384 = vst [vmem:[%s3849_s1 + $0xfe] sm:$0x3c] %v1382_v42   ;;  %v1542_v42 = vld [vmem:[%s3848_s0 + $0x350] sm:$0x3f]  }
  0x42   :  { %1386 = vst [vmem:[%s3849_s1 + $0xfe] sm:$0x3] %v1385_v43  }
  0x43   :  { %1387 = vst [vmem:[%s3849_s1 + $0x106] sm:$0x3c] %v1385_v43   ;;  %v1545_v43 = vld [vmem:[%s3848_s0 + $0x358] sm:$0x3f]  }
  0x44   :  { %1389 = vst [vmem:[%s3849_s1 + $0x104] sm:$0xf] %v1388_v44  }
  0x45   :  { %1390 = vst [vmem:[%s3849_s1 + $0x10c] sm:$0x30] %v1388_v44   ;;  %v1548_v44 = vld [vmem:[%s3848_s0 + $0x360] sm:$0x3f]  }
  0x46   :  { %1392 = vst [vmem:[%s3849_s1 + $0x10c] sm:$0xf] %v1391_v45  }
  0x47   :  { %1393 = vst [vmem:[%s3849_s1 + $0x114] sm:$0x30] %v1391_v45   ;;  %v1551_v45 = vld [vmem:[%s3848_s0 + $0x368] sm:$0x3f]  }
  0x48   :  { %1395 = vst [vmem:[%s3849_s1 + $0x112] sm:$0x3f] %v1394_v46   ;;  %v1554_v46 = vld [vmem:[%s3848_s0 + $0x370] sm:$0x3f]  }
  0x49   :  { %1397 = vst [vmem:[%s3849_s1 + $0x11a] sm:$0x3f] %v1396_v47   ;;  %v1556_v47 = vld [vmem:[%s3848_s0 + $0x378] sm:$0x3f]  }
  0x4a   :  { %1399 = vst [vmem:[%s3849_s1 + $0x120] sm:$0x3f] %v1398_v48   ;;  %v1558_v48 = vld [vmem:[%s3848_s0 + $0x380] sm:$0x3f]  }
  0x4b   :  { %1401 = vst [vmem:[%s3849_s1 + $0x128] sm:$0x3f] %v1400_v49   ;;  %v1560_v49 = vld [vmem:[%s3848_s0 + $0x388] sm:$0x3f]  }
  0x4c   :  { %1403 = vst [vmem:[%s3849_s1 + $0x126] sm:$0x3] %v1402_v50  }
  0x4d   :  { %1404 = vst [vmem:[%s3849_s1 + $0x12e] sm:$0x3c] %v1402_v50   ;;  %v1562_v50 = vld [vmem:[%s3848_s0 + $0x390] sm:$0x3f]  }
  0x4e   :  { %1406 = vst [vmem:[%s3849_s1 + $0x12e] sm:$0x3] %v1405_v51  }
  0x4f   :  { %1407 = vst [vmem:[%s3849_s1 + $0x136] sm:$0x3c] %v1405_v51   ;;  %v1565_v51 = vld [vmem:[%s3848_s0 + $0x398] sm:$0x3f]  }
  0x50   :  { %1409 = vst [vmem:[%s3849_s1 + $0x134] sm:$0xf] %v1408_v52  }
  0x51   :  { %1410 = vst [vmem:[%s3849_s1 + $0x13c] sm:$0x30] %v1408_v52   ;;  %v1568_v52 = vld [vmem:[%s3848_s0 + $0x3a0] sm:$0x3f]  }
  0x52   :  { %1412 = vst [vmem:[%s3849_s1 + $0x13c] sm:$0xf] %v1411_v53  }
  0x53   :  { %1413 = vst [vmem:[%s3849_s1 + $0x144] sm:$0x30] %v1411_v53   ;;  %v1571_v53 = vld [vmem:[%s3848_s0 + $0x3a8] sm:$0x3f]  }
  0x54   :  { %1415 = vst [vmem:[%s3849_s1 + $0x142] sm:$0x3f] %v1414_v54   ;;  %v1574_v54 = vld [vmem:[%s3848_s0 + $0x3b0] sm:$0x3f]  }
  0x55   :  { %1417 = vst [vmem:[%s3849_s1 + $0x14a] sm:$0x3f] %v1416_v55   ;;  %v1576_v55 = vld [vmem:[%s3848_s0 + $0x3b8] sm:$0x3f]  }
  0x56   :  { %1419 = vst [vmem:[%s3849_s1 + $0x150] sm:$0x3f] %v1418_v56   ;;  %v1578_v56 = vld [vmem:[%s3848_s0 + $0x3c0] sm:$0x3f]  }
  0x57   :  { %1421 = vst [vmem:[%s3849_s1 + $0x158] sm:$0x3f] %v1420_v57   ;;  %v1580_v57 = vld [vmem:[%s3848_s0 + $0x3c8] sm:$0x3f]  }
  0x58   :  { %1423 = vst [vmem:[%s3849_s1 + $0x156] sm:$0x3] %v1422_v58  }
  0x59   :  { %1424 = vst [vmem:[%s3849_s1 + $0x15e] sm:$0x3c] %v1422_v58   ;;  %v1582_v58 = vld [vmem:[%s3848_s0 + $0x3d0] sm:$0x3f]  }
  0x5a   :  { %1426 = vst [vmem:[%s3849_s1 + $0x15e] sm:$0x3] %v1425_v59  }
  0x5b   :  { %1427 = vst [vmem:[%s3849_s1 + $0x166] sm:$0x3c] %v1425_v59   ;;  %v1585_v59 = vld [vmem:[%s3848_s0 + $0x3d8] sm:$0x3f]  }
  0x5c   :  { %1429 = vst [vmem:[%s3849_s1 + $0x164] sm:$0xf] %v1428_v60  }
  0x5d   :  { %1430 = vst [vmem:[%s3849_s1 + $0x16c] sm:$0x30] %v1428_v60   ;;  %v1588_v60 = vld [vmem:[%s3848_s0 + $0x3e0] sm:$0x3f]  }
  0x5e   :  { %1432 = vst [vmem:[%s3849_s1 + $0x16c] sm:$0xf] %v1431_v61  }
  0x5f   :  { %1433 = vst [vmem:[%s3849_s1 + $0x174] sm:$0x30] %v1431_v61   ;;  %v1591_v61 = vld [vmem:[%s3848_s0 + $0x3e8] sm:$0x3f]  }
  0x60   :  { %1435 = vst [vmem:[%s3849_s1 + $0x172] sm:$0x3f] %v1434_v62   ;;  %v1594_v62 = vld [vmem:[%s3848_s0 + $0x3f0] sm:$0x3f]  }
  0x61   :  { %1437 = vst [vmem:[%s3849_s1 + $0x17a] sm:$0x3f] %v1436_v63   ;;  %v1596_v63 = vld [vmem:[%s3848_s0 + $0x3f8] sm:$0x3f]  }
  0x62   :  { %1439 = vst [vmem:[%s3849_s1 + $0x180] sm:$0x3f] %v1438_v0   ;;  %v1598_v0 = vld [vmem:[%s3848_s0 + $0x400] sm:$0x3f]  }
  0x63   :  { %1441 = vst [vmem:[%s3849_s1 + $0x188] sm:$0x3f] %v1440_v1   ;;  %v1600_v1 = vld [vmem:[%s3848_s0 + $0x408] sm:$0x3f]  }
  0x64   :  { %1443 = vst [vmem:[%s3849_s1 + $0x186] sm:$0x3] %v1442_v2  }
  0x65   :  { %1444 = vst [vmem:[%s3849_s1 + $0x18e] sm:$0x3c] %v1442_v2   ;;  %v1602_v2 = vld [vmem:[%s3848_s0 + $0x410] sm:$0x3f]  }
  0x66   :  { %1446 = vst [vmem:[%s3849_s1 + $0x18e] sm:$0x3] %v1445_v3  }
  0x67   :  { %1447 = vst [vmem:[%s3849_s1 + $0x196] sm:$0x3c] %v1445_v3   ;;  %v1605_v3 = vld [vmem:[%s3848_s0 + $0x418] sm:$0x3f]  }
  0x68   :  { %1449 = vst [vmem:[%s3849_s1 + $0x194] sm:$0xf] %v1448_v4  }
  0x69   :  { %1450 = vst [vmem:[%s3849_s1 + $0x19c] sm:$0x30] %v1448_v4   ;;  %v1608_v4 = vld [vmem:[%s3848_s0 + $0x420] sm:$0x3f]  }
  0x6a   :  { %1452 = vst [vmem:[%s3849_s1 + $0x19c] sm:$0xf] %v1451_v5  }
  0x6b   :  { %1453 = vst [vmem:[%s3849_s1 + $0x1a4] sm:$0x30] %v1451_v5   ;;  %v1611_v5 = vld [vmem:[%s3848_s0 + $0x428] sm:$0x3f]  }
  0x6c   :  { %1455 = vst [vmem:[%s3849_s1 + $0x1a2] sm:$0x3f] %v1454_v6   ;;  %v1614_v6 = vld [vmem:[%s3848_s0 + $0x430] sm:$0x3f]  }
  0x6d   :  { %1457 = vst [vmem:[%s3849_s1 + $0x1aa] sm:$0x3f] %v1456_v7   ;;  %v1616_v7 = vld [vmem:[%s3848_s0 + $0x438] sm:$0x3f]  }
  0x6e   :  { %1459 = vst [vmem:[%s3849_s1 + $0x1b0] sm:$0x3f] %v1458_v8   ;;  %v1618_v8 = vld [vmem:[%s3848_s0 + $0x440] sm:$0x3f]  }
  0x6f   :  { %1461 = vst [vmem:[%s3849_s1 + $0x1b8] sm:$0x3f] %v1460_v9   ;;  %v1620_v9 = vld [vmem:[%s3848_s0 + $0x448] sm:$0x3f]  }
  0x70   :  { %1463 = vst [vmem:[%s3849_s1 + $0x1b6] sm:$0x3] %v1462_v10  }
  0x71   :  { %1464 = vst [vmem:[%s3849_s1 + $0x1be] sm:$0x3c] %v1462_v10   ;;  %v1622_v10 = vld [vmem:[%s3848_s0 + $0x450] sm:$0x3f]  }
  0x72   :  { %1466 = vst [vmem:[%s3849_s1 + $0x1be] sm:$0x3] %v1465_v11  }
  0x73   :  { %1467 = vst [vmem:[%s3849_s1 + $0x1c6] sm:$0x3c] %v1465_v11   ;;  %v1625_v11 = vld [vmem:[%s3848_s0 + $0x458] sm:$0x3f]  }
  0x74   :  { %1469 = vst [vmem:[%s3849_s1 + $0x1c4] sm:$0xf] %v1468_v12  }
  0x75   :  { %1470 = vst [vmem:[%s3849_s1 + $0x1cc] sm:$0x30] %v1468_v12   ;;  %v1628_v12 = vld [vmem:[%s3848_s0 + $0x460] sm:$0x3f]  }
  0x76   :  { %1472 = vst [vmem:[%s3849_s1 + $0x1cc] sm:$0xf] %v1471_v13  }
  0x77   :  { %1473 = vst [vmem:[%s3849_s1 + $0x1d4] sm:$0x30] %v1471_v13   ;;  %v1631_v13 = vld [vmem:[%s3848_s0 + $0x468] sm:$0x3f]  }
  0x78   :  { %1475 = vst [vmem:[%s3849_s1 + $0x1d2] sm:$0x3f] %v1474_v14   ;;  %v1634_v14 = vld [vmem:[%s3848_s0 + $0x470] sm:$0x3f]  }
  0x79   :  { %1477 = vst [vmem:[%s3849_s1 + $0x1da] sm:$0x3f] %v1476_v15   ;;  %v1636_v15 = vld [vmem:[%s3848_s0 + $0x478] sm:$0x3f]  }
  0x7a   :  { %1479 = vst [vmem:[%s3849_s1 + $0x1e0] sm:$0x3f] %v1478_v16   ;;  %v1638_v16 = vld [vmem:[%s3848_s0 + $0x480] sm:$0x3f]  }
  0x7b   :  { %1481 = vst [vmem:[%s3849_s1 + $0x1e8] sm:$0x3f] %v1480_v17   ;;  %v1640_v17 = vld [vmem:[%s3848_s0 + $0x488] sm:$0x3f]  }
  0x7c   :  { %1483 = vst [vmem:[%s3849_s1 + $0x1e6] sm:$0x3] %v1482_v18  }
  0x7d   :  { %1484 = vst [vmem:[%s3849_s1 + $0x1ee] sm:$0x3c] %v1482_v18   ;;  %v1642_v18 = vld [vmem:[%s3848_s0 + $0x490] sm:$0x3f]  }
  0x7e   :  { %1486 = vst [vmem:[%s3849_s1 + $0x1ee] sm:$0x3] %v1485_v19  }
  0x7f   :  { %1487 = vst [vmem:[%s3849_s1 + $0x1f6] sm:$0x3c] %v1485_v19   ;;  %v1645_v19 = vld [vmem:[%s3848_s0 + $0x498] sm:$0x3f]  }
  0x80   :  { %1489 = vst [vmem:[%s3849_s1 + $0x1f4] sm:$0xf] %v1488_v20  }
  0x81   :  { %1490 = vst [vmem:[%s3849_s1 + $0x1fc] sm:$0x30] %v1488_v20   ;;  %v1648_v20 = vld [vmem:[%s3848_s0 + $0x4a0] sm:$0x3f]  }
  0x82   :  { %1492 = vst [vmem:[%s3849_s1 + $0x1fc] sm:$0xf] %v1491_v21  }
  0x83   :  { %1493 = vst [vmem:[%s3849_s1 + $0x204] sm:$0x30] %v1491_v21   ;;  %v1651_v21 = vld [vmem:[%s3848_s0 + $0x4a8] sm:$0x3f]  }
  0x84   :  { %1495 = vst [vmem:[%s3849_s1 + $0x202] sm:$0x3f] %v1494_v22   ;;  %v1654_v22 = vld [vmem:[%s3848_s0 + $0x4b0] sm:$0x3f]  }
  0x85   :  { %1497 = vst [vmem:[%s3849_s1 + $0x20a] sm:$0x3f] %v1496_v23   ;;  %v1656_v23 = vld [vmem:[%s3848_s0 + $0x4b8] sm:$0x3f]  }
  0x86   :  { %1499 = vst [vmem:[%s3849_s1 + $0x210] sm:$0x3f] %v1498_v24   ;;  %v1658_v24 = vld [vmem:[%s3848_s0 + $0x4c0] sm:$0x3f]  }
  0x87   :  { %1501 = vst [vmem:[%s3849_s1 + $0x218] sm:$0x3f] %v1500_v25   ;;  %v1660_v25 = vld [vmem:[%s3848_s0 + $0x4c8] sm:$0x3f]  }
  0x88   :  { %1503 = vst [vmem:[%s3849_s1 + $0x216] sm:$0x3] %v1502_v26  }
  0x89   :  { %1504 = vst [vmem:[%s3849_s1 + $0x21e] sm:$0x3c] %v1502_v26   ;;  %v1662_v26 = vld [vmem:[%s3848_s0 + $0x4d0] sm:$0x3f]  }
  0x8a   :  { %1506 = vst [vmem:[%s3849_s1 + $0x21e] sm:$0x3] %v1505_v27  }
  0x8b   :  { %1507 = vst [vmem:[%s3849_s1 + $0x226] sm:$0x3c] %v1505_v27   ;;  %v1665_v27 = vld [vmem:[%s3848_s0 + $0x4d8] sm:$0x3f]  }
  0x8c   :  { %1509 = vst [vmem:[%s3849_s1 + $0x224] sm:$0xf] %v1508_v28  }
  0x8d   :  { %1510 = vst [vmem:[%s3849_s1 + $0x22c] sm:$0x30] %v1508_v28   ;;  %v1668_v28 = vld [vmem:[%s3848_s0 + $0x4e0] sm:$0x3f]  }
  0x8e   :  { %1512 = vst [vmem:[%s3849_s1 + $0x22c] sm:$0xf] %v1511_v29  }
  0x8f   :  { %1513 = vst [vmem:[%s3849_s1 + $0x234] sm:$0x30] %v1511_v29   ;;  %v1671_v29 = vld [vmem:[%s3848_s0 + $0x4e8] sm:$0x3f]  }
  0x90   :  { %1515 = vst [vmem:[%s3849_s1 + $0x232] sm:$0x3f] %v1514_v30   ;;  %v1674_v30 = vld [vmem:[%s3848_s0 + $0x4f0] sm:$0x3f]  }
  0x91   :  { %1517 = vst [vmem:[%s3849_s1 + $0x23a] sm:$0x3f] %v1516_v31   ;;  %v1676_v31 = vld [vmem:[%s3848_s0 + $0x4f8] sm:$0x3f]  }
  0x92   :  { %1519 = vst [vmem:[%s3849_s1 + $0x240] sm:$0x3f] %v1518_v32   ;;  %v1678_v32 = vld [vmem:[%s3848_s0 + $0x500] sm:$0x3f]  }
  0x93   :  { %1521 = vst [vmem:[%s3849_s1 + $0x248] sm:$0x3f] %v1520_v33   ;;  %v1680_v33 = vld [vmem:[%s3848_s0 + $0x508] sm:$0x3f]  }
  0x94   :  { %1523 = vst [vmem:[%s3849_s1 + $0x246] sm:$0x3] %v1522_v34  }
  0x95   :  { %1524 = vst [vmem:[%s3849_s1 + $0x24e] sm:$0x3c] %v1522_v34   ;;  %v1682_v34 = vld [vmem:[%s3848_s0 + $0x510] sm:$0x3f]  }
  0x96   :  { %1526 = vst [vmem:[%s3849_s1 + $0x24e] sm:$0x3] %v1525_v35  }
  0x97   :  { %1527 = vst [vmem:[%s3849_s1 + $0x256] sm:$0x3c] %v1525_v35   ;;  %v1685_v35 = vld [vmem:[%s3848_s0 + $0x518] sm:$0x3f]  }
  0x98   :  { %1529 = vst [vmem:[%s3849_s1 + $0x254] sm:$0xf] %v1528_v36  }
  0x99   :  { %1530 = vst [vmem:[%s3849_s1 + $0x25c] sm:$0x30] %v1528_v36   ;;  %v1688_v36 = vld [vmem:[%s3848_s0 + $0x520] sm:$0x3f]  }
  0x9a   :  { %1532 = vst [vmem:[%s3849_s1 + $0x25c] sm:$0xf] %v1531_v37  }
  0x9b   :  { %1533 = vst [vmem:[%s3849_s1 + $0x264] sm:$0x30] %v1531_v37   ;;  %v1691_v37 = vld [vmem:[%s3848_s0 + $0x528] sm:$0x3f]  }
  0x9c   :  { %1535 = vst [vmem:[%s3849_s1 + $0x262] sm:$0x3f] %v1534_v38   ;;  %v1694_v38 = vld [vmem:[%s3848_s0 + $0x530] sm:$0x3f]  }
  0x9d   :  { %1537 = vst [vmem:[%s3849_s1 + $0x26a] sm:$0x3f] %v1536_v39   ;;  %v1696_v39 = vld [vmem:[%s3848_s0 + $0x538] sm:$0x3f]  }
  0x9e   :  { %1539 = vst [vmem:[%s3849_s1 + $0x270] sm:$0x3f] %v1538_v40   ;;  %v1698_v40 = vld [vmem:[%s3848_s0 + $0x540] sm:$0x3f]  }
  0x9f   :  { %1541 = vst [vmem:[%s3849_s1 + $0x278] sm:$0x3f] %v1540_v41   ;;  %v1700_v41 = vld [vmem:[%s3848_s0 + $0x548] sm:$0x3f]  }
  0xa0   :  { %1543 = vst [vmem:[%s3849_s1 + $0x276] sm:$0x3] %v1542_v42  }
  0xa1   :  { %1544 = vst [vmem:[%s3849_s1 + $0x27e] sm:$0x3c] %v1542_v42   ;;  %v1702_v42 = vld [vmem:[%s3848_s0 + $0x550] sm:$0x3f]  }
  0xa2   :  { %1546 = vst [vmem:[%s3849_s1 + $0x27e] sm:$0x3] %v1545_v43  }
  0xa3   :  { %1547 = vst [vmem:[%s3849_s1 + $0x286] sm:$0x3c] %v1545_v43   ;;  %v1705_v43 = vld [vmem:[%s3848_s0 + $0x558] sm:$0x3f]  }
  0xa4   :  { %1549 = vst [vmem:[%s3849_s1 + $0x284] sm:$0xf] %v1548_v44  }
  0xa5   :  { %1550 = vst [vmem:[%s3849_s1 + $0x28c] sm:$0x30] %v1548_v44   ;;  %v1708_v44 = vld [vmem:[%s3848_s0 + $0x560] sm:$0x3f]  }
  0xa6   :  { %1552 = vst [vmem:[%s3849_s1 + $0x28c] sm:$0xf] %v1551_v45  }
  0xa7   :  { %1553 = vst [vmem:[%s3849_s1 + $0x294] sm:$0x30] %v1551_v45   ;;  %v1711_v45 = vld [vmem:[%s3848_s0 + $0x568] sm:$0x3f]  }
  0xa8   :  { %1555 = vst [vmem:[%s3849_s1 + $0x292] sm:$0x3f] %v1554_v46   ;;  %v1714_v46 = vld [vmem:[%s3848_s0 + $0x570] sm:$0x3f]  }
  0xa9   :  { %1557 = vst [vmem:[%s3849_s1 + $0x29a] sm:$0x3f] %v1556_v47   ;;  %v1716_v47 = vld [vmem:[%s3848_s0 + $0x578] sm:$0x3f]  }
  0xaa   :  { %1559 = vst [vmem:[%s3849_s1 + $0x2a0] sm:$0x3f] %v1558_v48   ;;  %v1718_v48 = vld [vmem:[%s3848_s0 + $0x580] sm:$0x3f]  }
  0xab   :  { %1561 = vst [vmem:[%s3849_s1 + $0x2a8] sm:$0x3f] %v1560_v49   ;;  %v1720_v49 = vld [vmem:[%s3848_s0 + $0x588] sm:$0x3f]  }
  0xac   :  { %1563 = vst [vmem:[%s3849_s1 + $0x2a6] sm:$0x3] %v1562_v50  }
  0xad   :  { %1564 = vst [vmem:[%s3849_s1 + $0x2ae] sm:$0x3c] %v1562_v50   ;;  %v1722_v50 = vld [vmem:[%s3848_s0 + $0x590] sm:$0x3f]  }
  0xae   :  { %1566 = vst [vmem:[%s3849_s1 + $0x2ae] sm:$0x3] %v1565_v51  }
  0xaf   :  { %1567 = vst [vmem:[%s3849_s1 + $0x2b6] sm:$0x3c] %v1565_v51   ;;  %v1725_v51 = vld [vmem:[%s3848_s0 + $0x598] sm:$0x3f]  }
  0xb0   :  { %1569 = vst [vmem:[%s3849_s1 + $0x2b4] sm:$0xf] %v1568_v52  }
  0xb1   :  { %1570 = vst [vmem:[%s3849_s1 + $0x2bc] sm:$0x30] %v1568_v52   ;;  %v1728_v52 = vld [vmem:[%s3848_s0 + $0x5a0] sm:$0x3f]  }
  0xb2   :  { %1572 = vst [vmem:[%s3849_s1 + $0x2bc] sm:$0xf] %v1571_v53  }
  0xb3   :  { %1573 = vst [vmem:[%s3849_s1 + $0x2c4] sm:$0x30] %v1571_v53   ;;  %v1731_v53 = vld [vmem:[%s3848_s0 + $0x5a8] sm:$0x3f]  }
  0xb4   :  { %1575 = vst [vmem:[%s3849_s1 + $0x2c2] sm:$0x3f] %v1574_v54   ;;  %v1734_v54 = vld [vmem:[%s3848_s0 + $0x5b0] sm:$0x3f]  }
  0xb5   :  { %1577 = vst [vmem:[%s3849_s1 + $0x2ca] sm:$0x3f] %v1576_v55   ;;  %v1736_v55 = vld [vmem:[%s3848_s0 + $0x5b8] sm:$0x3f]  }
  0xb6   :  { %1579 = vst [vmem:[%s3849_s1 + $0x2d0] sm:$0x3f] %v1578_v56   ;;  %v1738_v56 = vld [vmem:[%s3848_s0 + $0x5c0] sm:$0x3f]  }
  0xb7   :  { %1581 = vst [vmem:[%s3849_s1 + $0x2d8] sm:$0x3f] %v1580_v57   ;;  %v1740_v57 = vld [vmem:[%s3848_s0 + $0x5c8] sm:$0x3f]  }
  0xb8   :  { %1583 = vst [vmem:[%s3849_s1 + $0x2d6] sm:$0x3] %v1582_v58  }
  0xb9   :  { %1584 = vst [vmem:[%s3849_s1 + $0x2de] sm:$0x3c] %v1582_v58   ;;  %v1742_v58 = vld [vmem:[%s3848_s0 + $0x5d0] sm:$0x3f]  }
  0xba   :  { %1586 = vst [vmem:[%s3849_s1 + $0x2de] sm:$0x3] %v1585_v59  }
  0xbb   :  { %1587 = vst [vmem:[%s3849_s1 + $0x2e6] sm:$0x3c] %v1585_v59   ;;  %v1745_v59 = vld [vmem:[%s3848_s0 + $0x5d8] sm:$0x3f]  }
  0xbc   :  { %1589 = vst [vmem:[%s3849_s1 + $0x2e4] sm:$0xf] %v1588_v60  }
  0xbd   :  { %1590 = vst [vmem:[%s3849_s1 + $0x2ec] sm:$0x30] %v1588_v60   ;;  %v1748_v60 = vld [vmem:[%s3848_s0 + $0x5e0] sm:$0x3f]  }
  0xbe   :  { %1592 = vst [vmem:[%s3849_s1 + $0x2ec] sm:$0xf] %v1591_v61  }
  0xbf   :  { %1593 = vst [vmem:[%s3849_s1 + $0x2f4] sm:$0x30] %v1591_v61   ;;  %v1751_v61 = vld [vmem:[%s3848_s0 + $0x5e8] sm:$0x3f]  }
  0xc0   :  { %1595 = vst [vmem:[%s3849_s1 + $0x2f2] sm:$0x3f] %v1594_v62   ;;  %v1754_v62 = vld [vmem:[%s3848_s0 + $0x5f0] sm:$0x3f]  }
  0xc1   :  { %1597 = vst [vmem:[%s3849_s1 + $0x2fa] sm:$0x3f] %v1596_v63   ;;  %v1756_v63 = vld [vmem:[%s3848_s0 + $0x5f8] sm:$0x3f]  }
  0xc2   :  { %1599 = vst [vmem:[%s3849_s1 + $0x300] sm:$0x3f] %v1598_v0   ;;  %v1758_v0 = vld [vmem:[%s3848_s0 + $0x600] sm:$0x3f]  }
  0xc3   :  { %1601 = vst [vmem:[%s3849_s1 + $0x308] sm:$0x3f] %v1600_v1   ;;  %v1760_v1 = vld [vmem:[%s3848_s0 + $0x608] sm:$0x3f]  }
  0xc4   :  { %1603 = vst [vmem:[%s3849_s1 + $0x306] sm:$0x3] %v1602_v2  }
  0xc5   :  { %1604 = vst [vmem:[%s3849_s1 + $0x30e] sm:$0x3c] %v1602_v2   ;;  %v1762_v2 = vld [vmem:[%s3848_s0 + $0x610] sm:$0x3f]  }
  0xc6   :  { %1606 = vst [vmem:[%s3849_s1 + $0x30e] sm:$0x3] %v1605_v3  }
  0xc7   :  { %1607 = vst [vmem:[%s3849_s1 + $0x316] sm:$0x3c] %v1605_v3   ;;  %v1765_v3 = vld [vmem:[%s3848_s0 + $0x618] sm:$0x3f]  }
  0xc8   :  { %1609 = vst [vmem:[%s3849_s1 + $0x314] sm:$0xf] %v1608_v4  }
  0xc9   :  { %1610 = vst [vmem:[%s3849_s1 + $0x31c] sm:$0x30] %v1608_v4   ;;  %v1768_v4 = vld [vmem:[%s3848_s0 + $0x620] sm:$0x3f]  }
  0xca   :  { %1612 = vst [vmem:[%s3849_s1 + $0x31c] sm:$0xf] %v1611_v5  }
  0xcb   :  { %1613 = vst [vmem:[%s3849_s1 + $0x324] sm:$0x30] %v1611_v5   ;;  %v1771_v5 = vld [vmem:[%s3848_s0 + $0x628] sm:$0x3f]  }
  0xcc   :  { %1615 = vst [vmem:[%s3849_s1 + $0x322] sm:$0x3f] %v1614_v6   ;;  %v1774_v6 = vld [vmem:[%s3848_s0 + $0x630] sm:$0x3f]  }
  0xcd   :  { %1617 = vst [vmem:[%s3849_s1 + $0x32a] sm:$0x3f] %v1616_v7   ;;  %v1776_v7 = vld [vmem:[%s3848_s0 + $0x638] sm:$0x3f]  }
  0xce   :  { %1619 = vst [vmem:[%s3849_s1 + $0x330] sm:$0x3f] %v1618_v8   ;;  %v1778_v8 = vld [vmem:[%s3848_s0 + $0x640] sm:$0x3f]  }
  0xcf   :  { %1621 = vst [vmem:[%s3849_s1 + $0x338] sm:$0x3f] %v1620_v9   ;;  %v1780_v9 = vld [vmem:[%s3848_s0 + $0x648] sm:$0x3f]  }
  0xd0   :  { %1623 = vst [vmem:[%s3849_s1 + $0x336] sm:$0x3] %v1622_v10  }
  0xd1   :  { %1624 = vst [vmem:[%s3849_s1 + $0x33e] sm:$0x3c] %v1622_v10   ;;  %v1782_v10 = vld [vmem:[%s3848_s0 + $0x650] sm:$0x3f]  }
  0xd2   :  { %1626 = vst [vmem:[%s3849_s1 + $0x33e] sm:$0x3] %v1625_v11  }
  0xd3   :  { %1627 = vst [vmem:[%s3849_s1 + $0x346] sm:$0x3c] %v1625_v11   ;;  %v1785_v11 = vld [vmem:[%s3848_s0 + $0x658] sm:$0x3f]  }
  0xd4   :  { %1629 = vst [vmem:[%s3849_s1 + $0x344] sm:$0xf] %v1628_v12  }
  0xd5   :  { %1630 = vst [vmem:[%s3849_s1 + $0x34c] sm:$0x30] %v1628_v12   ;;  %v1788_v12 = vld [vmem:[%s3848_s0 + $0x660] sm:$0x3f]  }
  0xd6   :  { %1632 = vst [vmem:[%s3849_s1 + $0x34c] sm:$0xf] %v1631_v13  }
  0xd7   :  { %1633 = vst [vmem:[%s3849_s1 + $0x354] sm:$0x30] %v1631_v13   ;;  %v1791_v13 = vld [vmem:[%s3848_s0 + $0x668] sm:$0x3f]  }
  0xd8   :  { %1635 = vst [vmem:[%s3849_s1 + $0x352] sm:$0x3f] %v1634_v14   ;;  %v1794_v14 = vld [vmem:[%s3848_s0 + $0x670] sm:$0x3f]  }
  0xd9   :  { %1637 = vst [vmem:[%s3849_s1 + $0x35a] sm:$0x3f] %v1636_v15   ;;  %v1796_v15 = vld [vmem:[%s3848_s0 + $0x678] sm:$0x3f]  }
  0xda   :  { %1639 = vst [vmem:[%s3849_s1 + $0x360] sm:$0x3f] %v1638_v16   ;;  %v1798_v16 = vld [vmem:[%s3848_s0 + $0x680] sm:$0x3f]  }
  0xdb   :  { %1641 = vst [vmem:[%s3849_s1 + $0x368] sm:$0x3f] %v1640_v17   ;;  %v1800_v17 = vld [vmem:[%s3848_s0 + $0x688] sm:$0x3f]  }
  0xdc   :  { %1643 = vst [vmem:[%s3849_s1 + $0x366] sm:$0x3] %v1642_v18  }
  0xdd   :  { %1644 = vst [vmem:[%s3849_s1 + $0x36e] sm:$0x3c] %v1642_v18   ;;  %v1802_v18 = vld [vmem:[%s3848_s0 + $0x690] sm:$0x3f]  }
  0xde   :  { %1646 = vst [vmem:[%s3849_s1 + $0x36e] sm:$0x3] %v1645_v19  }
  0xdf   :  { %1647 = vst [vmem:[%s3849_s1 + $0x376] sm:$0x3c] %v1645_v19   ;;  %v1805_v19 = vld [vmem:[%s3848_s0 + $0x698] sm:$0x3f]  }
  0xe0   :  { %1649 = vst [vmem:[%s3849_s1 + $0x374] sm:$0xf] %v1648_v20  }
  0xe1   :  { %1650 = vst [vmem:[%s3849_s1 + $0x37c] sm:$0x30] %v1648_v20   ;;  %v1808_v20 = vld [vmem:[%s3848_s0 + $0x6a0] sm:$0x3f]  }
  0xe2   :  { %1652 = vst [vmem:[%s3849_s1 + $0x37c] sm:$0xf] %v1651_v21  }
  0xe3   :  { %1653 = vst [vmem:[%s3849_s1 + $0x384] sm:$0x30] %v1651_v21   ;;  %v1811_v21 = vld [vmem:[%s3848_s0 + $0x6a8] sm:$0x3f]  }
  0xe4   :  { %1655 = vst [vmem:[%s3849_s1 + $0x382] sm:$0x3f] %v1654_v22   ;;  %v1814_v22 = vld [vmem:[%s3848_s0 + $0x6b0] sm:$0x3f]  }
  0xe5   :  { %1657 = vst [vmem:[%s3849_s1 + $0x38a] sm:$0x3f] %v1656_v23   ;;  %v1816_v23 = vld [vmem:[%s3848_s0 + $0x6b8] sm:$0x3f]  }
  0xe6   :  { %1659 = vst [vmem:[%s3849_s1 + $0x390] sm:$0x3f] %v1658_v24   ;;  %v1818_v24 = vld [vmem:[%s3848_s0 + $0x6c0] sm:$0x3f]  }
  0xe7   :  { %1661 = vst [vmem:[%s3849_s1 + $0x398] sm:$0x3f] %v1660_v25   ;;  %v1820_v25 = vld [vmem:[%s3848_s0 + $0x6c8] sm:$0x3f]  }
  0xe8   :  { %1663 = vst [vmem:[%s3849_s1 + $0x396] sm:$0x3] %v1662_v26  }
  0xe9   :  { %1664 = vst [vmem:[%s3849_s1 + $0x39e] sm:$0x3c] %v1662_v26   ;;  %v1822_v26 = vld [vmem:[%s3848_s0 + $0x6d0] sm:$0x3f]  }
  0xea   :  { %1666 = vst [vmem:[%s3849_s1 + $0x39e] sm:$0x3] %v1665_v27  }
  0xeb   :  { %1667 = vst [vmem:[%s3849_s1 + $0x3a6] sm:$0x3c] %v1665_v27   ;;  %v1825_v27 = vld [vmem:[%s3848_s0 + $0x6d8] sm:$0x3f]  }
  0xec   :  { %1669 = vst [vmem:[%s3849_s1 + $0x3a4] sm:$0xf] %v1668_v28  }
  0xed   :  { %1670 = vst [vmem:[%s3849_s1 + $0x3ac] sm:$0x30] %v1668_v28   ;;  %v1828_v28 = vld [vmem:[%s3848_s0 + $0x6e0] sm:$0x3f]  }
  0xee   :  { %1672 = vst [vmem:[%s3849_s1 + $0x3ac] sm:$0xf] %v1671_v29  }
  0xef   :  { %1673 = vst [vmem:[%s3849_s1 + $0x3b4] sm:$0x30] %v1671_v29   ;;  %v1831_v29 = vld [vmem:[%s3848_s0 + $0x6e8] sm:$0x3f]  }
  0xf0   :  { %1675 = vst [vmem:[%s3849_s1 + $0x3b2] sm:$0x3f] %v1674_v30   ;;  %v1834_v30 = vld [vmem:[%s3848_s0 + $0x6f0] sm:$0x3f]  }
  0xf1   :  { %1677 = vst [vmem:[%s3849_s1 + $0x3ba] sm:$0x3f] %v1676_v31   ;;  %v1836_v31 = vld [vmem:[%s3848_s0 + $0x6f8] sm:$0x3f]  }
  0xf2   :  { %1679 = vst [vmem:[%s3849_s1 + $0x3c0] sm:$0x3f] %v1678_v32   ;;  %v1838_v32 = vld [vmem:[%s3848_s0 + $0x700] sm:$0x3f]  }
  0xf3   :  { %1681 = vst [vmem:[%s3849_s1 + $0x3c8] sm:$0x3f] %v1680_v33   ;;  %v1840_v33 = vld [vmem:[%s3848_s0 + $0x708] sm:$0x3f]  }
  0xf4   :  { %1683 = vst [vmem:[%s3849_s1 + $0x3c6] sm:$0x3] %v1682_v34  }
  0xf5   :  { %1684 = vst [vmem:[%s3849_s1 + $0x3ce] sm:$0x3c] %v1682_v34   ;;  %v1842_v34 = vld [vmem:[%s3848_s0 + $0x710] sm:$0x3f]  }
  0xf6   :  { %1686 = vst [vmem:[%s3849_s1 + $0x3ce] sm:$0x3] %v1685_v35  }
  0xf7   :  { %1687 = vst [vmem:[%s3849_s1 + $0x3d6] sm:$0x3c] %v1685_v35   ;;  %v1845_v35 = vld [vmem:[%s3848_s0 + $0x718] sm:$0x3f]  }
  0xf8   :  { %1689 = vst [vmem:[%s3849_s1 + $0x3d4] sm:$0xf] %v1688_v36  }
  0xf9   :  { %1690 = vst [vmem:[%s3849_s1 + $0x3dc] sm:$0x30] %v1688_v36   ;;  %v1848_v36 = vld [vmem:[%s3848_s0 + $0x720] sm:$0x3f]  }
  0xfa   :  { %1692 = vst [vmem:[%s3849_s1 + $0x3dc] sm:$0xf] %v1691_v37  }
  0xfb   :  { %1693 = vst [vmem:[%s3849_s1 + $0x3e4] sm:$0x30] %v1691_v37   ;;  %v1851_v37 = vld [vmem:[%s3848_s0 + $0x728] sm:$0x3f]  }
  0xfc   :  { %1695 = vst [vmem:[%s3849_s1 + $0x3e2] sm:$0x3f] %v1694_v38   ;;  %v1854_v38 = vld [vmem:[%s3848_s0 + $0x730] sm:$0x3f]  }
  0xfd   :  { %1697 = vst [vmem:[%s3849_s1 + $0x3ea] sm:$0x3f] %v1696_v39   ;;  %v1856_v39 = vld [vmem:[%s3848_s0 + $0x738] sm:$0x3f]  }
  0xfe   :  { %1699 = vst [vmem:[%s3849_s1 + $0x3f0] sm:$0x3f] %v1698_v40   ;;  %v1858_v40 = vld [vmem:[%s3848_s0 + $0x740] sm:$0x3f]  }
  0xff   :  { %1701 = vst [vmem:[%s3849_s1 + $0x3f8] sm:$0x3f] %v1700_v41   ;;  %v1860_v41 = vld [vmem:[%s3848_s0 + $0x748] sm:$0x3f]  }
 0x100   :  { %1703 = vst [vmem:[%s3849_s1 + $0x3f6] sm:$0x3] %v1702_v42  }
 0x101   :  { %1704 = vst [vmem:[%s3849_s1 + $0x3fe] sm:$0x3c] %v1702_v42   ;;  %v1862_v42 = vld [vmem:[%s3848_s0 + $0x750] sm:$0x3f]  }
 0x102   :  { %1706 = vst [vmem:[%s3849_s1 + $0x3fe] sm:$0x3] %v1705_v43  }
 0x103   :  { %1707 = vst [vmem:[%s3849_s1 + $0x406] sm:$0x3c] %v1705_v43   ;;  %v1865_v43 = vld [vmem:[%s3848_s0 + $0x758] sm:$0x3f]  }
 0x104   :  { %1709 = vst [vmem:[%s3849_s1 + $0x404] sm:$0xf] %v1708_v44  }
 0x105   :  { %1710 = vst [vmem:[%s3849_s1 + $0x40c] sm:$0x30] %v1708_v44   ;;  %v1868_v44 = vld [vmem:[%s3848_s0 + $0x760] sm:$0x3f]  }
 0x106   :  { %1712 = vst [vmem:[%s3849_s1 + $0x40c] sm:$0xf] %v1711_v45  }
 0x107   :  { %1713 = vst [vmem:[%s3849_s1 + $0x414] sm:$0x30] %v1711_v45   ;;  %v1871_v45 = vld [vmem:[%s3848_s0 + $0x768] sm:$0x3f]  }
 0x108   :  { %1715 = vst [vmem:[%s3849_s1 + $0x412] sm:$0x3f] %v1714_v46   ;;  %v1874_v46 = vld [vmem:[%s3848_s0 + $0x770] sm:$0x3f]  }
 0x109   :  { %1717 = vst [vmem:[%s3849_s1 + $0x41a] sm:$0x3f] %v1716_v47   ;;  %v1876_v47 = vld [vmem:[%s3848_s0 + $0x778] sm:$0x3f]  }
 0x10a   :  { %1719 = vst [vmem:[%s3849_s1 + $0x420] sm:$0x3f] %v1718_v48   ;;  %v1878_v48 = vld [vmem:[%s3848_s0 + $0x780] sm:$0x3f]  }
 0x10b   :  { %1721 = vst [vmem:[%s3849_s1 + $0x428] sm:$0x3f] %v1720_v49   ;;  %v1880_v49 = vld [vmem:[%s3848_s0 + $0x788] sm:$0x3f]  }
 0x10c   :  { %1723 = vst [vmem:[%s3849_s1 + $0x426] sm:$0x3] %v1722_v50  }
 0x10d   :  { %1724 = vst [vmem:[%s3849_s1 + $0x42e] sm:$0x3c] %v1722_v50   ;;  %v1882_v50 = vld [vmem:[%s3848_s0 + $0x790] sm:$0x3f]  }
 0x10e   :  { %1726 = vst [vmem:[%s3849_s1 + $0x42e] sm:$0x3] %v1725_v51  }
 0x10f   :  { %1727 = vst [vmem:[%s3849_s1 + $0x436] sm:$0x3c] %v1725_v51   ;;  %v1885_v51 = vld [vmem:[%s3848_s0 + $0x798] sm:$0x3f]  }
 0x110   :  { %1729 = vst [vmem:[%s3849_s1 + $0x434] sm:$0xf] %v1728_v52  }
 0x111   :  { %1730 = vst [vmem:[%s3849_s1 + $0x43c] sm:$0x30] %v1728_v52   ;;  %v1888_v52 = vld [vmem:[%s3848_s0 + $0x7a0] sm:$0x3f]  }
 0x112   :  { %1732 = vst [vmem:[%s3849_s1 + $0x43c] sm:$0xf] %v1731_v53  }
 0x113   :  { %1733 = vst [vmem:[%s3849_s1 + $0x444] sm:$0x30] %v1731_v53   ;;  %v1891_v53 = vld [vmem:[%s3848_s0 + $0x7a8] sm:$0x3f]  }
 0x114   :  { %1735 = vst [vmem:[%s3849_s1 + $0x442] sm:$0x3f] %v1734_v54   ;;  %v1894_v54 = vld [vmem:[%s3848_s0 + $0x7b0] sm:$0x3f]  }
 0x115   :  { %1737 = vst [vmem:[%s3849_s1 + $0x44a] sm:$0x3f] %v1736_v55   ;;  %v1896_v55 = vld [vmem:[%s3848_s0 + $0x7b8] sm:$0x3f]  }
 0x116   :  { %1739 = vst [vmem:[%s3849_s1 + $0x450] sm:$0x3f] %v1738_v56   ;;  %v1898_v56 = vld [vmem:[%s3848_s0 + $0x7c0] sm:$0x3f]  }
 0x117   :  { %1741 = vst [vmem:[%s3849_s1 + $0x458] sm:$0x3f] %v1740_v57   ;;  %v1900_v57 = vld [vmem:[%s3848_s0 + $0x7c8] sm:$0x3f]  }
 0x118   :  { %1743 = vst [vmem:[%s3849_s1 + $0x456] sm:$0x3] %v1742_v58  }
 0x119   :  { %1744 = vst [vmem:[%s3849_s1 + $0x45e] sm:$0x3c] %v1742_v58   ;;  %v1902_v58 = vld [vmem:[%s3848_s0 + $0x7d0] sm:$0x3f]  }
 0x11a   :  { %1746 = vst [vmem:[%s3849_s1 + $0x45e] sm:$0x3] %v1745_v59  }
 0x11b   :  { %1747 = vst [vmem:[%s3849_s1 + $0x466] sm:$0x3c] %v1745_v59   ;;  %v1905_v59 = vld [vmem:[%s3848_s0 + $0x7d8] sm:$0x3f]  }
 0x11c   :  { %1749 = vst [vmem:[%s3849_s1 + $0x464] sm:$0xf] %v1748_v60  }
 0x11d   :  { %1750 = vst [vmem:[%s3849_s1 + $0x46c] sm:$0x30] %v1748_v60   ;;  %v1908_v60 = vld [vmem:[%s3848_s0 + $0x7e0] sm:$0x3f]  }
 0x11e   :  { %1752 = vst [vmem:[%s3849_s1 + $0x46c] sm:$0xf] %v1751_v61  }
 0x11f   :  { %1753 = vst [vmem:[%s3849_s1 + $0x474] sm:$0x30] %v1751_v61   ;;  %v1911_v61 = vld [vmem:[%s3848_s0 + $0x7e8] sm:$0x3f]  }
 0x120   :  { %1755 = vst [vmem:[%s3849_s1 + $0x472] sm:$0x3f] %v1754_v62   ;;  %v1914_v62 = vld [vmem:[%s3848_s0 + $0x7f0] sm:$0x3f]  }
 0x121   :  { %1757 = vst [vmem:[%s3849_s1 + $0x47a] sm:$0x3f] %v1756_v63   ;;  %v1916_v63 = vld [vmem:[%s3848_s0 + $0x7f8] sm:$0x3f]  }
 0x122   :  { %1759 = vst [vmem:[%s3849_s1 + $0x480] sm:$0x3f] %v1758_v0  }
 0x123   :  { %1761 = vst [vmem:[%s3849_s1 + $0x488] sm:$0x3f] %v1760_v1  }
 0x124   :  { %1763 = vst [vmem:[%s3849_s1 + $0x486] sm:$0x3] %v1762_v2  }
 0x125   :  { %1764 = vst [vmem:[%s3849_s1 + $0x48e] sm:$0x3c] %v1762_v2  }
 0x126   :  { %1766 = vst [vmem:[%s3849_s1 + $0x48e] sm:$0x3] %v1765_v3  }
 0x127   :  { %1767 = vst [vmem:[%s3849_s1 + $0x496] sm:$0x3c] %v1765_v3  }
 0x128   :  { %1769 = vst [vmem:[%s3849_s1 + $0x494] sm:$0xf] %v1768_v4  }
 0x129   :  { %1770 = vst [vmem:[%s3849_s1 + $0x49c] sm:$0x30] %v1768_v4  }
 0x12a   :  { %1772 = vst [vmem:[%s3849_s1 + $0x49c] sm:$0xf] %v1771_v5  }
 0x12b   :  { %1773 = vst [vmem:[%s3849_s1 + $0x4a4] sm:$0x30] %v1771_v5  }
 0x12c   :  { %1775 = vst [vmem:[%s3849_s1 + $0x4a2] sm:$0x3f] %v1774_v6  }
 0x12d   :  { %1777 = vst [vmem:[%s3849_s1 + $0x4aa] sm:$0x3f] %v1776_v7  }
 0x12e   :  { %1779 = vst [vmem:[%s3849_s1 + $0x4b0] sm:$0x3f] %v1778_v8  }
 0x12f   :  { %1781 = vst [vmem:[%s3849_s1 + $0x4b8] sm:$0x3f] %v1780_v9  }
 0x130   :  { %1783 = vst [vmem:[%s3849_s1 + $0x4b6] sm:$0x3] %v1782_v10  }
 0x131   :  { %1784 = vst [vmem:[%s3849_s1 + $0x4be] sm:$0x3c] %v1782_v10  }
 0x132   :  { %1786 = vst [vmem:[%s3849_s1 + $0x4be] sm:$0x3] %v1785_v11  }
 0x133   :  { %1787 = vst [vmem:[%s3849_s1 + $0x4c6] sm:$0x3c] %v1785_v11  }
 0x134   :  { %1789 = vst [vmem:[%s3849_s1 + $0x4c4] sm:$0xf] %v1788_v12  }
 0x135   :  { %1790 = vst [vmem:[%s3849_s1 + $0x4cc] sm:$0x30] %v1788_v12  }
 0x136   :  { %1792 = vst [vmem:[%s3849_s1 + $0x4cc] sm:$0xf] %v1791_v13  }
 0x137   :  { %1793 = vst [vmem:[%s3849_s1 + $0x4d4] sm:$0x30] %v1791_v13  }
 0x138   :  { %1795 = vst [vmem:[%s3849_s1 + $0x4d2] sm:$0x3f] %v1794_v14  }
 0x139   :  { %1797 = vst [vmem:[%s3849_s1 + $0x4da] sm:$0x3f] %v1796_v15  }
 0x13a   :  { %1799 = vst [vmem:[%s3849_s1 + $0x4e0] sm:$0x3f] %v1798_v16  }
 0x13b   :  { %1801 = vst [vmem:[%s3849_s1 + $0x4e8] sm:$0x3f] %v1800_v17  }
 0x13c   :  { %1803 = vst [vmem:[%s3849_s1 + $0x4e6] sm:$0x3] %v1802_v18  }
 0x13d   :  { %1804 = vst [vmem:[%s3849_s1 + $0x4ee] sm:$0x3c] %v1802_v18  }
 0x13e   :  { %1806 = vst [vmem:[%s3849_s1 + $0x4ee] sm:$0x3] %v1805_v19  }
 0x13f   :  { %1807 = vst [vmem:[%s3849_s1 + $0x4f6] sm:$0x3c] %v1805_v19  }
 0x140   :  { %1809 = vst [vmem:[%s3849_s1 + $0x4f4] sm:$0xf] %v1808_v20  }
 0x141   :  { %1810 = vst [vmem:[%s3849_s1 + $0x4fc] sm:$0x30] %v1808_v20  }
 0x142   :  { %1812 = vst [vmem:[%s3849_s1 + $0x4fc] sm:$0xf] %v1811_v21  }
 0x143   :  { %1813 = vst [vmem:[%s3849_s1 + $0x504] sm:$0x30] %v1811_v21  }
 0x144   :  { %1815 = vst [vmem:[%s3849_s1 + $0x502] sm:$0x3f] %v1814_v22  }
 0x145   :  { %1817 = vst [vmem:[%s3849_s1 + $0x50a] sm:$0x3f] %v1816_v23  }
 0x146   :  { %1819 = vst [vmem:[%s3849_s1 + $0x510] sm:$0x3f] %v1818_v24  }
 0x147   :  { %1821 = vst [vmem:[%s3849_s1 + $0x518] sm:$0x3f] %v1820_v25  }
 0x148   :  { %1823 = vst [vmem:[%s3849_s1 + $0x516] sm:$0x3] %v1822_v26  }
 0x149   :  { %1824 = vst [vmem:[%s3849_s1 + $0x51e] sm:$0x3c] %v1822_v26  }
 0x14a   :  { %1826 = vst [vmem:[%s3849_s1 + $0x51e] sm:$0x3] %v1825_v27  }
 0x14b   :  { %1827 = vst [vmem:[%s3849_s1 + $0x526] sm:$0x3c] %v1825_v27  }
 0x14c   :  { %1829 = vst [vmem:[%s3849_s1 + $0x524] sm:$0xf] %v1828_v28  }
 0x14d   :  { %1830 = vst [vmem:[%s3849_s1 + $0x52c] sm:$0x30] %v1828_v28  }
 0x14e   :  { %1832 = vst [vmem:[%s3849_s1 + $0x52c] sm:$0xf] %v1831_v29  }
 0x14f   :  { %1833 = vst [vmem:[%s3849_s1 + $0x534] sm:$0x30] %v1831_v29  }
 0x150   :  { %1835 = vst [vmem:[%s3849_s1 + $0x532] sm:$0x3f] %v1834_v30  }
 0x151   :  { %1837 = vst [vmem:[%s3849_s1 + $0x53a] sm:$0x3f] %v1836_v31  }
 0x152   :  { %1839 = vst [vmem:[%s3849_s1 + $0x540] sm:$0x3f] %v1838_v32  }
 0x153   :  { %1841 = vst [vmem:[%s3849_s1 + $0x548] sm:$0x3f] %v1840_v33  }
 0x154   :  { %1843 = vst [vmem:[%s3849_s1 + $0x546] sm:$0x3] %v1842_v34  }
 0x155   :  { %1844 = vst [vmem:[%s3849_s1 + $0x54e] sm:$0x3c] %v1842_v34  }
 0x156   :  { %1846 = vst [vmem:[%s3849_s1 + $0x54e] sm:$0x3] %v1845_v35  }
 0x157   :  { %1847 = vst [vmem:[%s3849_s1 + $0x556] sm:$0x3c] %v1845_v35  }
 0x158   :  { %1849 = vst [vmem:[%s3849_s1 + $0x554] sm:$0xf] %v1848_v36  }
 0x159   :  { %1850 = vst [vmem:[%s3849_s1 + $0x55c] sm:$0x30] %v1848_v36  }
 0x15a   :  { %1852 = vst [vmem:[%s3849_s1 + $0x55c] sm:$0xf] %v1851_v37  }
 0x15b   :  { %1853 = vst [vmem:[%s3849_s1 + $0x564] sm:$0x30] %v1851_v37  }
 0x15c   :  { %1855 = vst [vmem:[%s3849_s1 + $0x562] sm:$0x3f] %v1854_v38  }
 0x15d   :  { %1857 = vst [vmem:[%s3849_s1 + $0x56a] sm:$0x3f] %v1856_v39  }
 0x15e   :  { %1859 = vst [vmem:[%s3849_s1 + $0x570] sm:$0x3f] %v1858_v40  }
 0x15f   :  { %1861 = vst [vmem:[%s3849_s1 + $0x578] sm:$0x3f] %v1860_v41  }
 0x160   :  { %1863 = vst [vmem:[%s3849_s1 + $0x576] sm:$0x3] %v1862_v42  }
 0x161   :  { %1864 = vst [vmem:[%s3849_s1 + $0x57e] sm:$0x3c] %v1862_v42  }
 0x162   :  { %1866 = vst [vmem:[%s3849_s1 + $0x57e] sm:$0x3] %v1865_v43  }
 0x163   :  { %1867 = vst [vmem:[%s3849_s1 + $0x586] sm:$0x3c] %v1865_v43  }
 0x164   :  { %1869 = vst [vmem:[%s3849_s1 + $0x584] sm:$0xf] %v1868_v44  }
 0x165   :  { %1870 = vst [vmem:[%s3849_s1 + $0x58c] sm:$0x30] %v1868_v44  }
 0x166   :  { %1872 = vst [vmem:[%s3849_s1 + $0x58c] sm:$0xf] %v1871_v45  }
 0x167   :  { %1873 = vst [vmem:[%s3849_s1 + $0x594] sm:$0x30] %v1871_v45  }
 0x168   :  { %1875 = vst [vmem:[%s3849_s1 + $0x592] sm:$0x3f] %v1874_v46  }
 0x169   :  { %1877 = vst [vmem:[%s3849_s1 + $0x59a] sm:$0x3f] %v1876_v47  }
 0x16a   :  { %1879 = vst [vmem:[%s3849_s1 + $0x5a0] sm:$0x3f] %v1878_v48  }
 0x16b   :  { %1881 = vst [vmem:[%s3849_s1 + $0x5a8] sm:$0x3f] %v1880_v49  }
 0x16c   :  { %1883 = vst [vmem:[%s3849_s1 + $0x5a6] sm:$0x3] %v1882_v50  }
 0x16d   :  { %1884 = vst [vmem:[%s3849_s1 + $0x5ae] sm:$0x3c] %v1882_v50  }
 0x16e   :  { %1886 = vst [vmem:[%s3849_s1 + $0x5ae] sm:$0x3] %v1885_v51  }
 0x16f   :  { %1887 = vst [vmem:[%s3849_s1 + $0x5b6] sm:$0x3c] %v1885_v51  }
 0x170   :  { %1889 = vst [vmem:[%s3849_s1 + $0x5b4] sm:$0xf] %v1888_v52  }
 0x171   :  { %1890 = vst [vmem:[%s3849_s1 + $0x5bc] sm:$0x30] %v1888_v52  }
 0x172   :  { %1892 = vst [vmem:[%s3849_s1 + $0x5bc] sm:$0xf] %v1891_v53  }
 0x173   :  { %1893 = vst [vmem:[%s3849_s1 + $0x5c4] sm:$0x30] %v1891_v53  }
 0x174   :  { %1895 = vst [vmem:[%s3849_s1 + $0x5c2] sm:$0x3f] %v1894_v54  }
 0x175   :  { %1897 = vst [vmem:[%s3849_s1 + $0x5ca] sm:$0x3f] %v1896_v55  }
 0x176   :  { %1899 = vst [vmem:[%s3849_s1 + $0x5d0] sm:$0x3f] %v1898_v56  }
 0x177   :  { %1901 = vst [vmem:[%s3849_s1 + $0x5d8] sm:$0x3f] %v1900_v57  }
 0x178   :  { %1903 = vst [vmem:[%s3849_s1 + $0x5d6] sm:$0x3] %v1902_v58  }
 0x179   :  { %1904 = vst [vmem:[%s3849_s1 + $0x5de] sm:$0x3c] %v1902_v58  }
 0x17a   :  { %1906 = vst [vmem:[%s3849_s1 + $0x5de] sm:$0x3] %v1905_v59  }
 0x17b   :  { %1907 = vst [vmem:[%s3849_s1 + $0x5e6] sm:$0x3c] %v1905_v59  }
 0x17c   :  { %1909 = vst [vmem:[%s3849_s1 + $0x5e4] sm:$0xf] %v1908_v60  }
 0x17d   :  { %1910 = vst [vmem:[%s3849_s1 + $0x5ec] sm:$0x30] %v1908_v60  }
 0x17e   :  { %1912 = vst [vmem:[%s3849_s1 + $0x5ec] sm:$0xf] %v1911_v61  }
 0x17f   :  { %1913 = vst [vmem:[%s3849_s1 + $0x5f4] sm:$0x30] %v1911_v61  }
 0x180   :  { %1915 = vst [vmem:[%s3849_s1 + $0x5f2] sm:$0x3f] %v1914_v62  }
 0x181   :  { %1917 = vst [vmem:[%s3849_s1 + $0x5fa] sm:$0x3f] %v1916_v63  }

// kernel: cnn_forward.6
= control target key start
LH: loop header
LB: loop body
LE: loop exit
PB: predicated region body
PF: predicated region fallthrough
CT: control target
= control target key end

     0   :  { %s2191_s1 = inlined_call_operand.vmem [shape: bf16[768,256], index: 1, kind: input, shape index: {}]   ;;  %s2192_s0 = inlined_call_operand.vmem [shape: bf16[32,768], index: 0, kind: input, shape index: {}]   ;;  %s2193_s2 = inlined_call_operand.vmem [shape: f32[1,256], index: 2, kind: input, shape index: {}]   ;;  %s2194_s3 = inlined_call_operand.vmem [shape: f32[32,256], index: 3, kind: output, shape index: {}]  }
   0x1   :  { %v1022_v0 = vld [vmem:[%s2191_s1 + $0x70] sm:$0xf]  ;;  %v1375_v1 = vld [vmem:[%s2191_s1 + $0x74] sm:$0xf0]  ;;  %v1014_v11 = vld [vmem:[%s2191_s1 + $0x60] sm:$0xf] }
   0x2   :  { %v1086_v2 = vld [vmem:[%s2191_s1 + $0xf0] sm:$0xf]  ;;  %v1023_v3 = vor.u32 %v1375_v1, %v1022_v0  ;;  %v1391_v4 = vld [vmem:[%s2191_s1 + $0xf4] sm:$0xf0]  ;;  %v1373_v13 = vld [vmem:[%s2191_s1 + $0x64] sm:$0xf0] }
   0x3   :  { %v1150_v5 = vld [vmem:[%s2191_s1 + $0x170] sm:$0xf]  ;;  %v1407_v6 = vld [vmem:[%s2191_s1 + $0x174] sm:$0xf0]  ;;  %v1087_v7 = vor.u32 %v1391_v4, %v1086_v2  ;;  %v1078_v14 = vld [vmem:[%s2191_s1 + $0xe0] sm:$0xf]  ;;  %v1015_v16 = vor.u32 %v1373_v13, %v1014_v11 }
   0x4   :  { %v1151_v8 = vor.u32 %v1407_v6, %v1150_v5  ;;  %v1214_v9 = vld [vmem:[%s2191_s1 + $0x1f0] sm:$0xf]  ;;  %v1423_v10 = vld [vmem:[%s2191_s1 + $0x1f4] sm:$0xf0]  ;;  %668 = vmatpush.bf16.msra.mxu0 %v1023_v3  ;;  %v1389_v15 = vld [vmem:[%s2191_s1 + $0xe4] sm:$0xf0] }
   0x5   :  { %v1215_v12 = vor.u32 %v1423_v10, %v1214_v9  ;;  %687 = vmatpush.bf16.msra.mxu1 %v1087_v7  ;;  %v1079_v17 = vor.u32 %v1389_v15, %v1078_v14  ;;  %v1142_v18 = vld [vmem:[%s2191_s1 + $0x160] sm:$0xf]  ;;  %v1405_v19 = vld [vmem:[%s2191_s1 + $0x164] sm:$0xf0]  ;;  %v1006_v23 = vld [vmem:[%s2191_s1 + $0x50] sm:$0xf] }
   0x6   :  { %706 = vmatpush.bf16.msra.mxu2 %v1151_v8  ;;  %v1206_v20 = vld [vmem:[%s2191_s1 + $0x1e0] sm:$0xf]  ;;  %v1143_v21 = vor.u32 %v1405_v19, %v1142_v18  ;;  %v1421_v22 = vld [vmem:[%s2191_s1 + $0x1e4] sm:$0xf0]  ;;  %v1371_v24 = vld [vmem:[%s2191_s1 + $0x54] sm:$0xf0] }
   0x7   :  { %725 = vmatpush.bf16.msra.mxu3 %v1215_v12  ;;  %v1207_v25 = vor.u32 %v1421_v22, %v1206_v20  ;;  %v1070_v26 = vld [vmem:[%s2191_s1 + $0xd0] sm:$0xf]  ;;  %v1387_v27 = vld [vmem:[%s2191_s1 + $0xd4] sm:$0xf0]  ;;  %v1007_v29 = vor.u32 %v1371_v24, %v1006_v23  ;;  %v998_v35 = vld [vmem:[%s2191_s1 + $0x40] sm:$0xf] }
   0x8   :  { %v1134_v28 = vld [vmem:[%s2191_s1 + $0x150] sm:$0xf]  ;;  %669 = vmatpush.bf16.msra.mxu0 %v1015_v16  ;;  %v1403_v30 = vld [vmem:[%s2191_s1 + $0x154] sm:$0xf0]  ;;  %v1071_v33 = vor.u32 %v1387_v27, %v1070_v26  ;;  %v1369_v36 = vld [vmem:[%s2191_s1 + $0x44] sm:$0xf0] }
   0x9   :  { %v1198_v31 = vld [vmem:[%s2191_s1 + $0x1d0] sm:$0xf]  ;;  %v1419_v32 = vld [vmem:[%s2191_s1 + $0x1d4] sm:$0xf0]  ;;  %688 = vmatpush.bf16.msra.mxu1 %v1079_v17  ;;  %v1135_v34 = vor.u32 %v1403_v30, %v1134_v28  ;;  %v1062_v37 = vld [vmem:[%s2191_s1 + $0xc0] sm:$0xf]  ;;  %v999_v44 = vor.u32 %v1369_v36, %v998_v35 }
   0xa   :  { %707 = vmatpush.bf16.msra.mxu2 %v1143_v21  ;;  %v1199_v38 = vor.u32 %v1419_v32, %v1198_v31  ;;  %v1385_v39 = vld [vmem:[%s2191_s1 + $0xc4] sm:$0xf0]  ;;  %v1126_v40 = vld [vmem:[%s2191_s1 + $0x140] sm:$0xf]  ;;  %v990_v47 = vld [vmem:[%s2191_s1 + $0x30] sm:$0xf] }
   0xb   :  { %726 = vmatpush.bf16.msra.mxu3 %v1207_v25  ;;  %v1401_v41 = vld [vmem:[%s2191_s1 + $0x144] sm:$0xf0]  ;;  %v1190_v42 = vld [vmem:[%s2191_s1 + $0x1c0] sm:$0xf]  ;;  %v1063_v45 = vor.u32 %v1385_v39, %v1062_v37  ;;  %v1367_v48 = vld [vmem:[%s2191_s1 + $0x34] sm:$0xf0] }
   0xc   :  { %v1417_v43 = vld [vmem:[%s2191_s1 + $0x1c4] sm:$0xf0]  ;;  %670 = vmatpush.bf16.msra.mxu0 %v1007_v29  ;;  %v1127_v46 = vor.u32 %v1401_v41, %v1126_v40  ;;  %v1054_v49 = vld [vmem:[%s2191_s1 + $0xb0] sm:$0xf]  ;;  %v1383_v51 = vld [vmem:[%s2191_s1 + $0xb4] sm:$0xf0]  ;;  %v991_v56 = vor.u32 %v1367_v48, %v990_v47 }
   0xd   :  { %689 = vmatpush.bf16.msra.mxu1 %v1071_v33  ;;  %v1191_v50 = vor.u32 %v1417_v43, %v1190_v42  ;;  %v1118_v52 = vld [vmem:[%s2191_s1 + $0x130] sm:$0xf]  ;;  %v1399_v53 = vld [vmem:[%s2191_s1 + $0x134] sm:$0xf0]  ;;  %v1055_v57 = vor.u32 %v1383_v51, %v1054_v49  ;;  %v982_v59 = vld [vmem:[%s2191_s1 + $0x20] sm:$0xf] }
   0xe   :  { %708 = vmatpush.bf16.msra.mxu2 %v1135_v34  ;;  %v1182_v54 = vld [vmem:[%s2191_s1 + $0x1b0] sm:$0xf]  ;;  %v1415_v55 = vld [vmem:[%s2191_s1 + $0x1b4] sm:$0xf0]  ;;  %v1119_v58 = vor.u32 %v1399_v53, %v1118_v52  ;;  %v1365_v60 = vld [vmem:[%s2191_s1 + $0x24] sm:$0xf0] }
   0xf   :  { %727 = vmatpush.bf16.msra.mxu3 %v1199_v38  ;;  %v1046_v61 = vld [vmem:[%s2191_s1 + $0xa0] sm:$0xf]  ;;  %v1183_v62 = vor.u32 %v1415_v55, %v1182_v54  ;;  %v1381_v63 = vld [vmem:[%s2191_s1 + $0xa4] sm:$0xf0]  ;;  %v983_v4 = vor.u32 %v1365_v60, %v982_v59  ;;  %v974_v7 = vld [vmem:[%s2191_s1 + $0x10] sm:$0xf] }
  0x10   :  { %671 = vmatpush.bf16.msra.mxu0 %v999_v44  ;;  %v1110_v0 = vld [vmem:[%s2191_s1 + $0x120] sm:$0xf]  ;;  %v1397_v1 = vld [vmem:[%s2191_s1 + $0x124] sm:$0xf0]  ;;  %v1047_v5 = vor.u32 %v1381_v63, %v1046_v61  ;;  %v1363_v8 = vld [vmem:[%s2191_s1 + $0x14] sm:$0xf0] }
  0x11   :  { %690 = vmatpush.bf16.msra.mxu1 %v1063_v45  ;;  %v1174_v2 = vld [vmem:[%s2191_s1 + $0x1a0] sm:$0xf]  ;;  %v1413_v3 = vld [vmem:[%s2191_s1 + $0x1a4] sm:$0xf0]  ;;  %v1111_v6 = vor.u32 %v1397_v1, %v1110_v0  ;;  %v1038_v9 = vld [vmem:[%s2191_s1 + $0x90] sm:$0xf]  ;;  %v975_v17 = vor.u32 %v1363_v8, %v974_v7 }
  0x12   :  { %709 = vmatpush.bf16.msra.mxu2 %v1127_v46  ;;  %v1175_v10 = vor.u32 %v1413_v3, %v1174_v2  ;;  %v1379_v11 = vld [vmem:[%s2191_s1 + $0x94] sm:$0xf0]  ;;  %v1102_v12 = vld [vmem:[%s2191_s1 + $0x110] sm:$0xf]  ;;  %v966_v16 = vld [vmem:[%s2191_s1] sm:$0xf] }
  0x13   :  { %728 = vmatpush.bf16.msra.mxu3 %v1191_v50  ;;  %v1395_v13 = vld [vmem:[%s2191_s1 + $0x114] sm:$0xf0]  ;;  %v1166_v14 = vld [vmem:[%s2191_s1 + $0x190] sm:$0xf]  ;;  %v1361_v18 = vld [vmem:[%s2191_s1 + $0x4] sm:$0xf0]  ;;  %v1039_v21 = vor.u32 %v1379_v11, %v1038_v9 }
  0x14   :  { %672 = vmatpush.bf16.msra.mxu0 %v991_v56  ;;  %v1411_v15 = vld [vmem:[%s2191_s1 + $0x194] sm:$0xf0]  ;;  %v1030_v19 = vld [vmem:[%s2191_s1 + $0x80] sm:$0xf]  ;;  %v1377_v20 = vld [vmem:[%s2191_s1 + $0x84] sm:$0xf0]  ;;  %v1103_v22 = vor.u32 %v1395_v13, %v1102_v12  ;;  %v967_v34 = vor.u32 %v1361_v18, %v966_v16 }
  0x15   :  { %691 = vmatpush.bf16.msra.mxu1 %v1055_v57  ;;  %v1094_v23 = vld [vmem:[%s2191_s1 + $0x100] sm:$0xf]  ;;  %v1393_v24 = vld [vmem:[%s2191_s1 + $0x104] sm:$0xf0]  ;;  %v1167_v26 = vor.u32 %v1411_v15, %v1166_v14  ;;  %v1351_v29 = vld [vmem:[%s2192_s0 + $0x14] sm:$0xf0]  ;;  %v1031_v38 = vor.u32 %v1377_v20, %v1030_v19 }
  0x16   :  { %710 = vmatpush.bf16.msra.mxu2 %v1119_v58  ;;  %v1158_v25 = vld [vmem:[%s2191_s1 + $0x180] sm:$0xf]  ;;  %v1409_v27 = vld [vmem:[%s2191_s1 + $0x184] sm:$0xf0]  ;;  %v1348_v30 = vld [vmem:[%s2192_s0 + $0x4] sm:$0xf]  ;;  %v1095_v39 = vor.u32 %v1393_v24, %v1094_v23 }
  0x17   :  { %729 = vmatpush.bf16.msra.mxu3 %v1183_v62  ;;  %v918_v28 = vld [vmem:[%s2192_s0] sm:$0xf]  ;;  %v920_v31 = vld [vmem:[%s2192_s0 + $0x18] sm:$0xf0]  ;;  %v1374_v32 = vld [vmem:[%s2191_s1 + $0x74] sm:$0xf]  ;;  %v1159_v43 = vor.u32 %v1409_v27, %v1158_v25 }
  0x18   :  { %673 = vmatpush.bf16.msra.mxu0 %v983_v4  ;;  %v1024_v33 = vld [vmem:[%s2191_s1 + $0x78] sm:$0xf0]  ;;  %v926_v35 = vld [vmem:[%s2192_s0 + $0x8] sm:$0xf]  ;;  %v1342_v36 = vld [vmem:[%s2191_s1 + $0x2f0] sm:$0xf]  ;;  %v1713_v48 = vor.u32 %v1351_v29, %v918_v28  ;;  %v1724_v53 = vor.u32 %v1348_v30, %v920_v31 }
  0x19   :  { %692 = vmatpush.bf16.msra.mxu1 %v1047_v5  ;;  %v1455_v37 = vld [vmem:[%s2191_s1 + $0x2f4] sm:$0xf0]  ;;  %v1352_v40 = vld [vmem:[%s2192_s0 + $0x1c] sm:$0xf0]  ;;  %v1349_v41 = vld [vmem:[%s2192_s0 + $0xc] sm:$0xf]  ;;  %v1027_v44 = vor.u32 %v1374_v32, %v1024_v33 }
  0x1a   :  { %711 = vmatpush.bf16.msra.mxu2 %v1111_v6  ;;  %v928_v42 = vld [vmem:[%s2192_s0 + $0x20] sm:$0xf0]  ;;  %v1278_v45 = vld [vmem:[%s2191_s1 + $0x270] sm:$0xf]  ;;  %v1439_v46 = vld [vmem:[%s2191_s1 + $0x274] sm:$0xf0]  ;;  %v1343_v49 = vor.u32 %v1455_v37, %v1342_v36  ;;  %v1726_v54 = vor.u32 %v1352_v40, %v926_v35 }
  0x1b   :  { %730 = vmatpush.bf16.msra.mxu3 %v1175_v10  ;;  %v1390_v47 = vld [vmem:[%s2191_s1 + $0xf4] sm:$0xf]  ;;  %v1088_v50 = vld [vmem:[%s2191_s1 + $0xf8] sm:$0xf0]  ;;  %v1372_v51 = vld [vmem:[%s2191_s1 + $0x64] sm:$0xf]  ;;  %v1734_v57 = vor.u32 %v1349_v41, %v928_v42  ;;  %v1279_v58 = vor.u32 %v1439_v46, %v1278_v45 }
  0x1c   :  { %674 = vmatpush.bf16.msra.mxu0 %v975_v17  ;;  %v1016_v52 = vld [vmem:[%s2191_s1 + $0x68] sm:$0xf0]  ;;  %v1334_v55 = vld [vmem:[%s2191_s1 + $0x2e0] sm:$0xf]  ;;  %v1453_v56 = vld [vmem:[%s2191_s1 + $0x2e4] sm:$0xf0]  ;;  %v1091_v59 = vor.u32 %v1390_v47, %v1088_v50 }
  0x1d   :  { %693 = vmatpush.bf16.msra.mxu1 %v1039_v21  ;;  %v1019_v60 = vor.u32 %v1372_v51, %v1016_v52  ;;  %v1270_v61 = vld [vmem:[%s2191_s1 + $0x260] sm:$0xf]  ;;  %v1437_v62 = vld [vmem:[%s2191_s1 + $0x264] sm:$0xf0]  ;;  %v1388_v63 = vld [vmem:[%s2191_s1 + $0xe4] sm:$0xf]  ;;  %v1335_v0 = vor.u32 %v1453_v56, %v1334_v55 }
  0x1e   :  { %712 = vmatpush.bf16.msra.mxu2 %v1103_v22  ;;  %v1080_v1 = vld [vmem:[%s2191_s1 + $0xe8] sm:$0xf0]  ;;  %v1370_v2 = vld [vmem:[%s2191_s1 + $0x54] sm:$0xf]  ;;  %v1008_v3 = vld [vmem:[%s2191_s1 + $0x58] sm:$0xf0]  ;;  %v1271_v6 = vor.u32 %v1437_v62, %v1270_v61 }
  0x1f   :  { %731 = vmatpush.bf16.msra.mxu3 %v1167_v26  ;;  %v1326_v4 = vld [vmem:[%s2191_s1 + $0x2d0] sm:$0xf]  ;;  %v1451_v5 = vld [vmem:[%s2191_s1 + $0x2d4] sm:$0xf0]  ;;  %v1083_v7 = vor.u32 %v1388_v63, %v1080_v1  ;;  %v1011_v8 = vor.u32 %v1370_v2, %v1008_v3  ;;  %v1386_v11 = vld [vmem:[%s2191_s1 + $0xd4] sm:$0xf] }
  0x20   :  { %675 = vmatpush.bf16.msra.mxu0 %v967_v34  ;;  %v1262_v9 = vld [vmem:[%s2191_s1 + $0x250] sm:$0xf]  ;;  %v1435_v10 = vld [vmem:[%s2191_s1 + $0x254] sm:$0xf0]  ;;  %v1327_v12 = vor.u32 %v1451_v5, %v1326_v4  ;;  %v1072_v13 = vld [vmem:[%s2191_s1 + $0xd8] sm:$0xf0] }
  0x21   :  { %694 = vmatpush.bf16.msra.mxu1 %v1031_v38  ;;  %v1368_v14 = vld [vmem:[%s2191_s1 + $0x44] sm:$0xf]  ;;  %v1000_v15 = vld [vmem:[%s2191_s1 + $0x48] sm:$0xf0]  ;;  %v1318_v16 = vld [vmem:[%s2191_s1 + $0x2c0] sm:$0xf]  ;;  %v1263_v18 = vor.u32 %v1435_v10, %v1262_v9  ;;  %v1075_v22 = vor.u32 %v1386_v11, %v1072_v13 }
  0x22   :  { %713 = vmatpush.bf16.msra.mxu2 %v1095_v39  ;;  %v1449_v17 = vld [vmem:[%s2191_s1 + $0x2c4] sm:$0xf0]  ;;  %v1254_v19 = vld [vmem:[%s2191_s1 + $0x240] sm:$0xf]  ;;  %v1384_v21 = vld [vmem:[%s2191_s1 + $0xc4] sm:$0xf]  ;;  %v1003_v23 = vor.u32 %v1368_v14, %v1000_v15 }
  0x23   :  { %732 = vmatpush.bf16.msra.mxu3 %v1159_v43  ;;  %676 = vmatmul.bf16.vlgmr.msra.gmra.mxu0 %v1713_v48  ;;  %v1433_v20 = vld [vmem:[%s2191_s1 + $0x244] sm:$0xf0]  ;;  %v1064_v24 = vld [vmem:[%s2191_s1 + $0xc8] sm:$0xf0]  ;;  %v942_v25 = vld [vmem:[%s2192_s0 + $0x30] sm:$0xf]  ;;  %v1319_v27 = vor.u32 %v1449_v17, %v1318_v16 }
  0x24   :  { %695 = vmatmul.bf16.vlgmr.msra.gmra.mxu1 %v1724_v53  ;;  %744 = vmatpush.bf16.msrb.mxu0 %v1279_v58  ;;  %v1357_v26 = vld [vmem:[%s2192_s0 + $0x44] sm:$0xf0]  ;;  %v1354_v28 = vld [vmem:[%s2192_s0 + $0x34] sm:$0xf]  ;;  %v944_v29 = vld [vmem:[%s2192_s0 + $0x48] sm:$0xf0]  ;;  %v1255_v35 = vor.u32 %v1433_v20, %v1254_v19  ;;  %v1067_v39 = vor.u32 %v1384_v21, %v1064_v24 }
  0x25   :  { %763 = vmatpush.bf16.msrb.mxu1 %v1343_v49  ;;  %714 = vmatmul.bf16.vlgmr.msra.gmra.mxu2 %v1726_v54  ;;  %v1366_v30 = vld [vmem:[%s2191_s1 + $0x34] sm:$0xf]  ;;  %v992_v31 = vld [vmem:[%s2191_s1 + $0x38] sm:$0xf0]  ;;  %v950_v32 = vld [vmem:[%s2192_s0 + $0x38] sm:$0xf]  ;;  %v1856_v50 = vor.u32 %v1354_v28, %v944_v29 }
  0x26   :  { %782 = vmatpush.bf16.msrb.mxu2 %v1027_v44  ;;  %733 = vmatmul.bf16.vlgmr.msra.gmra.mxu3 %v1734_v57  ;;  %v1310_v33 = vld [vmem:[%s2191_s1 + $0x2b0] sm:$0xf]  ;;  %v1447_v34 = vld [vmem:[%s2191_s1 + $0x2b4] sm:$0xf0]  ;;  %v1355_v37 = vld [vmem:[%s2192_s0 + $0x3c] sm:$0xf]  ;;  %v995_v40 = vor.u32 %v1366_v30, %v992_v31  ;;  %v1845_v44 = vor.u32 %v1357_v26, %v942_v25 }
  0x27   :  { %801 = vmatpush.bf16.msrb.mxu3 %v1091_v59  ;;  %v1358_v36 = vld [vmem:[%s2192_s0 + $0x4c] sm:$0xf0]  ;;  %v952_v38 = vld [vmem:[%s2192_s0 + $0x50] sm:$0xf0]  ;;  %v1431_v42 = vld [vmem:[%s2191_s1 + $0x234] sm:$0xf0]  ;;  %v1311_v45 = vor.u32 %v1447_v34, %v1310_v33 }
  0x28   :  { %745 = vmatpush.bf16.msrb.mxu0 %v1271_v6  ;;  %v1246_v41 = vld [vmem:[%s2191_s1 + $0x230] sm:$0xf]  ;;  %v1382_v43 = vld [vmem:[%s2191_s1 + $0xb4] sm:$0xf]  ;;  %v1056_v46 = vld [vmem:[%s2191_s1 + $0xb8] sm:$0xf0]  ;;  %v1858_v51 = vor.u32 %v1358_v36, %v950_v32  ;;  %v1866_v56 = vor.u32 %v1355_v37, %v952_v38 }
  0x29   :  { %764 = vmatpush.bf16.msrb.mxu1 %v1335_v0  ;;  %v1364_v47 = vld [vmem:[%s2191_s1 + $0x24] sm:$0xf]  ;;  %v984_v49 = vld [vmem:[%s2191_s1 + $0x28] sm:$0xf0]  ;;  %v1302_v52 = vld [vmem:[%s2191_s1 + $0x2a0] sm:$0xf]  ;;  %v1247_v58 = vor.u32 %v1431_v42, %v1246_v41  ;;  %v1059_v59 = vor.u32 %v1382_v43, %v1056_v46 }
  0x2a   :  { %783 = vmatpush.bf16.msrb.mxu2 %v1019_v60  ;;  %v1445_v55 = vld [vmem:[%s2191_s1 + $0x2a4] sm:$0xf0]  ;;  %v987_v60 = vor.u32 %v1364_v47, %v984_v49  ;;  %v1238_v61 = vld [vmem:[%s2191_s1 + $0x220] sm:$0xf]  ;;  %v1380_v63 = vld [vmem:[%s2191_s1 + $0xa4] sm:$0xf] }
  0x2b   :  { %802 = vmatpush.bf16.msrb.mxu3 %v1083_v7  ;;  %v1429_v62 = vld [vmem:[%s2191_s1 + $0x224] sm:$0xf0]  ;;  %v1303_v0 = vor.u32 %v1445_v55, %v1302_v52  ;;  %v1048_v1 = vld [vmem:[%s2191_s1 + $0xa8] sm:$0xf0]  ;;  %v1362_v2 = vld [vmem:[%s2191_s1 + $0x14] sm:$0xf] }
  0x2c   :  { %746 = vmatpush.bf16.msrb.mxu0 %v1263_v18  ;;  %v976_v3 = vld [vmem:[%s2191_s1 + $0x18] sm:$0xf0]  ;;  %v1294_v4 = vld [vmem:[%s2191_s1 + $0x290] sm:$0xf]  ;;  %v1443_v5 = vld [vmem:[%s2191_s1 + $0x294] sm:$0xf0]  ;;  %v1239_v6 = vor.u32 %v1429_v62, %v1238_v61 }
  0x2d   :  { %765 = vmatpush.bf16.msrb.mxu1 %v1327_v12  ;;  %v1230_v7 = vld [vmem:[%s2191_s1 + $0x210] sm:$0xf]  ;;  %v979_v9 = vor.u32 %v1362_v2, %v976_v3  ;;  %v1427_v10 = vld [vmem:[%s2191_s1 + $0x214] sm:$0xf0]  ;;  %v1378_v11 = vld [vmem:[%s2191_s1 + $0x94] sm:$0xf]  ;;  %v1295_v13 = vor.u32 %v1443_v5, %v1294_v4 }
  0x2e   :  { %784 = vmatpush.bf16.msrb.mxu2 %v1011_v8  ;;  %v1051_v8 = vor.u32 %v1380_v63, %v1048_v1  ;;  %v1040_v12 = vld [vmem:[%s2191_s1 + $0x98] sm:$0xf0]  ;;  %v1360_v14 = vld [vmem:[%s2191_s1 + $0x4] sm:$0xf]  ;;  %v968_v15 = vld [vmem:[%s2191_s1 + $0x8] sm:$0xf0]  ;;  %v1231_v20 = vor.u32 %v1427_v10, %v1230_v7 }
  0x2f   :  { %803 = vmatpush.bf16.msrb.mxu3 %v1075_v22  ;;  %v1286_v16 = vld [vmem:[%s2191_s1 + $0x280] sm:$0xf]  ;;  %v1441_v17 = vld [vmem:[%s2191_s1 + $0x284] sm:$0xf0]  ;;  %v1438_v18 = vld [vmem:[%s2191_s1 + $0x274] sm:$0xf]  ;;  %v1043_v24 = vor.u32 %v1378_v11, %v1040_v12  ;;  %v971_v25 = vor.u32 %v1360_v14, %v968_v15 }
  0x30   :  { %747 = vmatpush.bf16.msrb.mxu0 %v1255_v35  ;;  %v1280_v19 = vld [vmem:[%s2191_s1 + $0x278] sm:$0xf0]  ;;  %v1222_v21 = vld [vmem:[%s2191_s1 + $0x200] sm:$0xf]  ;;  %v1422_v22 = vld [vmem:[%s2191_s1 + $0x1f4] sm:$0xf]  ;;  %v1287_v29 = vor.u32 %v1441_v17, %v1286_v16 }
  0x31   :  { %766 = vmatpush.bf16.msrb.mxu1 %v1319_v27  ;;  %v1425_v26 = vld [vmem:[%s2191_s1 + $0x204] sm:$0xf0]  ;;  %v1376_v27 = vld [vmem:[%s2191_s1 + $0x84] sm:$0xf]  ;;  %v1032_v28 = vld [vmem:[%s2191_s1 + $0x88] sm:$0xf0]  ;;  %v1283_v31 = vor.u32 %v1438_v18, %v1280_v19 }
  0x32   :  { %785 = vmatpush.bf16.msrb.mxu2 %v1003_v23  ;;  %v1216_v23 = vld [vmem:[%s2191_s1 + $0x1f8] sm:$0xf0]  ;;  %v934_v30 = vld [vmem:[%s2192_s0 + $0x10] sm:$0xf]  ;;  %v1406_v32 = vld [vmem:[%s2191_s1 + $0x174] sm:$0xf]  ;;  %v1035_v43 = vor.u32 %v1376_v27, %v1032_v28 }
  0x33   :  { %804 = vmatpush.bf16.msrb.mxu3 %v1067_v39  ;;  %681 = vmatmul.bf16.gmra.mxu0 %v1845_v44  ;;  %v1152_v33 = vld [vmem:[%s2191_s1 + $0x178] sm:$0xf0]  ;;  %v1454_v34 = vld [vmem:[%s2191_s1 + $0x2f4] sm:$0xf]  ;;  %v1219_v35 = vor.u32 %v1422_v22, %v1216_v23  ;;  %v1436_v37 = vld [vmem:[%s2191_s1 + $0x264] sm:$0xf]  ;;  %v1223_v39 = vor.u32 %v1425_v26, %v1222_v21 }
  0x34   :  { %700 = vmatmul.bf16.gmra.mxu1 %v1856_v50  ;;  %748 = vmatpush.bf16.msrb.mxu0 %v1247_v58  ;;  %v1344_v36 = vld [vmem:[%s2191_s1 + $0x2f8] sm:$0xf0]  ;;  %v1272_v38 = vld [vmem:[%s2191_s1 + $0x268] sm:$0xf0]  ;;  %v1350_v41 = vld [vmem:[%s2192_s0 + $0x14] sm:$0xf] }
  0x35   :  { %767 = vmatpush.bf16.msrb.mxu1 %v1311_v45  ;;  %719 = vmatmul.bf16.gmra.mxu2 %v1858_v51  ;;  %v936_v42 = vld [vmem:[%s2192_s0 + $0x28] sm:$0xf0]  ;;  %v1155_v45 = vor.u32 %v1406_v32, %v1152_v33  ;;  %v1404_v46 = vld [vmem:[%s2191_s1 + $0x164] sm:$0xf]  ;;  %v1347_v49 = vor.u32 %v1454_v34, %v1344_v36  ;;  %v1275_v52 = vor.u32 %v1436_v37, %v1272_v38  ;;  %v1434_v63 = vld [vmem:[%s2191_s1 + $0x254] sm:$0xf] }
  0x36   :  { %786 = vmatpush.bf16.msrb.mxu2 %v995_v40  ;;  %738 = vmatmul.bf16.gmra.mxu3 %v1866_v56  ;;  %v1353_v40 = vld [vmem:[%s2192_s0 + $0x24] sm:$0xf0]  ;;  %v1144_v47 = vld [vmem:[%s2191_s1 + $0x168] sm:$0xf0]  ;;  %v1420_v55 = vld [vmem:[%s2191_s1 + $0x1e4] sm:$0xf]  ;;  %v1991_v61 = vor.u32 %v1350_v41, %v936_v42 }
  0x37   :  { %805 = vmatpush.bf16.msrb.mxu3 %v1059_v59  ;;  %v1208_v58 = vld [vmem:[%s2191_s1 + $0x1e8] sm:$0xf0]  ;;  %v1452_v59 = vld [vmem:[%s2191_s1 + $0x2e4] sm:$0xf]  ;;  %v1147_v1 = vor.u32 %v1404_v46, %v1144_v47  ;;  %v1402_v3 = vld [vmem:[%s2191_s1 + $0x154] sm:$0xf] }
  0x38   :  { %749 = vmatpush.bf16.msrb.mxu0 %v1239_v6  ;;  %v1336_v62 = vld [vmem:[%s2191_s1 + $0x2e8] sm:$0xf0]  ;;  %v1211_v2 = vor.u32 %v1420_v55, %v1208_v58  ;;  %v1136_v4 = vld [vmem:[%s2191_s1 + $0x158] sm:$0xf0]  ;;  %v1418_v7 = vld [vmem:[%s2191_s1 + $0x1d4] sm:$0xf] }
  0x39   :  { %768 = vmatpush.bf16.msrb.mxu1 %v1303_v0  ;;  %v1264_v0 = vld [vmem:[%s2191_s1 + $0x258] sm:$0xf0]  ;;  %v1339_v5 = vor.u32 %v1452_v59, %v1336_v62  ;;  %v1432_v11 = vld [vmem:[%s2191_s1 + $0x244] sm:$0xf]  ;;  %v1256_v12 = vld [vmem:[%s2191_s1 + $0x248] sm:$0xf0] }
  0x3a   :  { %787 = vmatpush.bf16.msrb.mxu2 %v987_v60  ;;  %v1989_v60 = vor.u32 %v1353_v40, %v934_v30  ;;  %v1267_v6 = vor.u32 %v1434_v63, %v1264_v0  ;;  %v1328_v10 = vld [vmem:[%s2191_s1 + $0x2d8] sm:$0xf0]  ;;  %v1400_v15 = vld [vmem:[%s2191_s1 + $0x144] sm:$0xf]  ;;  %v1128_v16 = vld [vmem:[%s2191_s1 + $0x148] sm:$0xf0]  ;;  %v1259_v18 = vor.u32 %v1432_v11, %v1256_v12 }
  0x3b   :  { %806 = vmatpush.bf16.msrb.mxu3 %v1051_v8  ;;  %v1200_v8 = vld [vmem:[%s2191_s1 + $0x1d8] sm:$0xf0]  ;;  %v1448_v19 = vld [vmem:[%s2191_s1 + $0x2c4] sm:$0xf]  ;;  %v1430_v21 = vld [vmem:[%s2191_s1 + $0x234] sm:$0xf]  ;;  %v1131_v23 = vor.u32 %v1400_v15, %v1128_v16 }
  0x3c   :  { %750 = vmatpush.bf16.msrb.mxu0 %v1231_v20  ;;  %v1203_v14 = vor.u32 %v1418_v7, %v1200_v8  ;;  %v1320_v20 = vld [vmem:[%s2191_s1 + $0x2c8] sm:$0xf0]  ;;  %v1248_v22 = vld [vmem:[%s2191_s1 + $0x238] sm:$0xf0]  ;;  %v958_v28 = vld [vmem:[%s2192_s0 + $0x40] sm:$0xf] }
  0x3d   :  { %769 = vmatpush.bf16.msrb.mxu1 %v1295_v13  ;;  %v1139_v13 = vor.u32 %v1402_v3, %v1136_v4  ;;  %v1120_v26 = vld [vmem:[%s2191_s1 + $0x138] sm:$0xf0]  ;;  %v1323_v27 = vor.u32 %v1448_v19, %v1320_v20  ;;  %v1414_v30 = vld [vmem:[%s2191_s1 + $0x1b4] sm:$0xf]  ;;  %v1428_v34 = vld [vmem:[%s2191_s1 + $0x224] sm:$0xf] }
  0x3e   :  { %788 = vmatpush.bf16.msrb.mxu2 %v979_v9  ;;  %v1450_v9 = vld [vmem:[%s2191_s1 + $0x2d4] sm:$0xf]  ;;  %v1312_v33 = vld [vmem:[%s2191_s1 + $0x2b8] sm:$0xf0]  ;;  %v1359_v36 = vld [vmem:[%s2192_s0 + $0x54] sm:$0xf0] }
  0x3f   :  { %807 = vmatpush.bf16.msrb.mxu3 %v1043_v24  ;;  %v1331_v17 = vor.u32 %v1450_v9, %v1328_v10  ;;  %v1446_v32 = vld [vmem:[%s2191_s1 + $0x2b4] sm:$0xf]  ;;  %v1356_v37 = vld [vmem:[%s2192_s0 + $0x44] sm:$0xf]  ;;  %v960_v38 = vld [vmem:[%s2192_s0 + $0x58] sm:$0xf0] }
  0x40   :  { %751 = vmatpush.bf16.msrb.mxu0 %v1223_v39  ;;  %v1396_v41 = vld [vmem:[%s2191_s1 + $0x124] sm:$0xf]  ;;  %v1112_v42 = vld [vmem:[%s2191_s1 + $0x128] sm:$0xf0]  ;;  %v963_v55 = vor.u32 %v1356_v37, %v960_v38  ;;  %v1426_v59 = vld [vmem:[%s2191_s1 + $0x214] sm:$0xf] }
  0x41   :  { %770 = vmatpush.bf16.msrb.mxu1 %v1287_v29  ;;  %v1251_v29 = vor.u32 %v1430_v21, %v1248_v22  ;;  %v1412_v46 = vld [vmem:[%s2191_s1 + $0x1a4] sm:$0xf]  ;;  %v1176_v47 = vld [vmem:[%s2191_s1 + $0x1a8] sm:$0xf0]  ;;  %v1232_v62 = vld [vmem:[%s2191_s1 + $0x218] sm:$0xf0]  ;;  %v1115_v63 = vor.u32 %v1396_v41, %v1112_v42 }
  0x42   :  { %789 = vmatpush.bf16.msrb.mxu2 %v971_v25  ;;  %v1398_v25 = vld [vmem:[%s2191_s1 + $0x134] sm:$0xf]  ;;  %v1304_v58 = vld [vmem:[%s2191_s1 + $0x2a8] sm:$0xf0]  ;;  %v1179_v0 = vor.u32 %v1412_v46, %v1176_v47  ;;  %v1235_v4 = vor.u32 %v1426_v59, %v1232_v62  ;;  %v1296_v8 = vld [vmem:[%s2191_s1 + $0x298] sm:$0xf0] }
  0x43   :  { %808 = vmatpush.bf16.msrb.mxu3 %v1035_v43  ;;  %752 = vmatmul.bf16.vlgmr.msrb.gmra.mxu0 %v1989_v60  ;;  %v1123_v39 = vor.u32 %v1398_v25, %v1120_v26  ;;  %v1315_v43 = vor.u32 %v1446_v32, %v1312_v33  ;;  %v1442_v7 = vld [vmem:[%s2191_s1 + $0x294] sm:$0xf]  ;;  %v1424_v9 = vld [vmem:[%s2191_s1 + $0x204] sm:$0xf]  ;;  %v1224_v10 = vld [vmem:[%s2191_s1 + $0x208] sm:$0xf0] }
  0x44   :  { %820 = vmatpush.bf16.msra.mxu0 %v1155_v45  ;;  %771 = vmatmul.bf16.vlgmr.msrb.gmra.mxu1 %v1991_v61  ;;  %v1227_v15 = vor.u32 %v1424_v9, %v1224_v10  ;;  %v1096_v16 = vld [vmem:[%s2191_s1 + $0x108] sm:$0xf0] }
  0x45   :  { %839 = vmatpush.bf16.msra.mxu1 %v1219_v35  ;;  %790 = vmatmul.bf16.vlgmr.msrb.gmra.mxu2 %v1713_v48  ;;  %v1416_v48 = vld [vmem:[%s2191_s1 + $0x1c4] sm:$0xf]  ;;  %v1240_v35 = vld [vmem:[%s2191_s1 + $0x228] sm:$0xf0] }
  0x46   :  { %858 = vmatpush.bf16.msra.mxu2 %v1283_v31  ;;  %809 = vmatmul.bf16.vlgmr.msrb.gmra.mxu3 %v1724_v53  ;;  %v1192_v53 = vld [vmem:[%s2191_s1 + $0x1c8] sm:$0xf0]  ;;  %v1184_v31 = vld [vmem:[%s2191_s1 + $0x1b8] sm:$0xf0]  ;;  %v1243_v45 = vor.u32 %v1428_v34, %v1240_v35 }
  0x47   :  { %877 = vmatpush.bf16.msra.mxu3 %v1347_v49  ;;  %v1195_v24 = vor.u32 %v1416_v48, %v1192_v53  ;;  %v1187_v40 = vor.u32 %v1414_v30, %v1184_v31  ;;  %v1444_v49 = vld [vmem:[%s2191_s1 + $0x2a4] sm:$0xf] }
  0x48   :  { %821 = vmatpush.bf16.msra.mxu0 %v1147_v1  ;;  %v1394_v1 = vld [vmem:[%s2191_s1 + $0x114] sm:$0xf]  ;;  %v1307_v3 = vor.u32 %v1444_v49, %v1304_v58 }
  0x49   :  { %840 = vmatpush.bf16.msra.mxu1 %v1211_v2  ;;  %v1104_v2 = vld [vmem:[%s2191_s1 + $0x118] sm:$0xf0] }
  0x4a   :  { %859 = vmatpush.bf16.msra.mxu2 %v1275_v52  ;;  %v959_v52 = vor.u32 %v1359_v36, %v958_v28  ;;  %v1107_v11 = vor.u32 %v1394_v1, %v1104_v2 }
  0x4b   :  { %878 = vmatpush.bf16.msra.mxu3 %v1339_v5  ;;  %v1410_v5 = vld [vmem:[%s2191_s1 + $0x194] sm:$0xf] }
  0x4c   :  { %822 = vmatpush.bf16.msra.mxu0 %v1139_v13  ;;  %v1392_v13 = vld [vmem:[%s2191_s1 + $0x104] sm:$0xf] }
  0x4d   :  { %841 = vmatpush.bf16.msra.mxu1 %v1203_v14  ;;  %v1299_v14 = vor.u32 %v1442_v7, %v1296_v8  ;;  %v1099_v48 = vor.u32 %v1392_v13, %v1096_v16 }
  0x4e   :  { %860 = vmatpush.bf16.msra.mxu2 %v1267_v6  ;;  %v1168_v6 = vld [vmem:[%s2191_s1 + $0x198] sm:$0xf0] }
  0x4f   :  { %879 = vmatpush.bf16.msra.mxu3 %v1331_v17  ;;  %v1171_v12 = vor.u32 %v1410_v5, %v1168_v6  ;;  %v1440_v17 = vld [vmem:[%s2191_s1 + $0x284] sm:$0xf] }
  0x50   :  { %823 = vmatpush.bf16.msra.mxu0 %v1131_v23 }
  0x51   :  { %842 = vmatpush.bf16.msra.mxu1 %v1195_v24 }
  0x52   :  { %861 = vmatpush.bf16.msra.mxu2 %v1259_v18  ;;  %v1288_v18 = vld [vmem:[%s2191_s1 + $0x288] sm:$0xf0] }
  0x53   :  { %880 = vmatpush.bf16.msra.mxu3 %v1323_v27  ;;  %757 = vmatmul.bf16.gmra.mxu0 %v959_v52  ;;  %v1291_v19 = vor.u32 %v1440_v17, %v1288_v18 }
  0x54   :  { %824 = vmatpush.bf16.msra.mxu0 %v1123_v39  ;;  %776 = vmatmul.bf16.gmra.mxu1 %v963_v55 }
  0x55   :  { %843 = vmatpush.bf16.msra.mxu1 %v1187_v40  ;;  %795 = vmatmul.bf16.gmra.mxu2 %v1845_v44  ;;  %v1408_v44 = vld [vmem:[%s2191_s1 + $0x184] sm:$0xf] }
  0x56   :  { %862 = vmatpush.bf16.msra.mxu2 %v1251_v29  ;;  %814 = vmatmul.bf16.gmra.mxu3 %v1856_v50  ;;  %v1160_v50 = vld [vmem:[%s2191_s1 + $0x188] sm:$0xf0] }
  0x57   :  { %881 = vmatpush.bf16.msra.mxu3 %v1315_v43  ;;  %v1163_v53 = vor.u32 %v1408_v44, %v1160_v50 }
  0x58   :  { %825 = vmatpush.bf16.msra.mxu0 %v1115_v63 }
  0x59   :  { %844 = vmatpush.bf16.msra.mxu1 %v1179_v0 }
  0x5a   :  { %863 = vmatpush.bf16.msra.mxu2 %v1243_v45 }
  0x5b   :  { %882 = vmatpush.bf16.msra.mxu3 %v1307_v3 }
  0x5c   :  { %826 = vmatpush.bf16.msra.mxu0 %v1107_v11 }
  0x5d   :  { %845 = vmatpush.bf16.msra.mxu1 %v1171_v12 }
  0x5e   :  { %864 = vmatpush.bf16.msra.mxu2 %v1235_v4 }
  0x5f   :  { %883 = vmatpush.bf16.msra.mxu3 %v1299_v14 }
  0x60   :  { %827 = vmatpush.bf16.msra.mxu0 %v1099_v48 }
  0x61   :  { %846 = vmatpush.bf16.msra.mxu1 %v1163_v53 }
  0x62   :  { %865 = vmatpush.bf16.msra.mxu2 %v1227_v15 }
  0x63   :  { %884 = vmatpush.bf16.msra.mxu3 %v1291_v19  ;;  %828 = vmatmul.bf16.vlgmr.msra.gmra.mxu0 %v1726_v54  ;;  %v122_v54 = vld [vmem:[%s2193_s2] sm:$0x3] }
  0x64   :  { %847 = vmatmul.bf16.vlgmr.msra.gmra.mxu1 %v1734_v57  ;;  %v125_v15 = vperm.slane %v122_v54, 1 }
  0x65   :  { %866 = vmatmul.bf16.vlgmr.msra.gmra.mxu2 %v1989_v60  ;;  %v124_v60 = vperm.slane %v122_v54, 0 }
  0x66   :  { %885 = vmatmul.bf16.vlgmr.msra.gmra.mxu3 %v1991_v61 }
  0x73   :  { %833 = vmatmul.bf16.gmra.mxu0 %v1858_v51 }
  0x74   :  { %852 = vmatmul.bf16.gmra.mxu1 %v1866_v56 }
  0x75   :  { %871 = vmatmul.bf16.gmra.mxu2 %v959_v52 }
  0x76   :  { %890 = vmatmul.bf16.gmra.mxu3 %v963_v55 }
  0xa0   :  { %v677_v20 = vpop.f32.mrf.mxu0 }
  0xa1   :  { %v696_v21 = vpop.f32.mrf.mxu1  ;;  %v678_v51 = vadd.f32 %v677_v20, %v124_v60 }
  0xa3   :  { %v697_v56 = vadd.f32 %v696_v21, %v678_v51 }
  0xa8   :  { %v715_v22 = vpop.f32.mrf.mxu2  ;;  %v679_v24 = vpop.f32.mrf.mxu0 }
  0xa9   :  { %v734_v23 = vpop.f32.mrf.mxu3  ;;  %v698_v25 = vpop.f32.mrf.mxu1  ;;  %v716_v32 = vadd.f32 %v715_v22, %v697_v56  ;;  %v680_v33 = vadd.f32 %v679_v24, %v124_v60 }
  0xab   :  { %v735_v35 = vadd.f32 %v734_v23, %v716_v32  ;;  %v699_v39 = vadd.f32 %v698_v25, %v680_v33 }
  0xb0   :  { %v717_v57 = vpop.f32.mrf.mxu2  ;;  %v682_v61 = vpop.f32.mrf.mxu0 }
  0xb1   :  { %v736_v26 = vpop.f32.mrf.mxu3  ;;  %v701_v27 = vpop.f32.mrf.mxu1  ;;  %v718_v41 = vadd.f32 %v717_v57, %v699_v39  ;;  %v683_v42 = vadd.f32 %v682_v61, %v124_v60 }
  0xb3   :  { %v737_v46 = vadd.f32 %v736_v26, %v718_v41  ;;  %v702_v47 = vadd.f32 %v701_v27, %v683_v42 }
  0xb8   :  { %v720_v28 = vpop.f32.mrf.mxu2  ;;  %v684_v30 = vpop.f32.mrf.mxu0 }
  0xb9   :  { %v739_v29 = vpop.f32.mrf.mxu3  ;;  %v703_v31 = vpop.f32.mrf.mxu1  ;;  %v721_v62 = vadd.f32 %v720_v28, %v702_v47  ;;  %v685_v0 = vadd.f32 %v684_v30, %v124_v60 }
  0xbb   :  { %v740_v2 = vadd.f32 %v739_v29, %v721_v62  ;;  %v704_v7 = vadd.f32 %v703_v31, %v685_v0 }
  0xc0   :  { %v722_v34 = vpop.f32.mrf.mxu2  ;;  %v753_v37 = vpop.f32.mrf.mxu0 }
  0xc1   :  { %v741_v36 = vpop.f32.mrf.mxu3  ;;  %v772_v38 = vpop.f32.mrf.mxu1  ;;  %v754_v40 = vadd.f32 %v753_v37, %v735_v35  ;;  %v723_v9 = vadd.f32 %v722_v34, %v704_v7 }
  0xc3   :  { %v773_v43 = vadd.f32 %v772_v38, %v754_v40  ;;  %v742_v12 = vadd.f32 %v741_v36, %v723_v9 }
  0xc5   :  { %v896_v45 = vmax.f32 %v773_v43, 0.0 }
  0xc7   :  { %904 = vst [vmem:[%s2194_s3] sm:$0xff] %v896_v45 }
  0xc8   :  { %v791_v49 = vpop.f32.mrf.mxu2  ;;  %v755_v55 = vpop.f32.mrf.mxu0 }
  0xc9   :  { %v810_v52 = vpop.f32.mrf.mxu3  ;;  %v774_v58 = vpop.f32.mrf.mxu1  ;;  %v756_v59 = vadd.f32 %v755_v55, %v737_v46  ;;  %v792_v18 = vadd.f32 %v791_v49, %v125_v15 }
  0xcb   :  { %v775_v63 = vadd.f32 %v774_v58, %v756_v59  ;;  %v811_v20 = vadd.f32 %v810_v52, %v792_v18 }
  0xcd   :  { %v898_v1 = vmax.f32 %v775_v63, 0.0 }
  0xcf   :  { %906 = vst [vmem:[%s2194_s3 + $0x10] sm:$0xff] %v898_v1 }
  0xd0   :  { %v793_v3 = vpop.f32.mrf.mxu2  ;;  %v758_v5 = vpop.f32.mrf.mxu0 }
  0xd1   :  { %v812_v4 = vpop.f32.mrf.mxu3  ;;  %v777_v6 = vpop.f32.mrf.mxu1  ;;  %v759_v8 = vadd.f32 %v758_v5, %v740_v2  ;;  %v794_v24 = vadd.f32 %v793_v3, %v125_v15 }
  0xd3   :  { %v778_v10 = vadd.f32 %v777_v6, %v759_v8  ;;  %v813_v60 = vadd.f32 %v812_v4, %v794_v24 }
  0xd5   :  { %v900_v11 = vmax.f32 %v778_v10, 0.0 }
  0xd7   :  { %908 = vst [vmem:[%s2194_s3 + $0x20] sm:$0xff] %v900_v11 }
  0xd8   :  { %v796_v13 = vpop.f32.mrf.mxu2  ;;  %v760_v16 = vpop.f32.mrf.mxu0 }
  0xd9   :  { %v815_v14 = vpop.f32.mrf.mxu3  ;;  %v779_v44 = vpop.f32.mrf.mxu1  ;;  %v761_v50 = vadd.f32 %v760_v16, %v742_v12  ;;  %v797_v56 = vadd.f32 %v796_v13, %v125_v15 }
  0xdb   :  { %v780_v17 = vadd.f32 %v779_v44, %v761_v50  ;;  %v816_v33 = vadd.f32 %v815_v14, %v797_v56 }
  0xdd   :  { %v902_v48 = vmax.f32 %v780_v17, 0.0 }
  0xdf   :  { %910 = vst [vmem:[%s2194_s3 + $0x30] sm:$0xff] %v902_v48 }
  0xe0   :  { %v798_v53 = vpop.f32.mrf.mxu2  ;;  %v829_v21 = vpop.f32.mrf.mxu0 }
  0xe1   :  { %v817_v19 = vpop.f32.mrf.mxu3  ;;  %v848_v22 = vpop.f32.mrf.mxu1  ;;  %v830_v23 = vadd.f32 %v829_v21, %v811_v20  ;;  %v799_v39 = vadd.f32 %v798_v53, %v125_v15 }
  0xe3   :  { %v849_v25 = vadd.f32 %v848_v22, %v830_v23  ;;  %v818_v45 = vadd.f32 %v817_v19, %v799_v39 }
  0xe8   :  { %v867_v57 = vpop.f32.mrf.mxu2  ;;  %v831_v61 = vpop.f32.mrf.mxu0 }
  0xe9   :  { %v886_v54 = vpop.f32.mrf.mxu3  ;;  %v868_v26 = vadd.f32 %v867_v57, %v849_v25  ;;  %v850_v27 = vpop.f32.mrf.mxu1  ;;  %v832_v28 = vadd.f32 %v831_v61, %v813_v60 }
  0xeb   :  { %v887_v51 = vadd.f32 %v886_v54, %v868_v26  ;;  %v851_v30 = vadd.f32 %v850_v27, %v832_v28 }
  0xed   :  { %v897_v29 = vmax.f32 %v887_v51, 0.0 }
  0xef   :  { %905 = vst [vmem:[%s2194_s3 + $0x8] sm:$0xff] %v897_v29 }
  0xf0   :  { %v869_v31 = vpop.f32.mrf.mxu2  ;;  %v834_v35 = vpop.f32.mrf.mxu0 }
  0xf1   :  { %v888_v32 = vpop.f32.mrf.mxu3  ;;  %v870_v34 = vadd.f32 %v869_v31, %v851_v30  ;;  %v835_v37 = vadd.f32 %v834_v35, %v816_v33  ;;  %v853_v38 = vpop.f32.mrf.mxu1 }
  0xf3   :  { %v889_v36 = vadd.f32 %v888_v32, %v870_v34  ;;  %v854_v41 = vadd.f32 %v853_v38, %v835_v37 }
  0xf5   :  { %v899_v40 = vmax.f32 %v889_v36, 0.0 }
  0xf7   :  { %907 = vst [vmem:[%s2194_s3 + $0x18] sm:$0xff] %v899_v40 }
  0xf8   :  { %v872_v42 = vpop.f32.mrf.mxu2  ;;  %v836_v47 = vpop.f32.mrf.mxu0 }
  0xf9   :  { %v891_v43 = vpop.f32.mrf.mxu3  ;;  %v873_v46 = vadd.f32 %v872_v42, %v854_v41  ;;  %v837_v52 = vadd.f32 %v836_v47, %v818_v45  ;;  %v855_v58 = vpop.f32.mrf.mxu1 }
  0xfb   :  { %v892_v49 = vadd.f32 %v891_v43, %v873_v46  ;;  %v856_v59 = vadd.f32 %v855_v58, %v837_v52 }
  0xfd   :  { %v901_v55 = vmax.f32 %v892_v49, 0.0 }
  0xff   :  { %909 = vst [vmem:[%s2194_s3 + $0x28] sm:$0xff] %v901_v55 }
 0x100   :  { %v874_v62 = vpop.f32.mrf.mxu2 }
 0x101   :  { %v875_v63 = vadd.f32 %v874_v62, %v856_v59  ;;  %v893_v0 = vpop.f32.mrf.mxu3 }
 0x103   :  { %v894_v1 = vadd.f32 %v893_v0, %v875_v63 }
 0x105   :  { %v903_v2 = vmax.f32 %v894_v1, 0.0 }
 0x107   :  { %911 = vst [vmem:[%s2194_s3 + $0x38] sm:$0xff] %v903_v2 }

// kernel: cnn_forward.7
= control target key start
LH: loop header
LB: loop body
LE: loop exit
PB: predicated region body
PF: predicated region fallthrough
CT: control target
= control target key end

     0   :  { %s2916_s1 = inlined_call_operand.vmem [shape: bf16[2304,128], index: 1, kind: input, shape index: {}]   ;;  %s2917_s0 = inlined_call_operand.vmem [shape: bf16[16,2304], index: 0, kind: input, shape index: {}]   ;;  %s2918_s2 = inlined_call_operand.vmem [shape: f32[1,128], index: 2, kind: input, shape index: {}]   ;;  %s2919_s3 = inlined_call_operand.vmem [shape: f32[16,128], index: 3, kind: output, shape index: {}]  }
   0x1   :  { %v2209_v0 = vld [vmem:[%s2916_s1 + $0x38] sm:$0xff]  ;;  %v2208_v4 = vld [vmem:[%s2916_s1 + $0x30] sm:$0xff]  ;;  %v2207_v8 = vld [vmem:[%s2916_s1 + $0x28] sm:$0xff] }
   0x2   :  { %v2217_v1 = vld [vmem:[%s2916_s1 + $0x78] sm:$0xff]  ;;  %1278 = vmatpush.bf16.msra.mxu0 %v2209_v0  ;;  %v2216_v5 = vld [vmem:[%s2916_s1 + $0x70] sm:$0xff]  ;;  %v2215_v9 = vld [vmem:[%s2916_s1 + $0x68] sm:$0xff] }
   0x3   :  { %v2225_v2 = vld [vmem:[%s2916_s1 + $0xb8] sm:$0xff]  ;;  %1292 = vmatpush.bf16.msra.mxu1 %v2217_v1  ;;  %v2224_v6 = vld [vmem:[%s2916_s1 + $0xb0] sm:$0xff]  ;;  %v2223_v10 = vld [vmem:[%s2916_s1 + $0xa8] sm:$0xff] }
   0x4   :  { %v2233_v3 = vld [vmem:[%s2916_s1 + $0xf8] sm:$0xff]  ;;  %1306 = vmatpush.bf16.msra.mxu2 %v2225_v2  ;;  %v2232_v7 = vld [vmem:[%s2916_s1 + $0xf0] sm:$0xff]  ;;  %v2231_v11 = vld [vmem:[%s2916_s1 + $0xe8] sm:$0xff] }
   0x5   :  { %1320 = vmatpush.bf16.msra.mxu3 %v2233_v3  ;;  %v2206_v12 = vld [vmem:[%s2916_s1 + $0x20] sm:$0xff]  ;;  %v2205_v16 = vld [vmem:[%s2916_s1 + $0x18] sm:$0xff]  ;;  %v2204_v20 = vld [vmem:[%s2916_s1 + $0x10] sm:$0xff] }
   0x6   :  { %1279 = vmatpush.bf16.msra.mxu0 %v2208_v4  ;;  %v2214_v13 = vld [vmem:[%s2916_s1 + $0x60] sm:$0xff]  ;;  %v2213_v17 = vld [vmem:[%s2916_s1 + $0x58] sm:$0xff]  ;;  %v2212_v21 = vld [vmem:[%s2916_s1 + $0x50] sm:$0xff] }
   0x7   :  { %1293 = vmatpush.bf16.msra.mxu1 %v2216_v5  ;;  %v2222_v14 = vld [vmem:[%s2916_s1 + $0xa0] sm:$0xff]  ;;  %v2221_v18 = vld [vmem:[%s2916_s1 + $0x98] sm:$0xff]  ;;  %v2220_v22 = vld [vmem:[%s2916_s1 + $0x90] sm:$0xff] }
   0x8   :  { %1307 = vmatpush.bf16.msra.mxu2 %v2224_v6  ;;  %v2230_v15 = vld [vmem:[%s2916_s1 + $0xe0] sm:$0xff]  ;;  %v2229_v19 = vld [vmem:[%s2916_s1 + $0xd8] sm:$0xff]  ;;  %v2228_v23 = vld [vmem:[%s2916_s1 + $0xd0] sm:$0xff] }
   0x9   :  { %1321 = vmatpush.bf16.msra.mxu3 %v2232_v7  ;;  %v2203_v24 = vld [vmem:[%s2916_s1 + $0x8] sm:$0xff]  ;;  %v2202_v28 = vld [vmem:[%s2916_s1] sm:$0xff]  ;;  %v2241_v31 = vld [vmem:[%s2916_s1 + $0x138] sm:$0xff] }
   0xa   :  { %1280 = vmatpush.bf16.msra.mxu0 %v2207_v8  ;;  %v2211_v25 = vld [vmem:[%s2916_s1 + $0x48] sm:$0xff]  ;;  %v2210_v29 = vld [vmem:[%s2916_s1 + $0x40] sm:$0xff]  ;;  %v2249_v32 = vld [vmem:[%s2916_s1 + $0x178] sm:$0xff] }
   0xb   :  { %1294 = vmatpush.bf16.msra.mxu1 %v2215_v9  ;;  %v2219_v26 = vld [vmem:[%s2916_s1 + $0x88] sm:$0xff]  ;;  %v2218_v30 = vld [vmem:[%s2916_s1 + $0x80] sm:$0xff]  ;;  %v2257_v35 = vld [vmem:[%s2916_s1 + $0x1b8] sm:$0xff] }
   0xc   :  { %1308 = vmatpush.bf16.msra.mxu2 %v2223_v10  ;;  %v2227_v27 = vld [vmem:[%s2916_s1 + $0xc8] sm:$0xff]  ;;  %v1538_v33 = vld [vmem:[%s2917_s0] sm:$0xf]  ;;  %v2194_v37 = vld [vmem:[%s2917_s0 + $0x4c] sm:$0xf0] }
   0xd   :  { %1322 = vmatpush.bf16.msra.mxu3 %v2231_v11  ;;  %v2193_v34 = vld [vmem:[%s2917_s0 + $0x44] sm:$0xf0]  ;;  %v2184_v38 = vld [vmem:[%s2917_s0 + $0x4] sm:$0xf]  ;;  %v1540_v39 = vld [vmem:[%s2917_s0 + $0x48] sm:$0xf0] }
   0xe   :  { %1281 = vmatpush.bf16.msra.mxu0 %v2206_v12  ;;  %v1546_v36 = vld [vmem:[%s2917_s0 + $0x8] sm:$0xf]  ;;  %v2226_v40 = vld [vmem:[%s2916_s1 + $0xc0] sm:$0xff]  ;;  %v1539_v41 = vor.u32 %v2193_v34, %v1538_v33  ;;  %v2265_v42 = vld [vmem:[%s2916_s1 + $0x1f8] sm:$0xff]  ;;  %v1543_v47 = vor.u32 %v2184_v38, %v1540_v39 }
   0xf   :  { %1295 = vmatpush.bf16.msra.mxu1 %v2214_v13  ;;  %v1547_v43 = vor.u32 %v2194_v37, %v1546_v36  ;;  %v2185_v44 = vld [vmem:[%s2917_s0 + $0xc] sm:$0xf]  ;;  %v1548_v45 = vld [vmem:[%s2917_s0 + $0x50] sm:$0xf0]  ;;  %v2238_v56 = vld [vmem:[%s2916_s1 + $0x120] sm:$0xff] }
  0x10   :  { %1309 = vmatpush.bf16.msra.mxu2 %v2222_v14  ;;  %v2240_v46 = vld [vmem:[%s2916_s1 + $0x130] sm:$0xff]  ;;  %v1551_v50 = vor.u32 %v2185_v44, %v1548_v45  ;;  %v2239_v52 = vld [vmem:[%s2916_s1 + $0x128] sm:$0xff]  ;;  %v2246_v57 = vld [vmem:[%s2916_s1 + $0x160] sm:$0xff] }
  0x11   :  { %1323 = vmatpush.bf16.msra.mxu3 %v2230_v15  ;;  %v2248_v48 = vld [vmem:[%s2916_s1 + $0x170] sm:$0xff]  ;;  %v2247_v53 = vld [vmem:[%s2916_s1 + $0x168] sm:$0xff]  ;;  %v2254_v58 = vld [vmem:[%s2916_s1 + $0x1a0] sm:$0xff] }
  0x12   :  { %1282 = vmatpush.bf16.msra.mxu0 %v2205_v16  ;;  %v2256_v49 = vld [vmem:[%s2916_s1 + $0x1b0] sm:$0xff]  ;;  %v2255_v54 = vld [vmem:[%s2916_s1 + $0x1a8] sm:$0xff]  ;;  %v2262_v59 = vld [vmem:[%s2916_s1 + $0x1e0] sm:$0xff] }
  0x13   :  { %1296 = vmatpush.bf16.msra.mxu1 %v2213_v17  ;;  %v2264_v51 = vld [vmem:[%s2916_s1 + $0x1f0] sm:$0xff]  ;;  %v2263_v55 = vld [vmem:[%s2916_s1 + $0x1e8] sm:$0xff]  ;;  %v2237_v60 = vld [vmem:[%s2916_s1 + $0x118] sm:$0xff] }
  0x14   :  { %1310 = vmatpush.bf16.msra.mxu2 %v2221_v18  ;;  %v2245_v61 = vld [vmem:[%s2916_s1 + $0x158] sm:$0xff]  ;;  %v2236_v0 = vld [vmem:[%s2916_s1 + $0x110] sm:$0xff]  ;;  %v2235_v4 = vld [vmem:[%s2916_s1 + $0x108] sm:$0xff] }
  0x15   :  { %1324 = vmatpush.bf16.msra.mxu3 %v2229_v19  ;;  %v2253_v62 = vld [vmem:[%s2916_s1 + $0x198] sm:$0xff]  ;;  %v2244_v1 = vld [vmem:[%s2916_s1 + $0x150] sm:$0xff]  ;;  %v2243_v5 = vld [vmem:[%s2916_s1 + $0x148] sm:$0xff] }
  0x16   :  { %1283 = vmatpush.bf16.msra.mxu0 %v2204_v20  ;;  %v2261_v63 = vld [vmem:[%s2916_s1 + $0x1d8] sm:$0xff]  ;;  %v2252_v2 = vld [vmem:[%s2916_s1 + $0x190] sm:$0xff]  ;;  %v2251_v6 = vld [vmem:[%s2916_s1 + $0x188] sm:$0xff] }
  0x17   :  { %1297 = vmatpush.bf16.msra.mxu1 %v2212_v21  ;;  %v2260_v3 = vld [vmem:[%s2916_s1 + $0x1d0] sm:$0xff]  ;;  %v2259_v7 = vld [vmem:[%s2916_s1 + $0x1c8] sm:$0xff]  ;;  %v2234_v8 = vld [vmem:[%s2916_s1 + $0x100] sm:$0xff] }
  0x18   :  { %1311 = vmatpush.bf16.msra.mxu2 %v2220_v22  ;;  %v2242_v9 = vld [vmem:[%s2916_s1 + $0x140] sm:$0xff]  ;;  %v2273_v11 = vld [vmem:[%s2916_s1 + $0x238] sm:$0xff]  ;;  %v1554_v13 = vld [vmem:[%s2917_s0 + $0x10] sm:$0xf] }
  0x19   :  { %1325 = vmatpush.bf16.msra.mxu3 %v2228_v23  ;;  %v2250_v10 = vld [vmem:[%s2916_s1 + $0x180] sm:$0xff]  ;;  %v2281_v12 = vld [vmem:[%s2916_s1 + $0x278] sm:$0xff]  ;;  %v2186_v18 = vld [vmem:[%s2917_s0 + $0x14] sm:$0xf] }
  0x1a   :  { %1284 = vmatpush.bf16.msra.mxu0 %v2203_v24  ;;  %v2195_v14 = vld [vmem:[%s2917_s0 + $0x54] sm:$0xf0]  ;;  %v2196_v16 = vld [vmem:[%s2917_s0 + $0x5c] sm:$0xf0]  ;;  %v1556_v19 = vld [vmem:[%s2917_s0 + $0x58] sm:$0xf0] }
  0x1b   :  { %1298 = vmatpush.bf16.msra.mxu1 %v2211_v25  ;;  %v1562_v15 = vld [vmem:[%s2917_s0 + $0x18] sm:$0xf]  ;;  %v2258_v20 = vld [vmem:[%s2916_s1 + $0x1c0] sm:$0xff]  ;;  %v2187_v21 = vld [vmem:[%s2917_s0 + $0x1c] sm:$0xf]  ;;  %v1555_v23 = vor.u32 %v2195_v14, %v1554_v13 }
  0x1c   :  { %1312 = vmatpush.bf16.msra.mxu2 %v2219_v26  ;;  %v2289_v17 = vld [vmem:[%s2916_s1 + $0x2b8] sm:$0xff]  ;;  %v1564_v22 = vld [vmem:[%s2917_s0 + $0x60] sm:$0xf0]  ;;  %v1563_v24 = vor.u32 %v2196_v16, %v1562_v15  ;;  %v1559_v26 = vor.u32 %v2186_v18, %v1556_v19  ;;  %v2279_v33 = vld [vmem:[%s2916_s1 + $0x268] sm:$0xff] }
  0x1d   :  { %1326 = vmatpush.bf16.msra.mxu3 %v2227_v27  ;;  %v2297_v25 = vld [vmem:[%s2916_s1 + $0x2f8] sm:$0xff]  ;;  %v1567_v27 = vor.u32 %v2187_v21, %v1564_v22  ;;  %v2287_v34 = vld [vmem:[%s2916_s1 + $0x2a8] sm:$0xff]  ;;  %v2270_v36 = vld [vmem:[%s2916_s1 + $0x220] sm:$0xff] }
  0x1e   :  { %1285 = vmatpush.bf16.msra.mxu0 %v2202_v28  ;;  %v2272_v28 = vld [vmem:[%s2916_s1 + $0x230] sm:$0xff]  ;;  %v2278_v37 = vld [vmem:[%s2916_s1 + $0x260] sm:$0xff]  ;;  %v2311_v13 = vld [vmem:[%s2916_s1 + $0x368] sm:$0xff] }
  0x1f   :  { %1299 = vmatpush.bf16.msra.mxu1 %v2210_v29  ;;  %v2280_v29 = vld [vmem:[%s2916_s1 + $0x270] sm:$0xff]  ;;  %v2286_v38 = vld [vmem:[%s2916_s1 + $0x2a0] sm:$0xff]  ;;  %v2319_v14 = vld [vmem:[%s2916_s1 + $0x3a8] sm:$0xff] }
  0x20   :  { %1313 = vmatpush.bf16.msra.mxu2 %v2218_v30  ;;  %v2288_v30 = vld [vmem:[%s2916_s1 + $0x2b0] sm:$0xff]  ;;  %v2294_v39 = vld [vmem:[%s2916_s1 + $0x2e0] sm:$0xff]  ;;  %v2327_v15 = vld [vmem:[%s2916_s1 + $0x3e8] sm:$0xff] }
  0x21   :  { %1327 = vmatpush.bf16.msra.mxu3 %v2226_v40  ;;  %1286 = vmatmul.bf16.vlgmr.msra.gmra.mxu0 %v1539_v41  ;;  %v2269_v40 = vld [vmem:[%s2916_s1 + $0x218] sm:$0xff]  ;;  %v2268_v44 = vld [vmem:[%s2916_s1 + $0x210] sm:$0xff]  ;;  %v2302_v16 = vld [vmem:[%s2916_s1 + $0x320] sm:$0xff] }
  0x22   :  { %1334 = vmatpush.bf16.msrb.mxu0 %v2241_v31  ;;  %1300 = vmatmul.bf16.vlgmr.msra.gmra.mxu1 %v1543_v47  ;;  %v2296_v31 = vld [vmem:[%s2916_s1 + $0x2f0] sm:$0xff]  ;;  %v2277_v41 = vld [vmem:[%s2916_s1 + $0x258] sm:$0xff]  ;;  %v2318_v18 = vld [vmem:[%s2916_s1 + $0x3a0] sm:$0xff] }
  0x23   :  { %1348 = vmatpush.bf16.msrb.mxu1 %v2249_v32  ;;  %1314 = vmatmul.bf16.vlgmr.msra.gmra.mxu2 %v1547_v43  ;;  %v2271_v32 = vld [vmem:[%s2916_s1 + $0x228] sm:$0xff]  ;;  %v2293_v43 = vld [vmem:[%s2916_s1 + $0x2d8] sm:$0xff]  ;;  %v2276_v45 = vld [vmem:[%s2916_s1 + $0x250] sm:$0xff] }
  0x24   :  { %1362 = vmatpush.bf16.msrb.mxu2 %v2257_v35  ;;  %1328 = vmatmul.bf16.vlgmr.msra.gmra.mxu3 %v1551_v50  ;;  %v2295_v35 = vld [vmem:[%s2916_s1 + $0x2e8] sm:$0xff]  ;;  %v2292_v47 = vld [vmem:[%s2916_s1 + $0x2d0] sm:$0xff]  ;;  %v2326_v19 = vld [vmem:[%s2916_s1 + $0x3e0] sm:$0xff] }
  0x25   :  { %1376 = vmatpush.bf16.msrb.mxu3 %v2265_v42  ;;  %v2285_v42 = vld [vmem:[%s2916_s1 + $0x298] sm:$0xff]  ;;  %v2283_v50 = vld [vmem:[%s2916_s1 + $0x288] sm:$0xff] }
  0x26   :  { %1335 = vmatpush.bf16.msrb.mxu0 %v2240_v46  ;;  %v2284_v46 = vld [vmem:[%s2916_s1 + $0x290] sm:$0xff]  ;;  %v2309_v21 = vld [vmem:[%s2916_s1 + $0x358] sm:$0xff] }
  0x27   :  { %1349 = vmatpush.bf16.msrb.mxu1 %v2248_v48  ;;  %v2267_v48 = vld [vmem:[%s2916_s1 + $0x208] sm:$0xff]  ;;  %v2317_v22 = vld [vmem:[%s2916_s1 + $0x398] sm:$0xff] }
  0x28   :  { %1363 = vmatpush.bf16.msrb.mxu2 %v2256_v49  ;;  %v2275_v49 = vld [vmem:[%s2916_s1 + $0x248] sm:$0xff] }
  0x29   :  { %1377 = vmatpush.bf16.msrb.mxu3 %v2264_v51  ;;  %v2291_v51 = vld [vmem:[%s2916_s1 + $0x2c8] sm:$0xff] }
  0x2a   :  { %1336 = vmatpush.bf16.msrb.mxu0 %v2239_v52  ;;  %v2266_v52 = vld [vmem:[%s2916_s1 + $0x200] sm:$0xff] }
  0x2b   :  { %1350 = vmatpush.bf16.msrb.mxu1 %v2247_v53  ;;  %v2274_v53 = vld [vmem:[%s2916_s1 + $0x240] sm:$0xff] }
  0x2c   :  { %1364 = vmatpush.bf16.msrb.mxu2 %v2255_v54  ;;  %v2282_v54 = vld [vmem:[%s2916_s1 + $0x280] sm:$0xff] }
  0x2d   :  { %1378 = vmatpush.bf16.msrb.mxu3 %v2263_v55  ;;  %v2305_v55 = vld [vmem:[%s2916_s1 + $0x338] sm:$0xff] }
  0x2e   :  { %1337 = vmatpush.bf16.msrb.mxu0 %v2238_v56  ;;  %v2313_v56 = vld [vmem:[%s2916_s1 + $0x378] sm:$0xff] }
  0x2f   :  { %1351 = vmatpush.bf16.msrb.mxu1 %v2246_v57  ;;  %v1570_v57 = vld [vmem:[%s2917_s0 + $0x20] sm:$0xf] }
  0x30   :  { %1365 = vmatpush.bf16.msrb.mxu2 %v2254_v58  ;;  %v2197_v58 = vld [vmem:[%s2917_s0 + $0x64] sm:$0xf0] }
  0x31   :  { %1379 = vmatpush.bf16.msrb.mxu3 %v2262_v59  ;;  %v1578_v59 = vld [vmem:[%s2917_s0 + $0x28] sm:$0xf] }
  0x32   :  { %1338 = vmatpush.bf16.msrb.mxu0 %v2237_v60  ;;  %v2198_v60 = vld [vmem:[%s2917_s0 + $0x6c] sm:$0xf0] }
  0x33   :  { %1352 = vmatpush.bf16.msrb.mxu1 %v2245_v61  ;;  %v2321_v61 = vld [vmem:[%s2916_s1 + $0x3b8] sm:$0xff] }
  0x34   :  { %1366 = vmatpush.bf16.msrb.mxu2 %v2253_v62  ;;  %v2188_v62 = vld [vmem:[%s2917_s0 + $0x24] sm:$0xf] }
  0x35   :  { %1380 = vmatpush.bf16.msrb.mxu3 %v2261_v63  ;;  %v1572_v63 = vld [vmem:[%s2917_s0 + $0x68] sm:$0xf0] }
  0x36   :  { %1339 = vmatpush.bf16.msrb.mxu0 %v2236_v0  ;;  %v2290_v0 = vld [vmem:[%s2916_s1 + $0x2c0] sm:$0xff] }
  0x37   :  { %1353 = vmatpush.bf16.msrb.mxu1 %v2244_v1  ;;  %v2189_v1 = vld [vmem:[%s2917_s0 + $0x2c] sm:$0xf] }
  0x38   :  { %1367 = vmatpush.bf16.msrb.mxu2 %v2252_v2  ;;  %v1580_v2 = vld [vmem:[%s2917_s0 + $0x70] sm:$0xf0] }
  0x39   :  { %1381 = vmatpush.bf16.msrb.mxu3 %v2260_v3  ;;  %v1571_v3 = vor.u32 %v2197_v58, %v1570_v57  ;;  %v2341_v57 = vld [vmem:[%s2916_s1 + $0x458] sm:$0xff]  ;;  %v2332_v58 = vld [vmem:[%s2916_s1 + $0x410] sm:$0xff] }
  0x3a   :  { %1340 = vmatpush.bf16.msrb.mxu0 %v2235_v4  ;;  %v1579_v4 = vor.u32 %v2198_v60, %v1578_v59  ;;  %v2340_v59 = vld [vmem:[%s2916_s1 + $0x450] sm:$0xff]  ;;  %v2331_v60 = vld [vmem:[%s2916_s1 + $0x408] sm:$0xff] }
  0x3b   :  { %1354 = vmatpush.bf16.msrb.mxu1 %v2243_v5  ;;  %v2329_v5 = vld [vmem:[%s2916_s1 + $0x3f8] sm:$0xff] }
  0x3c   :  { %1368 = vmatpush.bf16.msrb.mxu2 %v2251_v6  ;;  %v1575_v6 = vor.u32 %v2188_v62, %v1572_v63  ;;  %v2330_v62 = vld [vmem:[%s2916_s1 + $0x400] sm:$0xff] }
  0x3d   :  { %1382 = vmatpush.bf16.msrb.mxu3 %v2259_v7  ;;  %v1583_v7 = vor.u32 %v2189_v1, %v1580_v2  ;;  %v1602_v63 = vld [vmem:[%s2917_s0 + $0x40] sm:$0xf]  ;;  %v2192_v2 = vld [vmem:[%s2917_s0 + $0x44] sm:$0xf] }
  0x3e   :  { %1341 = vmatpush.bf16.msrb.mxu0 %v2234_v8  ;;  %v2304_v8 = vld [vmem:[%s2916_s1 + $0x330] sm:$0xff]  ;;  %v2338_v1 = vld [vmem:[%s2916_s1 + $0x440] sm:$0xff] }
  0x3f   :  { %1355 = vmatpush.bf16.msrb.mxu1 %v2242_v9  ;;  %v2312_v9 = vld [vmem:[%s2916_s1 + $0x370] sm:$0xff] }
  0x40   :  { %1369 = vmatpush.bf16.msrb.mxu2 %v2250_v10  ;;  %v2320_v10 = vld [vmem:[%s2916_s1 + $0x3b0] sm:$0xff] }
  0x41   :  { %1383 = vmatpush.bf16.msrb.mxu3 %v2258_v20  ;;  %1342 = vmatmul.bf16.vlgmr.msrb.gmra.mxu0 %v1555_v23  ;;  %v2301_v20 = vld [vmem:[%s2916_s1 + $0x318] sm:$0xff] }
  0x42   :  { %1390 = vmatpush.bf16.msra.mxu0 %v2273_v11  ;;  %1356 = vmatmul.bf16.vlgmr.msrb.gmra.mxu1 %v1559_v26  ;;  %v2328_v11 = vld [vmem:[%s2916_s1 + $0x3f0] sm:$0xff]  ;;  %v2325_v23 = vld [vmem:[%s2916_s1 + $0x3d8] sm:$0xff] }
  0x43   :  { %1404 = vmatpush.bf16.msra.mxu1 %v2281_v12  ;;  %1370 = vmatmul.bf16.vlgmr.msrb.gmra.mxu2 %v1563_v24  ;;  %v2303_v12 = vld [vmem:[%s2916_s1 + $0x328] sm:$0xff]  ;;  %v2300_v24 = vld [vmem:[%s2916_s1 + $0x310] sm:$0xff] }
  0x44   :  { %1418 = vmatpush.bf16.msra.mxu2 %v2289_v17  ;;  %1384 = vmatmul.bf16.vlgmr.msrb.gmra.mxu3 %v1567_v27  ;;  %v2310_v17 = vld [vmem:[%s2916_s1 + $0x360] sm:$0xff]  ;;  %v2316_v26 = vld [vmem:[%s2916_s1 + $0x390] sm:$0xff] }
  0x45   :  { %1432 = vmatpush.bf16.msra.mxu3 %v2297_v25  ;;  %v2308_v25 = vld [vmem:[%s2916_s1 + $0x350] sm:$0xff] }
  0x46   :  { %1391 = vmatpush.bf16.msra.mxu0 %v2272_v28  ;;  %v2324_v27 = vld [vmem:[%s2916_s1 + $0x3d0] sm:$0xff]  ;;  %v2299_v28 = vld [vmem:[%s2916_s1 + $0x308] sm:$0xff] }
  0x47   :  { %1405 = vmatpush.bf16.msra.mxu1 %v2280_v29  ;;  %v2307_v29 = vld [vmem:[%s2916_s1 + $0x348] sm:$0xff] }
  0x48   :  { %1419 = vmatpush.bf16.msra.mxu2 %v2288_v30  ;;  %v2315_v30 = vld [vmem:[%s2916_s1 + $0x388] sm:$0xff] }
  0x49   :  { %1433 = vmatpush.bf16.msra.mxu3 %v2296_v31  ;;  %v2323_v31 = vld [vmem:[%s2916_s1 + $0x3c8] sm:$0xff] }
  0x4a   :  { %1392 = vmatpush.bf16.msra.mxu0 %v2271_v32  ;;  %v2298_v32 = vld [vmem:[%s2916_s1 + $0x300] sm:$0xff] }
  0x4b   :  { %1406 = vmatpush.bf16.msra.mxu1 %v2279_v33  ;;  %v2306_v33 = vld [vmem:[%s2916_s1 + $0x340] sm:$0xff] }
  0x4c   :  { %1420 = vmatpush.bf16.msra.mxu2 %v2287_v34  ;;  %v2314_v34 = vld [vmem:[%s2916_s1 + $0x380] sm:$0xff] }
  0x4d   :  { %1434 = vmatpush.bf16.msra.mxu3 %v2295_v35  ;;  %v1586_v35 = vld [vmem:[%s2917_s0 + $0x30] sm:$0xf] }
  0x4e   :  { %1393 = vmatpush.bf16.msra.mxu0 %v2270_v36  ;;  %v2199_v36 = vld [vmem:[%s2917_s0 + $0x74] sm:$0xf0] }
  0x4f   :  { %1407 = vmatpush.bf16.msra.mxu1 %v2278_v37  ;;  %v1594_v37 = vld [vmem:[%s2917_s0 + $0x38] sm:$0xf] }
  0x50   :  { %1421 = vmatpush.bf16.msra.mxu2 %v2286_v38  ;;  %v2200_v38 = vld [vmem:[%s2917_s0 + $0x7c] sm:$0xf0] }
  0x51   :  { %1435 = vmatpush.bf16.msra.mxu3 %v2294_v39  ;;  %v2190_v39 = vld [vmem:[%s2917_s0 + $0x34] sm:$0xf] }
  0x52   :  { %1394 = vmatpush.bf16.msra.mxu0 %v2269_v40  ;;  %v1588_v40 = vld [vmem:[%s2917_s0 + $0x78] sm:$0xf0] }
  0x53   :  { %1408 = vmatpush.bf16.msra.mxu1 %v2277_v41  ;;  %v2337_v41 = vld [vmem:[%s2916_s1 + $0x438] sm:$0xff] }
  0x54   :  { %1422 = vmatpush.bf16.msra.mxu2 %v2285_v42  ;;  %v2345_v42 = vld [vmem:[%s2916_s1 + $0x478] sm:$0xff] }
  0x55   :  { %1436 = vmatpush.bf16.msra.mxu3 %v2293_v43  ;;  %v2322_v43 = vld [vmem:[%s2916_s1 + $0x3c0] sm:$0xff] }
  0x56   :  { %1395 = vmatpush.bf16.msra.mxu0 %v2268_v44  ;;  %v1587_v44 = vor.u32 %v2199_v36, %v1586_v35 }
  0x57   :  { %1409 = vmatpush.bf16.msra.mxu1 %v2276_v45  ;;  %v2191_v45 = vld [vmem:[%s2917_s0 + $0x3c] sm:$0xf] }
  0x58   :  { %1423 = vmatpush.bf16.msra.mxu2 %v2284_v46  ;;  %v1596_v46 = vld [vmem:[%s2917_s0 + $0x80] sm:$0xf0] }
  0x59   :  { %1437 = vmatpush.bf16.msra.mxu3 %v2292_v47  ;;  %v1595_v47 = vor.u32 %v2200_v38, %v1594_v37 }
  0x5a   :  { %1396 = vmatpush.bf16.msra.mxu0 %v2267_v48  ;;  %v1591_v48 = vor.u32 %v2190_v39, %v1588_v40 }
  0x5b   :  { %1410 = vmatpush.bf16.msra.mxu1 %v2275_v49  ;;  %v1599_v49 = vor.u32 %v2191_v45, %v1596_v46 }
  0x5c   :  { %1424 = vmatpush.bf16.msra.mxu2 %v2283_v50  ;;  %v2336_v50 = vld [vmem:[%s2916_s1 + $0x430] sm:$0xff] }
  0x5d   :  { %1438 = vmatpush.bf16.msra.mxu3 %v2291_v51  ;;  %v2344_v51 = vld [vmem:[%s2916_s1 + $0x470] sm:$0xff] }
  0x5e   :  { %1397 = vmatpush.bf16.msra.mxu0 %v2266_v52  ;;  %v2335_v52 = vld [vmem:[%s2916_s1 + $0x428] sm:$0xff] }
  0x5f   :  { %1411 = vmatpush.bf16.msra.mxu1 %v2274_v53  ;;  %v2343_v53 = vld [vmem:[%s2916_s1 + $0x468] sm:$0xff] }
  0x60   :  { %1425 = vmatpush.bf16.msra.mxu2 %v2282_v54  ;;  %v2334_v54 = vld [vmem:[%s2916_s1 + $0x420] sm:$0xff] }
  0x61   :  { %1439 = vmatpush.bf16.msra.mxu3 %v2290_v0  ;;  %1398 = vmatmul.bf16.vlgmr.msra.gmra.mxu0 %v1571_v3  ;;  %v2201_v0 = vld [vmem:[%s2917_s0 + $0x84] sm:$0xf0]  ;;  %v1604_v3 = vld [vmem:[%s2917_s0 + $0x88] sm:$0xf0] }
  0x62   :  { %1446 = vmatpush.bf16.msrb.mxu0 %v2305_v55  ;;  %1412 = vmatmul.bf16.vlgmr.msra.gmra.mxu1 %v1575_v6  ;;  %v2342_v55 = vld [vmem:[%s2916_s1 + $0x460] sm:$0xff] }
  0x63   :  { %1460 = vmatpush.bf16.msrb.mxu1 %v2313_v56  ;;  %1426 = vmatmul.bf16.vlgmr.msra.gmra.mxu2 %v1579_v4  ;;  %v2333_v56 = vld [vmem:[%s2916_s1 + $0x418] sm:$0xff]  ;;  %v1603_v4 = vor.u32 %v2201_v0, %v1602_v63 }
  0x64   :  { %1474 = vmatpush.bf16.msrb.mxu2 %v2321_v61  ;;  %1440 = vmatmul.bf16.vlgmr.msra.gmra.mxu3 %v1583_v7  ;;  %v2339_v61 = vld [vmem:[%s2916_s1 + $0x448] sm:$0xff] }
  0x65   :  { %1488 = vmatpush.bf16.msrb.mxu3 %v2329_v5  ;;  %v1607_v5 = vor.u32 %v2192_v2, %v1604_v3 }
  0x66   :  { %1447 = vmatpush.bf16.msrb.mxu0 %v2304_v8 }
  0x67   :  { %1461 = vmatpush.bf16.msrb.mxu1 %v2312_v9 }
  0x68   :  { %1475 = vmatpush.bf16.msrb.mxu2 %v2320_v10 }
  0x69   :  { %1489 = vmatpush.bf16.msrb.mxu3 %v2328_v11 }
  0x6a   :  { %1448 = vmatpush.bf16.msrb.mxu0 %v2303_v12  ;;  %v2346_v12 = vld [vmem:[%s2918_s2] ss:$0 sm:$0xff] }
  0x6b   :  { %1462 = vmatpush.bf16.msrb.mxu1 %v2311_v13 }
  0x6c   :  { %1476 = vmatpush.bf16.msrb.mxu2 %v2319_v14 }
  0x6d   :  { %1490 = vmatpush.bf16.msrb.mxu3 %v2327_v15 }
  0x6e   :  { %1449 = vmatpush.bf16.msrb.mxu0 %v2302_v16 }
  0x6f   :  { %1463 = vmatpush.bf16.msrb.mxu1 %v2310_v17 }
  0x70   :  { %1477 = vmatpush.bf16.msrb.mxu2 %v2318_v18 }
  0x71   :  { %1491 = vmatpush.bf16.msrb.mxu3 %v2326_v19 }
  0x72   :  { %1450 = vmatpush.bf16.msrb.mxu0 %v2301_v20 }
  0x73   :  { %1464 = vmatpush.bf16.msrb.mxu1 %v2309_v21 }
  0x74   :  { %1478 = vmatpush.bf16.msrb.mxu2 %v2317_v22 }
  0x75   :  { %1492 = vmatpush.bf16.msrb.mxu3 %v2325_v23 }
  0x76   :  { %1451 = vmatpush.bf16.msrb.mxu0 %v2300_v24 }
  0x77   :  { %1465 = vmatpush.bf16.msrb.mxu1 %v2308_v25 }
  0x78   :  { %1479 = vmatpush.bf16.msrb.mxu2 %v2316_v26 }
  0x79   :  { %1493 = vmatpush.bf16.msrb.mxu3 %v2324_v27 }
  0x7a   :  { %1452 = vmatpush.bf16.msrb.mxu0 %v2299_v28 }
  0x7b   :  { %1466 = vmatpush.bf16.msrb.mxu1 %v2307_v29 }
  0x7c   :  { %1480 = vmatpush.bf16.msrb.mxu2 %v2315_v30 }
  0x7d   :  { %1494 = vmatpush.bf16.msrb.mxu3 %v2323_v31 }
  0x7e   :  { %1453 = vmatpush.bf16.msrb.mxu0 %v2298_v32 }
  0x7f   :  { %1467 = vmatpush.bf16.msrb.mxu1 %v2306_v33 }
  0x80   :  { %1481 = vmatpush.bf16.msrb.mxu2 %v2314_v34 }
  0x81   :  { %1495 = vmatpush.bf16.msrb.mxu3 %v2322_v43  ;;  %1454 = vmatmul.bf16.vlgmr.msrb.gmra.mxu0 %v1587_v44 }
  0x82   :  { %1502 = vmatpush.bf16.msra.mxu0 %v2337_v41  ;;  %1468 = vmatmul.bf16.vlgmr.msrb.gmra.mxu1 %v1591_v48 }
  0x83   :  { %1516 = vmatpush.bf16.msra.mxu1 %v2345_v42  ;;  %1482 = vmatmul.bf16.vlgmr.msrb.gmra.mxu2 %v1595_v47 }
  0x84   :  { %1496 = vmatmul.bf16.vlgmr.msrb.gmra.mxu3 %v1599_v49 }
  0x86   :  { %1503 = vmatpush.bf16.msra.mxu0 %v2336_v50 }
  0x87   :  { %1517 = vmatpush.bf16.msra.mxu1 %v2344_v51 }
  0x8a   :  { %1504 = vmatpush.bf16.msra.mxu0 %v2335_v52 }
  0x8b   :  { %1518 = vmatpush.bf16.msra.mxu1 %v2343_v53 }
  0x8e   :  { %1505 = vmatpush.bf16.msra.mxu0 %v2334_v54 }
  0x8f   :  { %1519 = vmatpush.bf16.msra.mxu1 %v2342_v55 }
  0x92   :  { %1506 = vmatpush.bf16.msra.mxu0 %v2333_v56 }
  0x93   :  { %1520 = vmatpush.bf16.msra.mxu1 %v2341_v57 }
  0x96   :  { %1507 = vmatpush.bf16.msra.mxu0 %v2332_v58 }
  0x97   :  { %1521 = vmatpush.bf16.msra.mxu1 %v2340_v59 }
  0x9a   :  { %1508 = vmatpush.bf16.msra.mxu0 %v2331_v60 }
  0x9b   :  { %1522 = vmatpush.bf16.msra.mxu1 %v2339_v61 }
  0x9e   :  { %1509 = vmatpush.bf16.msra.mxu0 %v2330_v62  ;;  %v1287_v6 = vpop.f32.mrf.mxu0 }
  0x9f   :  { %1523 = vmatpush.bf16.msra.mxu1 %v2338_v1  ;;  %v1301_v7 = vpop.f32.mrf.mxu1  ;;  %v1288_v15 = vadd.f32 %v2346_v12, %v1287_v6 }
  0xa1   :  { %1510 = vmatmul.bf16.vlgmr.msra.gmra.mxu0 %v1603_v4  ;;  %v1302_v18 = vadd.f32 %v1301_v7, %v1288_v15 }
  0xa2   :  { %1524 = vmatmul.bf16.vlgmr.msra.gmra.mxu1 %v1607_v5 }
  0xa6   :  { %v1315_v8 = vpop.f32.mrf.mxu2  ;;  %v1289_v9 = vpop.f32.mrf.mxu0 }
  0xa7   :  { %v1303_v10 = vpop.f32.mrf.mxu1  ;;  %v1329_v11 = vpop.f32.mrf.mxu3  ;;  %v1316_v20 = vadd.f32 %v1315_v8, %v1302_v18  ;;  %v1290_v24 = vadd.f32 %v2346_v12, %v1289_v9 }
  0xa9   :  { %v1330_v25 = vadd.f32 %v1329_v11, %v1316_v20  ;;  %v1304_v26 = vadd.f32 %v1303_v10, %v1290_v24 }
  0xae   :  { %v1317_v13 = vpop.f32.mrf.mxu2 }
  0xaf   :  { %v1331_v17 = vpop.f32.mrf.mxu3  ;;  %v1318_v31 = vadd.f32 %v1317_v13, %v1304_v26 }
  0xb1   :  { %v1332_v34 = vadd.f32 %v1331_v17, %v1318_v31 }
  0xbe   :  { %v1343_v14 = vpop.f32.mrf.mxu0 }
  0xbf   :  { %v1357_v16 = vpop.f32.mrf.mxu1  ;;  %v1344_v27 = vadd.f32 %v1343_v14, %v1330_v25 }
  0xc1   :  { %v1358_v32 = vadd.f32 %v1357_v16, %v1344_v27 }
  0xc6   :  { %v1371_v19 = vpop.f32.mrf.mxu2  ;;  %v1345_v21 = vpop.f32.mrf.mxu0 }
  0xc7   :  { %v1359_v22 = vpop.f32.mrf.mxu1  ;;  %v1385_v23 = vpop.f32.mrf.mxu3  ;;  %v1372_v35 = vadd.f32 %v1371_v19, %v1358_v32  ;;  %v1346_v37 = vadd.f32 %v1345_v21, %v1332_v34 }
  0xc9   :  { %v1386_v39 = vadd.f32 %v1385_v23, %v1372_v35  ;;  %v1360_v42 = vadd.f32 %v1359_v22, %v1346_v37 }
  0xce   :  { %v1373_v28 = vpop.f32.mrf.mxu2 }
  0xcf   :  { %v1387_v33 = vpop.f32.mrf.mxu3  ;;  %v1374_v44 = vadd.f32 %v1373_v28, %v1360_v42 }
  0xd1   :  { %v1388_v48 = vadd.f32 %v1387_v33, %v1374_v44 }
  0xde   :  { %v1399_v29 = vpop.f32.mrf.mxu0 }
  0xdf   :  { %v1413_v30 = vpop.f32.mrf.mxu1  ;;  %v1400_v43 = vadd.f32 %v1399_v29, %v1386_v39 }
  0xe1   :  { %v1414_v45 = vadd.f32 %v1413_v30, %v1400_v43 }
  0xe6   :  { %v1427_v36 = vpop.f32.mrf.mxu2  ;;  %v1401_v38 = vpop.f32.mrf.mxu0 }
  0xe7   :  { %v1415_v40 = vpop.f32.mrf.mxu1  ;;  %v1441_v41 = vpop.f32.mrf.mxu3  ;;  %v1428_v49 = vadd.f32 %v1427_v36, %v1414_v45  ;;  %v1402_v51 = vadd.f32 %v1401_v38, %v1388_v48 }
  0xe9   :  { %v1442_v53 = vadd.f32 %v1441_v41, %v1428_v49  ;;  %v1416_v54 = vadd.f32 %v1415_v40, %v1402_v51 }
  0xee   :  { %v1429_v46 = vpop.f32.mrf.mxu2 }
  0xef   :  { %v1443_v52 = vpop.f32.mrf.mxu3  ;;  %v1430_v57 = vadd.f32 %v1429_v46, %v1416_v54 }
  0xf1   :  { %v1444_v62 = vadd.f32 %v1443_v52, %v1430_v57 }
  0xfe   :  { %v1455_v47 = vpop.f32.mrf.mxu0 }
  0xff   :  { %v1469_v50 = vpop.f32.mrf.mxu1  ;;  %v1456_v55 = vadd.f32 %v1455_v47, %v1442_v53 }
 0x101   :  { %v1470_v59 = vadd.f32 %v1469_v50, %v1456_v55 }
 0x106   :  { %v1483_v56 = vpop.f32.mrf.mxu2  ;;  %v1457_v58 = vpop.f32.mrf.mxu0 }
 0x107   :  { %v1471_v60 = vpop.f32.mrf.mxu1  ;;  %v1497_v61 = vpop.f32.mrf.mxu3  ;;  %v1484_v63 = vadd.f32 %v1483_v56, %v1470_v59  ;;  %v1458_v0 = vadd.f32 %v1457_v58, %v1444_v62 }
 0x109   :  { %v1498_v1 = vadd.f32 %v1497_v61, %v1484_v63  ;;  %v1472_v4 = vadd.f32 %v1471_v60, %v1458_v0 }
 0x10e   :  { %v1485_v2 = vpop.f32.mrf.mxu2 }
 0x10f   :  { %v1486_v7 = vadd.f32 %v1485_v2, %v1472_v4  ;;  %v1499_v9 = vpop.f32.mrf.mxu3 }
 0x111   :  { %v1500_v10 = vadd.f32 %v1499_v9, %v1486_v7 }
 0x11e   :  { %v1511_v3 = vpop.f32.mrf.mxu0 }
 0x11f   :  { %v1512_v5 = vadd.f32 %v1511_v3, %v1498_v1  ;;  %v1525_v6 = vpop.f32.mrf.mxu1 }
 0x121   :  { %v1526_v8 = vadd.f32 %v1525_v6, %v1512_v5 }
 0x123   :  { %1530 = vst [vmem:[%s2919_s3] sm:$0xff] %v1526_v8 }
 0x126   :  { %v1513_v11 = vpop.f32.mrf.mxu0 }
 0x127   :  { %v1514_v12 = vadd.f32 %v1513_v11, %v1500_v10  ;;  %v1527_v13 = vpop.f32.mrf.mxu1 }
 0x129   :  { %v1528_v14 = vadd.f32 %v1527_v13, %v1514_v12 }
 0x12b   :  { %1531 = vst [vmem:[%s2919_s3 + $0x8] sm:$0xff] %v1528_v14 }

</bundles_post_ra>
